<compile_context>
chip_gen: v7x
topology: tpu7x:2x2x1
jax: 0.10.0
libtpu: 0.0.40
codegen_flags: <defaults>
</compile_context>

<pallas_src>
import functools

import jax
import jax.numpy as jnp
from jax.experimental import pallas as pl
from jax.experimental.pallas import tpu as pltpu


# ---------------------------------------------------------------------------
# Tiling helpers
# ---------------------------------------------------------------------------
_VMEM_BUDGET = 20 * 1024 * 1024     # conservative per-layer footprint target
_VMEM_LIMIT = 48 * 1024 * 1024      # raise scoped VMEM (v5e default is 16 MiB)


def _round_up(x, m):
    return (x + m - 1) // m * m


def _pick_tm(M, K, C):
    """Largest M tile that divides M, fits the VMEM budget, and (when possible)
    leaves >=2 grid steps so the 'parallel' axis can split across v7x's 2 TCs."""
    cands = [t for t in (2048, 1024, 512, 256, 128, 64, 32, 16, 8) if M % t == 0]
    if not cands:
        return M                     # odd tiny M -> single whole-M block
    tm = cands[-1]
    for t in cands:
        # resident weight (counted double-buffered to be safe) + A + bf16 out
        fp = 2 * (K * C * 2) + 2 * (t * K * 2) + 2 * (t * C * 2) + 8 * C * 4
        if fp <= _VMEM_BUDGET:
            tm = t
            break
    while M // tm < 2 and tm // 2 >= 8 and M % (tm // 2) == 0:
        tm //= 2
    return tm


# ---------------------------------------------------------------------------
# Pallas kernels
# ---------------------------------------------------------------------------
def _mm_bias_stats_kernel(a_ref, b_ref, bias_ref, o_ref, sum_ref, ssq_ref):
    """y = a @ b + bias (bf16 x bf16 -> f32 on the MXU), stored as bf16;
    per-M-tile f32 column sum / sum(x^2) emitted for the BatchNorm reduce."""
    y = jnp.dot(a_ref[...], b_ref[...], preferred_element_type=jnp.float32)
    y = y + bias_ref[...]
    o_ref[...] = y.astype(o_ref.dtype)
    sum_ref[...] = jnp.sum(y, axis=0, keepdims=True)[None]
    ssq_ref[...] = jnp.sum(y * y, axis=0, keepdims=True)[None]


def _mm_bias_lrelu_kernel(a_ref, b_ref, bias_ref, o_ref):
    """o = leaky_relu(a @ b + bias, 0.2) stored as bf16 — no-BN layers."""
    y = jnp.dot(a_ref[...], b_ref[...], preferred_element_type=jnp.float32)
    z = y + bias_ref[...]
    o_ref[...] = jnp.where(z >= 0.0, z, 0.2 * z).astype(o_ref.dtype)


def _scale_shift_lrelu_kernel(y_ref, sc_ref, sh_ref, o_ref):
    """Fused BatchNorm-affine + LeakyReLU(0.2): o = lrelu(y * sc + sh), bf16 out."""
    z = y_ref[...].astype(jnp.float32) * sc_ref[...] + sh_ref[...]
    o_ref[...] = jnp.where(z >= 0.0, z, 0.2 * z).astype(o_ref.dtype)


def _linear_head_kernel(x_ref, w_ref, b_ref, o_ref):
    """Tiny matrix-vector head: o[n, 0] = sum_d x[n, d] * w[0, d] + b."""
    x = x_ref[...].astype(jnp.float32)
    o_ref[...] = jnp.sum(x * w_ref[...], axis=-1, keepdims=True) + b_ref[...]


# ---------------------------------------------------------------------------
# Kernel wrappers
# ---------------------------------------------------------------------------
def matmul_bias_stats(a_bf16, b_bf16, bias_f32):
    """a: (M,K) bf16, b: (K,C) bf16, bias: (1,C) f32
    -> y (M,C) bf16, partial sums (gm,1,C) f32, partial sumsq (gm,1,C) f32."""
    M, K = a_bf16.shape
    C = b_bf16.shape[1]
    tm = _pick_tm(M, K, C)
    gm = M // tm
    return pl.pallas_call(
        _mm_bias_stats_kernel,
        out_shape=(
            jax.ShapeDtypeStruct((M, C), jnp.bfloat16),
            jax.ShapeDtypeStruct((gm, 1, C), jnp.float32),
            jax.ShapeDtypeStruct((gm, 1, C), jnp.float32),
        ),
        grid_spec=pltpu.PrefetchScalarGridSpec(
            num_scalar_prefetch=0,
            grid=(gm,),
            in_specs=[
                pl.BlockSpec((tm, K), lambda i: (i, 0)),
                pl.BlockSpec((K, C), lambda i: (0, 0)),   # constant index -> resident weight
                pl.BlockSpec((1, C), lambda i: (0, 0)),
            ],
            out_specs=(
                pl.BlockSpec((tm, C), lambda i: (i, 0)),
                pl.BlockSpec((1, 1, C), lambda i: (i, 0, 0)),
                pl.BlockSpec((1, 1, C), lambda i: (i, 0, 0)),
            ),
        ),
        compiler_params=pltpu.CompilerParams(
            dimension_semantics=("parallel",),
            vmem_limit_bytes=_VMEM_LIMIT),
    )(a_bf16, b_bf16, bias_f32)


def matmul_bias_lrelu(a_bf16, b_bf16, bias_f32):
    """a: (M,K) bf16, b: (K,C) bf16, bias: (1,C) f32 -> lrelu(a@b+bias) (M,C) bf16."""
    M, K = a_bf16.shape
    C = b_bf16.shape[1]
    tm = _pick_tm(M, K, C)
    gm = M // tm
    return pl.pallas_call(
        _mm_bias_lrelu_kernel,
        out_shape=jax.ShapeDtypeStruct((M, C), jnp.bfloat16),
        grid_spec=pltpu.PrefetchScalarGridSpec(
            num_scalar_prefetch=0,
            grid=(gm,),
            in_specs=[
                pl.BlockSpec((tm, K), lambda i: (i, 0)),
                pl.BlockSpec((K, C), lambda i: (0, 0)),   # resident weight
                pl.BlockSpec((1, C), lambda i: (0, 0)),
            ],
            out_specs=pl.BlockSpec((tm, C), lambda i: (i, 0)),
        ),
        compiler_params=pltpu.CompilerParams(
            dimension_semantics=("parallel",),
            vmem_limit_bytes=_VMEM_LIMIT),
    )(a_bf16, b_bf16, bias_f32)


def scale_shift_lrelu(y_bf16, scale_f32, shift_f32):
    """y: (M,C) bf16, scale/shift: (1,C) f32 -> lrelu(y*scale+shift) (M,C) bf16."""
    M, C = y_bf16.shape
    tm = _pick_tm(M, 0, C)
    gm = M // tm
    return pl.pallas_call(
        _scale_shift_lrelu_kernel,
        out_shape=jax.ShapeDtypeStruct((M, C), jnp.bfloat16),
        grid_spec=pltpu.PrefetchScalarGridSpec(
            num_scalar_prefetch=0,
            grid=(gm,),
            in_specs=[
                pl.BlockSpec((tm, C), lambda i: (i, 0)),
                pl.BlockSpec((1, C), lambda i: (0, 0)),
                pl.BlockSpec((1, C), lambda i: (0, 0)),
            ],
            out_specs=pl.BlockSpec((tm, C), lambda i: (i, 0)),
        ),
        compiler_params=pltpu.CompilerParams(
            dimension_semantics=("parallel",),
            vmem_limit_bytes=_VMEM_LIMIT),
    )(y_bf16, scale_f32, shift_f32)


def linear_head(x_bf16, w_perm, b):
    """x: (N, D) bf16, w_perm: (1, D) f32 (flatten-permutation pre-applied),
    b: (1,) f32 -> (N, 1) f32.  Tiny layer; single-block reduction kernel."""
    N, D = x_bf16.shape
    return pl.pallas_call(
        _linear_head_kernel,
        out_shape=jax.ShapeDtypeStruct((N, 1), jnp.float32),
        grid=(1,),
        in_specs=[
            pl.BlockSpec((N, D), lambda i: (0, 0)),
            pl.BlockSpec((1, D), lambda i: (0, 0)),
            pl.BlockSpec((1, 1), lambda i: (0, 0)),
        ],
        out_specs=pl.BlockSpec((N, 1), lambda i: (0, 0)),
    )(x_bf16, w_perm, b.reshape(1, 1))


# ---------------------------------------------------------------------------
# JAX glue: im2col, layer composition, parameter init
# ---------------------------------------------------------------------------
def im2col(x_nhwc, k, s, p, k_align=128):
    """x: (N, H, W, C) -> patches (N*Ho*Wo, Kp), column order (kh, kw, cin).
    K alignment padding is folded into the same concatenate/copy pass."""
    N, H, W, C = x_nhwc.shape
    xp = jnp.pad(x_nhwc, ((0, 0), (p, p), (p, p), (0, 0)))
    Ho = (H + 2 * p - k) // s + 1
    Wo = (W + 2 * p - k) // s + 1
    cols = [xp[:, di:di + (Ho - 1) * s + 1:s, dj:dj + (Wo - 1) * s + 1:s, :]
            for di in range(k) for dj in range(k)]
    K = k * k * C
    K_pad = _round_up(K, k_align)
    if K_pad != K:
        cols.append(jnp.zeros((N, Ho, Wo, K_pad - K), x_nhwc.dtype))
    a = jnp.concatenate(cols, axis=-1)                 # (N, Ho, Wo, K_pad)
    return a.reshape(N * Ho * Wo, K_pad), (N, Ho, Wo)


def conv_block(x_nhwc, w, b, gamma, beta, *, stride, pad, use_bn, cin):
    """Conv2d (+ optional training-mode BatchNorm2d) + LeakyReLU(0.2).
    Input may carry lane-padded channels (zeros) from the previous layer; the
    output carries Cout padded to a multiple of 128 (padded channels = 0)."""
    cout, _cin_w, k, _ = w.shape
    c_pad = _round_up(max(cout, 128), 128)             # lane-dense output channels

    # Slice back to the real cin so the padded channels never inflate A traffic.
    a, (N, Ho, Wo) = im2col(x_nhwc[..., :cin], k, stride, pad)
    K_pad = a.shape[1]

    # PyTorch weight (Cout, Cin, kh, kw) -> (kh*kw*Cin, Cout) matching im2col
    # column order; zero-pad K rows and Cout columns (trace-time, tiny).
    wmat = jnp.transpose(w, (2, 3, 1, 0)).reshape(k * k * cin, cout)
    wmat = jnp.pad(wmat, ((0, K_pad - k * k * cin),
                          (0, c_pad - cout))).astype(jnp.bfloat16)
    bias = jnp.pad(b, (0, c_pad - cout)).reshape(1, c_pad).astype(jnp.float32)

    if use_bn:
        y, psum, pssq = matmul_bias_stats(a, wmat, bias)
        M = y.shape[0]
        mean = jnp.sum(psum, axis=0) / M                       # (1, c_pad) f32
        # E[x^2] - mean^2 in f32 (stats taken on the pre-cast f32 y), clamped.
        # TODO(synk): a shifted/two-pass variance would be safer if |mean| >> std.
        var = jnp.maximum(jnp.sum(pssq, axis=0) / M - mean * mean, 0.0)
        gamma_p = jnp.pad(gamma, (0, c_pad - cout)).reshape(1, c_pad)
        beta_p = jnp.pad(beta, (0, c_pad - cout)).reshape(1, c_pad)
        scale = (gamma_p / jnp.sqrt(var + 1e-5)).astype(jnp.float32)
        shift = (beta_p - mean * scale).astype(jnp.float32)
        out = scale_shift_lrelu(y, scale, shift)
    else:
        out = matmul_bias_lrelu(a, wmat, bias)

    return out.reshape(N, Ho, Wo, c_pad)


def layer_configs(ch):
    # (cin, cout, k, stride, pad, has_bn) -- mirrors the nn.Sequential
    return [
        (3,        ch // 8, 3, 1, 1, False),
        (ch // 8,  ch // 4, 4, 2, 1, True),
        (ch // 4,  ch // 4, 3, 1, 1, True),
        (ch // 4,  ch // 2, 4, 2, 1, True),
        (ch // 2,  ch // 2, 3, 1, 1, True),
        (ch // 2,  ch,      4, 2, 1, True),
        (ch,       ch,      3, 1, 1, True),
    ]


def init_params(key, ch, bw):
    conv_params = []
    for i, (cin, cout, k, s, p, bn) in enumerate(layer_configs(ch)):
        kw_, kb_ = jax.random.split(jax.random.fold_in(key, i))
        conv_params.append(dict(
            w=0.05 * jax.random.normal(kw_, (cout, cin, k, k), jnp.float32),
            b=0.05 * jax.random.normal(kb_, (cout,), jnp.float32),
            gamma=jnp.ones((cout,), jnp.float32),
            beta=jnp.zeros((cout,), jnp.float32),
        ))
    kl1, kl2 = jax.random.split(jax.random.fold_in(key, 100))
    D = bw * bw * ch
    # PyTorch-layout linear weight: column j <-> NCHW flat index c*bw*bw + h*bw + w.
    w_ln = 0.05 * jax.random.normal(kl1, (1, D), jnp.float32)
    b_ln = 0.05 * jax.random.normal(kl2, (1,), jnp.float32)
    # Fold the NCHW .view() flatten permutation into the weight once at init,
    # laid out over the lane-padded channel dim the last conv block produces
    # (zeros for padded channels), so the forward uses a free NHWC reshape.
    ch_pad = _round_up(max(ch, 128), 128)
    w_hwc = jnp.transpose(w_ln.reshape(ch, bw, bw), (1, 2, 0))     # (bw, bw, ch)
    w_hwc = jnp.pad(w_hwc, ((0, 0), (0, 0), (0, ch_pad - ch)))
    w_ln_perm = w_hwc.reshape(1, bw * bw * ch_pad)
    return conv_params, w_ln_perm, b_ln


def discriminator_forward(x_nchw, conv_params, w_ln_perm, b_ln, *, bw, ch):
    cfgs = layer_configs(ch)            # static config (stride/pad/bn) baked in
    x = jnp.transpose(x_nchw, (0, 2, 3, 1)).astype(jnp.bfloat16)   # NCHW -> NHWC
    for p, (cin, _cout, _k, stride, pad, has_bn) in zip(conv_params, cfgs):
        x = conv_block(x, p["w"], p["b"], p["gamma"], p["beta"],
                       stride=stride, pad=pad, use_bn=has_bn, cin=cin)
    N = x.shape[0]
    ch_pad = x.shape[-1]
    flat = x.reshape(N, bw * bw * ch_pad)   # NHWC flatten; weight already permuted/padded
    return linear_head(flat, w_ln_perm, b_ln)


# ---------------------------------------------------------------------------
if __name__ == "__main__":
    key = jax.random.PRNGKey(0)
    ch = 64          # small stand-in for the module's ch=512 hyperparameter
    bw = 4           # 32x32 input -> three stride-2 convs -> 4x4
    N = 2

    x = jax.random.normal(jax.random.fold_in(key, 7), (N, 3, 32, 32), jnp.float32)
    conv_params, w_ln_perm, b_ln = init_params(jax.random.fold_in(key, 1),
                                               ch=ch, bw=bw)

    fwd = jax.jit(functools.partial(discriminator_forward, bw=bw, ch=ch))
    out = fwd(x, conv_params, w_ln_perm, b_ln)
    jax.block_until_ready(out)
    assert out.shape == (N, 1) and out.dtype == jnp.float32
    print("KERNEL_OK")
</pallas_src>

<mosaic_0001>
module attributes {stable_mosaic.version = 11 : i64} {
  func.func @_mm_bias_lrelu_kernel(%arg0: i32, %arg1: memref<1024x128xbf16, #tpu.memory_space<vmem>>, %arg2: memref<128x128xbf16, #tpu.memory_space<vmem>>, %arg3: memref<1x128xf32, #tpu.memory_space<vmem>>, %arg4: memref<1024x128xbf16, #tpu.memory_space<vmem>>) attributes {dimension_semantics = [#tpu.dimension_semantics<parallel>], iteration_bounds = array<i64: 2>, scalar_prefetch = 0 : i64, scratch_operands = 0 : i64, tpu.core_type = #tpu.core_type<tc>, window_params = [{transform_indices = @transform_0, window_bounds = array<i64: 1024, 128>}, {pipeline_mode = #tpu.pipeline_mode<synchronous>, transform_indices = @transform_1, window_bounds = array<i64: 128, 128>}, {pipeline_mode = #tpu.pipeline_mode<synchronous>, transform_indices = @transform_2, window_bounds = array<i64: 1, 128>}, {transform_indices = @transform_3, window_bounds = array<i64: 1024, 128>}]} {
    %c0 = arith.constant 0 : index
    %c0_0 = arith.constant 0 : index
    %0 = vector.load %arg1[%c0, %c0_0] : memref<1024x128xbf16, #tpu.memory_space<vmem>>, vector<1024x128xbf16>
    %c0_1 = arith.constant 0 : index
    %c0_2 = arith.constant 0 : index
    %1 = vector.load %arg2[%c0_1, %c0_2] : memref<128x128xbf16, #tpu.memory_space<vmem>>, vector<128x128xbf16>
    %cst = arith.constant dense<0.000000e+00> : vector<1024x128xf32>
    %2 = tpu.matmul %0, %1, %cst {dimension_numbers = #tpu.dot_dimension_numbers<[1], [0], [0], [1], [0, 0, 1, 1], [], []>} : vector<1024x128xbf16>, vector<128x128xbf16>, vector<1024x128xf32> -> vector<1024x128xf32>
    %c0_3 = arith.constant 0 : index
    %c0_4 = arith.constant 0 : index
    %3 = vector.load %arg3[%c0_3, %c0_4] : memref<1x128xf32, #tpu.memory_space<vmem>>, vector<1x128xf32>
    %4 = vector.broadcast %3 : vector<1x128xf32> to vector<1024x128xf32>
    %5 = arith.addf %2, %4 : vector<1024x128xf32>
    %cst_5 = arith.constant 0.000000e+00 : f32
    %6 = vector.broadcast %cst_5 : f32 to vector<1024x128xf32>
    %7 = arith.cmpf oge, %5, %6 : vector<1024x128xf32>
    %cst_6 = arith.constant 2.000000e-01 : f32
    %8 = vector.broadcast %cst_6 : f32 to vector<1024x128xf32>
    %9 = arith.mulf %8, %5 : vector<1024x128xf32>
    %10 = arith.select %7, %5, %9 : vector<1024x128xi1>, vector<1024x128xf32>
    %11 = arith.truncf %10 : vector<1024x128xf32> to vector<1024x128xbf16>
    %c0_7 = arith.constant 0 : index
    %c0_8 = arith.constant 0 : index
    %12 = vector.load %arg4[%c0_7, %c0_8] : memref<1024x128xbf16, #tpu.memory_space<vmem>>, vector<1024x128xbf16>
    tpu.vector_store %arg4[%c0_7, %c0_8], %11 {strides = array<i32>} : memref<1024x128xbf16, #tpu.memory_space<vmem>>, vector<1024x128xbf16>,
    return
  }
  func.func @transform_0(%arg0: i32) -> (i32, i32) {
    %c0_i32 = arith.constant 0 : i32
    %c0_i32_0 = arith.constant 0 : i32
    return %arg0, %c0_i32 : i32, i32
  }
  func.func @transform_1(%arg0: i32) -> (i32, i32) {
    %c0_i32 = arith.constant 0 : i32
    %c0_i32_0 = arith.constant 0 : i32
    %c0_i32_1 = arith.constant 0 : i32
    return %c0_i32, %c0_i32_0 : i32, i32
  }
  func.func @transform_2(%arg0: i32) -> (i32, i32) {
    %c0_i32 = arith.constant 0 : i32
    %c0_i32_0 = arith.constant 0 : i32
    %c0_i32_1 = arith.constant 0 : i32
    return %c0_i32, %c0_i32_0 : i32, i32
  }
  func.func @transform_3(%arg0: i32) -> (i32, i32) {
    %c0_i32 = arith.constant 0 : i32
    %c0_i32_0 = arith.constant 0 : i32
    return %arg0, %c0_i32 : i32, i32
  }
}

module attributes {stable_mosaic.version = 11 : i64} {
  func.func @_mm_bias_stats_kernel(%arg0: i32, %arg1: memref<256x128xbf16, #tpu.memory_space<vmem>>, %arg2: memref<128x128xbf16, #tpu.memory_space<vmem>>, %arg3: memref<1x128xf32, #tpu.memory_space<vmem>>, %arg4: memref<256x128xbf16, #tpu.memory_space<vmem>>, %arg5: memref<1x1x128xf32, #tpu.memory_space<vmem>>, %arg6: memref<1x1x128xf32, #tpu.memory_space<vmem>>) attributes {dimension_semantics = [#tpu.dimension_semantics<parallel>], iteration_bounds = array<i64: 2>, scalar_prefetch = 0 : i64, scratch_operands = 0 : i64, tpu.core_type = #tpu.core_type<tc>, window_params = [{transform_indices = @transform_0, window_bounds = array<i64: 256, 128>}, {pipeline_mode = #tpu.pipeline_mode<synchronous>, transform_indices = @transform_1, window_bounds = array<i64: 128, 128>}, {pipeline_mode = #tpu.pipeline_mode<synchronous>, transform_indices = @transform_2, window_bounds = array<i64: 1, 128>}, {transform_indices = @transform_3, window_bounds = array<i64: 256, 128>}, {transform_indices = @transform_4, window_bounds = array<i64: 1, 1, 128>}, {transform_indices = @transform_5, window_bounds = array<i64: 1, 1, 128>}]} {
    %c0 = arith.constant 0 : index
    %c0_0 = arith.constant 0 : index
    %0 = vector.load %arg1[%c0, %c0_0] : memref<256x128xbf16, #tpu.memory_space<vmem>>, vector<256x128xbf16>
    %c0_1 = arith.constant 0 : index
    %c0_2 = arith.constant 0 : index
    %1 = vector.load %arg2[%c0_1, %c0_2] : memref<128x128xbf16, #tpu.memory_space<vmem>>, vector<128x128xbf16>
    %cst = arith.constant dense<0.000000e+00> : vector<256x128xf32>
    %2 = tpu.matmul %0, %1, %cst {dimension_numbers = #tpu.dot_dimension_numbers<[1], [0], [0], [1], [0, 0, 1, 1], [], []>} : vector<256x128xbf16>, vector<128x128xbf16>, vector<256x128xf32> -> vector<256x128xf32>
    %c0_3 = arith.constant 0 : index
    %c0_4 = arith.constant 0 : index
    %3 = vector.load %arg3[%c0_3, %c0_4] : memref<1x128xf32, #tpu.memory_space<vmem>>, vector<1x128xf32>
    %4 = vector.broadcast %3 : vector<1x128xf32> to vector<256x128xf32>
    %5 = arith.addf %2, %4 : vector<256x128xf32>
    %6 = arith.truncf %5 : vector<256x128xf32> to vector<256x128xbf16>
    %c0_5 = arith.constant 0 : index
    %c0_6 = arith.constant 0 : index
    %7 = vector.load %arg4[%c0_5, %c0_6] : memref<256x128xbf16, #tpu.memory_space<vmem>>, vector<256x128xbf16>
    tpu.vector_store %arg4[%c0_5, %c0_6], %6 {strides = array<i32>} : memref<256x128xbf16, #tpu.memory_space<vmem>>, vector<256x128xbf16>,
    %cst_7 = arith.constant dense<0.000000e+00> : vector<128xf32>
    %8 = vector.multi_reduction <add>, %5, %cst_7 [0] : vector<256x128xf32> to vector<128xf32>
    %9 = vector.shape_cast %8 : vector<128xf32> to vector<1x128xf32>
    %10 = vector.shape_cast %9 : vector<1x128xf32> to vector<1x1x128xf32>
    %c0_8 = arith.constant 0 : index
    %c0_9 = arith.constant 0 : index
    %c0_10 = arith.constant 0 : index
    %11 = vector.load %arg5[%c0_8, %c0_9, %c0_10] : memref<1x1x128xf32, #tpu.memory_space<vmem>>, vector<1x1x128xf32>
    tpu.vector_store %arg5[%c0_8, %c0_9, %c0_10], %10 {strides = array<i32>} : memref<1x1x128xf32, #tpu.memory_space<vmem>>, vector<1x1x128xf32>,
    %12 = arith.mulf %5, %5 : vector<256x128xf32>
    %cst_11 = arith.constant dense<0.000000e+00> : vector<128xf32>
    %13 = vector.multi_reduction <add>, %12, %cst_11 [0] : vector<256x128xf32> to vector<128xf32>
    %14 = vector.shape_cast %13 : vector<128xf32> to vector<1x128xf32>
    %15 = vector.shape_cast %14 : vector<1x128xf32> to vector<1x1x128xf32>
    %c0_12 = arith.constant 0 : index
    %c0_13 = arith.constant 0 : index
    %c0_14 = arith.constant 0 : index
    %16 = vector.load %arg6[%c0_12, %c0_13, %c0_14] : memref<1x1x128xf32, #tpu.memory_space<vmem>>, vector<1x1x128xf32>
    tpu.vector_store %arg6[%c0_12, %c0_13, %c0_14], %15 {strides = array<i32>} : memref<1x1x128xf32, #tpu.memory_space<vmem>>, vector<1x1x128xf32>,
    return
  }
  func.func @transform_0(%arg0: i32) -> (i32, i32) {
    %c0_i32 = arith.constant 0 : i32
    %c0_i32_0 = arith.constant 0 : i32
    return %arg0, %c0_i32 : i32, i32
  }
  func.func @transform_1(%arg0: i32) -> (i32, i32) {
    %c0_i32 = arith.constant 0 : i32
    %c0_i32_0 = arith.constant 0 : i32
    %c0_i32_1 = arith.constant 0 : i32
    return %c0_i32, %c0_i32_0 : i32, i32
  }
  func.func @transform_2(%arg0: i32) -> (i32, i32) {
    %c0_i32 = arith.constant 0 : i32
    %c0_i32_0 = arith.constant 0 : i32
    %c0_i32_1 = arith.constant 0 : i32
    return %c0_i32, %c0_i32_0 : i32, i32
  }
  func.func @transform_3(%arg0: i32) -> (i32, i32) {
    %c0_i32 = arith.constant 0 : i32
    %c0_i32_0 = arith.constant 0 : i32
    return %arg0, %c0_i32 : i32, i32
  }
  func.func @transform_4(%arg0: i32) -> (i32, i32, i32) {
    %c0_i32 = arith.constant 0 : i32
    %c0_i32_0 = arith.constant 0 : i32
    %c0_i32_1 = arith.constant 0 : i32
    return %arg0, %c0_i32, %c0_i32_0 : i32, i32, i32
  }
  func.func @transform_5(%arg0: i32) -> (i32, i32, i32) {
    %c0_i32 = arith.constant 0 : i32
    %c0_i32_0 = arith.constant 0 : i32
    %c0_i32_1 = arith.constant 0 : i32
    return %arg0, %c0_i32, %c0_i32_0 : i32, i32, i32
  }
}

module attributes {stable_mosaic.version = 11 : i64} {
  func.func @_scale_shift_lrelu_kernel(%arg0: i32, %arg1: memref<256x128xbf16, #tpu.memory_space<vmem>>, %arg2: memref<1x128xf32, #tpu.memory_space<vmem>>, %arg3: memref<1x128xf32, #tpu.memory_space<vmem>>, %arg4: memref<256x128xbf16, #tpu.memory_space<vmem>>) attributes {dimension_semantics = [#tpu.dimension_semantics<parallel>], iteration_bounds = array<i64: 2>, scalar_prefetch = 0 : i64, scratch_operands = 0 : i64, tpu.core_type = #tpu.core_type<tc>, window_params = [{transform_indices = @transform_0, window_bounds = array<i64: 256, 128>}, {pipeline_mode = #tpu.pipeline_mode<synchronous>, transform_indices = @transform_1, window_bounds = array<i64: 1, 128>}, {pipeline_mode = #tpu.pipeline_mode<synchronous>, transform_indices = @transform_2, window_bounds = array<i64: 1, 128>}, {transform_indices = @transform_3, window_bounds = array<i64: 256, 128>}]} {
    %c0 = arith.constant 0 : index
    %c0_0 = arith.constant 0 : index
    %0 = vector.load %arg1[%c0, %c0_0] : memref<256x128xbf16, #tpu.memory_space<vmem>>, vector<256x128xbf16>
    %1 = arith.extf %0 : vector<256x128xbf16> to vector<256x128xf32>
    %c0_1 = arith.constant 0 : index
    %c0_2 = arith.constant 0 : index
    %2 = vector.load %arg2[%c0_1, %c0_2] : memref<1x128xf32, #tpu.memory_space<vmem>>, vector<1x128xf32>
    %3 = vector.broadcast %2 : vector<1x128xf32> to vector<256x128xf32>
    %4 = arith.mulf %1, %3 : vector<256x128xf32>
    %c0_3 = arith.constant 0 : index
    %c0_4 = arith.constant 0 : index
    %5 = vector.load %arg3[%c0_3, %c0_4] : memref<1x128xf32, #tpu.memory_space<vmem>>, vector<1x128xf32>
    %6 = vector.broadcast %5 : vector<1x128xf32> to vector<256x128xf32>
    %7 = arith.addf %4, %6 : vector<256x128xf32>
    %cst = arith.constant 0.000000e+00 : f32
    %8 = vector.broadcast %cst : f32 to vector<256x128xf32>
    %9 = arith.cmpf oge, %7, %8 : vector<256x128xf32>
    %cst_5 = arith.constant 2.000000e-01 : f32
    %10 = vector.broadcast %cst_5 : f32 to vector<256x128xf32>
    %11 = arith.mulf %10, %7 : vector<256x128xf32>
    %12 = arith.select %9, %7, %11 : vector<256x128xi1>, vector<256x128xf32>
    %13 = arith.truncf %12 : vector<256x128xf32> to vector<256x128xbf16>
    %c0_6 = arith.constant 0 : index
    %c0_7 = arith.constant 0 : index
    %14 = vector.load %arg4[%c0_6, %c0_7] : memref<256x128xbf16, #tpu.memory_space<vmem>>, vector<256x128xbf16>
    tpu.vector_store %arg4[%c0_6, %c0_7], %13 {strides = array<i32>} : memref<256x128xbf16, #tpu.memory_space<vmem>>, vector<256x128xbf16>,
    return
  }
  func.func @transform_0(%arg0: i32) -> (i32, i32) {
    %c0_i32 = arith.constant 0 : i32
    %c0_i32_0 = arith.constant 0 : i32
    return %arg0, %c0_i32 : i32, i32
  }
  func.func @transform_1(%arg0: i32) -> (i32, i32) {
    %c0_i32 = arith.constant 0 : i32
    %c0_i32_0 = arith.constant 0 : i32
    %c0_i32_1 = arith.constant 0 : i32
    return %c0_i32, %c0_i32_0 : i32, i32
  }
  func.func @transform_2(%arg0: i32) -> (i32, i32) {
    %c0_i32 = arith.constant 0 : i32
    %c0_i32_0 = arith.constant 0 : i32
    %c0_i32_1 = arith.constant 0 : i32
    return %c0_i32, %c0_i32_0 : i32, i32
  }
  func.func @transform_3(%arg0: i32) -> (i32, i32) {
    %c0_i32 = arith.constant 0 : i32
    %c0_i32_0 = arith.constant 0 : i32
    return %arg0, %c0_i32 : i32, i32
  }
}

module attributes {stable_mosaic.version = 11 : i64} {
  func.func @_mm_bias_stats_kernel(%arg0: i32, %arg1: memref<256x256xbf16, #tpu.memory_space<vmem>>, %arg2: memref<256x128xbf16, #tpu.memory_space<vmem>>, %arg3: memref<1x128xf32, #tpu.memory_space<vmem>>, %arg4: memref<256x128xbf16, #tpu.memory_space<vmem>>, %arg5: memref<1x1x128xf32, #tpu.memory_space<vmem>>, %arg6: memref<1x1x128xf32, #tpu.memory_space<vmem>>) attributes {dimension_semantics = [#tpu.dimension_semantics<parallel>], iteration_bounds = array<i64: 2>, scalar_prefetch = 0 : i64, scratch_operands = 0 : i64, tpu.core_type = #tpu.core_type<tc>, window_params = [{transform_indices = @transform_0, window_bounds = array<i64: 256, 256>}, {pipeline_mode = #tpu.pipeline_mode<synchronous>, transform_indices = @transform_1, window_bounds = array<i64: 256, 128>}, {pipeline_mode = #tpu.pipeline_mode<synchronous>, transform_indices = @transform_2, window_bounds = array<i64: 1, 128>}, {transform_indices = @transform_3, window_bounds = array<i64: 256, 128>}, {transform_indices = @transform_4, window_bounds = array<i64: 1, 1, 128>}, {transform_indices = @transform_5, window_bounds = array<i64: 1, 1, 128>}]} {
    %c0 = arith.constant 0 : index
    %c0_0 = arith.constant 0 : index
    %0 = vector.load %arg1[%c0, %c0_0] : memref<256x256xbf16, #tpu.memory_space<vmem>>, vector<256x256xbf16>
    %c0_1 = arith.constant 0 : index
    %c0_2 = arith.constant 0 : index
    %1 = vector.load %arg2[%c0_1, %c0_2] : memref<256x128xbf16, #tpu.memory_space<vmem>>, vector<256x128xbf16>
    %cst = arith.constant dense<0.000000e+00> : vector<256x128xf32>
    %2 = tpu.matmul %0, %1, %cst {dimension_numbers = #tpu.dot_dimension_numbers<[1], [0], [0], [1], [0, 0, 1, 1], [], []>} : vector<256x256xbf16>, vector<256x128xbf16>, vector<256x128xf32> -> vector<256x128xf32>
    %c0_3 = arith.constant 0 : index
    %c0_4 = arith.constant 0 : index
    %3 = vector.load %arg3[%c0_3, %c0_4] : memref<1x128xf32, #tpu.memory_space<vmem>>, vector<1x128xf32>
    %4 = vector.broadcast %3 : vector<1x128xf32> to vector<256x128xf32>
    %5 = arith.addf %2, %4 : vector<256x128xf32>
    %6 = arith.truncf %5 : vector<256x128xf32> to vector<256x128xbf16>
    %c0_5 = arith.constant 0 : index
    %c0_6 = arith.constant 0 : index
    %7 = vector.load %arg4[%c0_5, %c0_6] : memref<256x128xbf16, #tpu.memory_space<vmem>>, vector<256x128xbf16>
    tpu.vector_store %arg4[%c0_5, %c0_6], %6 {strides = array<i32>} : memref<256x128xbf16, #tpu.memory_space<vmem>>, vector<256x128xbf16>,
    %cst_7 = arith.constant dense<0.000000e+00> : vector<128xf32>
    %8 = vector.multi_reduction <add>, %5, %cst_7 [0] : vector<256x128xf32> to vector<128xf32>
    %9 = vector.shape_cast %8 : vector<128xf32> to vector<1x128xf32>
    %10 = vector.shape_cast %9 : vector<1x128xf32> to vector<1x1x128xf32>
    %c0_8 = arith.constant 0 : index
    %c0_9 = arith.constant 0 : index
    %c0_10 = arith.constant 0 : index
    %11 = vector.load %arg5[%c0_8, %c0_9, %c0_10] : memref<1x1x128xf32, #tpu.memory_space<vmem>>, vector<1x1x128xf32>
    tpu.vector_store %arg5[%c0_8, %c0_9, %c0_10], %10 {strides = array<i32>} : memref<1x1x128xf32, #tpu.memory_space<vmem>>, vector<1x1x128xf32>,
    %12 = arith.mulf %5, %5 : vector<256x128xf32>
    %cst_11 = arith.constant dense<0.000000e+00> : vector<128xf32>
    %13 = vector.multi_reduction <add>, %12, %cst_11 [0] : vector<256x128xf32> to vector<128xf32>
    %14 = vector.shape_cast %13 : vector<128xf32> to vector<1x128xf32>
    %15 = vector.shape_cast %14 : vector<1x128xf32> to vector<1x1x128xf32>
    %c0_12 = arith.constant 0 : index
    %c0_13 = arith.constant 0 : index
    %c0_14 = arith.constant 0 : index
    %16 = vector.load %arg6[%c0_12, %c0_13, %c0_14] : memref<1x1x128xf32, #tpu.memory_space<vmem>>, vector<1x1x128xf32>
    tpu.vector_store %arg6[%c0_12, %c0_13, %c0_14], %15 {strides = array<i32>} : memref<1x1x128xf32, #tpu.memory_space<vmem>>, vector<1x1x128xf32>,
    return
  }
  func.func @transform_0(%arg0: i32) -> (i32, i32) {
    %c0_i32 = arith.constant 0 : i32
    %c0_i32_0 = arith.constant 0 : i32
    return %arg0, %c0_i32 : i32, i32
  }
  func.func @transform_1(%arg0: i32) -> (i32, i32) {
    %c0_i32 = arith.constant 0 : i32
    %c0_i32_0 = arith.constant 0 : i32
    %c0_i32_1 = arith.constant 0 : i32
    return %c0_i32, %c0_i32_0 : i32, i32
  }
  func.func @transform_2(%arg0: i32) -> (i32, i32) {
    %c0_i32 = arith.constant 0 : i32
    %c0_i32_0 = arith.constant 0 : i32
    %c0_i32_1 = arith.constant 0 : i32
    return %c0_i32, %c0_i32_0 : i32, i32
  }
  func.func @transform_3(%arg0: i32) -> (i32, i32) {
    %c0_i32 = arith.constant 0 : i32
    %c0_i32_0 = arith.constant 0 : i32
    return %arg0, %c0_i32 : i32, i32
  }
  func.func @transform_4(%arg0: i32) -> (i32, i32, i32) {
    %c0_i32 = arith.constant 0 : i32
    %c0_i32_0 = arith.constant 0 : i32
    %c0_i32_1 = arith.constant 0 : i32
    return %arg0, %c0_i32, %c0_i32_0 : i32, i32, i32
  }
  func.func @transform_5(%arg0: i32) -> (i32, i32, i32) {
    %c0_i32 = arith.constant 0 : i32
    %c0_i32_0 = arith.constant 0 : i32
    %c0_i32_1 = arith.constant 0 : i32
    return %arg0, %c0_i32, %c0_i32_0 : i32, i32, i32
  }
}

module attributes {stable_mosaic.version = 11 : i64} {
  func.func @_scale_shift_lrelu_kernel(%arg0: i32, %arg1: memref<64x128xbf16, #tpu.memory_space<vmem>>, %arg2: memref<1x128xf32, #tpu.memory_space<vmem>>, %arg3: memref<1x128xf32, #tpu.memory_space<vmem>>, %arg4: memref<64x128xbf16, #tpu.memory_space<vmem>>) attributes {dimension_semantics = [#tpu.dimension_semantics<parallel>], iteration_bounds = array<i64: 2>, scalar_prefetch = 0 : i64, scratch_operands = 0 : i64, tpu.core_type = #tpu.core_type<tc>, window_params = [{transform_indices = @transform_0, window_bounds = array<i64: 64, 128>}, {pipeline_mode = #tpu.pipeline_mode<synchronous>, transform_indices = @transform_1, window_bounds = array<i64: 1, 128>}, {pipeline_mode = #tpu.pipeline_mode<synchronous>, transform_indices = @transform_2, window_bounds = array<i64: 1, 128>}, {transform_indices = @transform_3, window_bounds = array<i64: 64, 128>}]} {
    %c0 = arith.constant 0 : index
    %c0_0 = arith.constant 0 : index
    %0 = vector.load %arg1[%c0, %c0_0] : memref<64x128xbf16, #tpu.memory_space<vmem>>, vector<64x128xbf16>
    %1 = arith.extf %0 : vector<64x128xbf16> to vector<64x128xf32>
    %c0_1 = arith.constant 0 : index
    %c0_2 = arith.constant 0 : index
    %2 = vector.load %arg2[%c0_1, %c0_2] : memref<1x128xf32, #tpu.memory_space<vmem>>, vector<1x128xf32>
    %3 = vector.broadcast %2 : vector<1x128xf32> to vector<64x128xf32>
    %4 = arith.mulf %1, %3 : vector<64x128xf32>
    %c0_3 = arith.constant 0 : index
    %c0_4 = arith.constant 0 : index
    %5 = vector.load %arg3[%c0_3, %c0_4] : memref<1x128xf32, #tpu.memory_space<vmem>>, vector<1x128xf32>
    %6 = vector.broadcast %5 : vector<1x128xf32> to vector<64x128xf32>
    %7 = arith.addf %4, %6 : vector<64x128xf32>
    %cst = arith.constant 0.000000e+00 : f32
    %8 = vector.broadcast %cst : f32 to vector<64x128xf32>
    %9 = arith.cmpf oge, %7, %8 : vector<64x128xf32>
    %cst_5 = arith.constant 2.000000e-01 : f32
    %10 = vector.broadcast %cst_5 : f32 to vector<64x128xf32>
    %11 = arith.mulf %10, %7 : vector<64x128xf32>
    %12 = arith.select %9, %7, %11 : vector<64x128xi1>, vector<64x128xf32>
    %13 = arith.truncf %12 : vector<64x128xf32> to vector<64x128xbf16>
    %c0_6 = arith.constant 0 : index
    %c0_7 = arith.constant 0 : index
    %14 = vector.load %arg4[%c0_6, %c0_7] : memref<64x128xbf16, #tpu.memory_space<vmem>>, vector<64x128xbf16>
    tpu.vector_store %arg4[%c0_6, %c0_7], %13 {strides = array<i32>} : memref<64x128xbf16, #tpu.memory_space<vmem>>, vector<64x128xbf16>,
    return
  }
  func.func @transform_0(%arg0: i32) -> (i32, i32) {
    %c0_i32 = arith.constant 0 : i32
    %c0_i32_0 = arith.constant 0 : i32
    return %arg0, %c0_i32 : i32, i32
  }
  func.func @transform_1(%arg0: i32) -> (i32, i32) {
    %c0_i32 = arith.constant 0 : i32
    %c0_i32_0 = arith.constant 0 : i32
    %c0_i32_1 = arith.constant 0 : i32
    return %c0_i32, %c0_i32_0 : i32, i32
  }
  func.func @transform_2(%arg0: i32) -> (i32, i32) {
    %c0_i32 = arith.constant 0 : i32
    %c0_i32_0 = arith.constant 0 : i32
    %c0_i32_1 = arith.constant 0 : i32
    return %c0_i32, %c0_i32_0 : i32, i32
  }
  func.func @transform_3(%arg0: i32) -> (i32, i32) {
    %c0_i32 = arith.constant 0 : i32
    %c0_i32_0 = arith.constant 0 : i32
    return %arg0, %c0_i32 : i32, i32
  }
}

module attributes {stable_mosaic.version = 11 : i64} {
  func.func @_mm_bias_stats_kernel(%arg0: i32, %arg1: memref<64x256xbf16, #tpu.memory_space<vmem>>, %arg2: memref<256x128xbf16, #tpu.memory_space<vmem>>, %arg3: memref<1x128xf32, #tpu.memory_space<vmem>>, %arg4: memref<64x128xbf16, #tpu.memory_space<vmem>>, %arg5: memref<1x1x128xf32, #tpu.memory_space<vmem>>, %arg6: memref<1x1x128xf32, #tpu.memory_space<vmem>>) attributes {dimension_semantics = [#tpu.dimension_semantics<parallel>], iteration_bounds = array<i64: 2>, scalar_prefetch = 0 : i64, scratch_operands = 0 : i64, tpu.core_type = #tpu.core_type<tc>, window_params = [{transform_indices = @transform_0, window_bounds = array<i64: 64, 256>}, {pipeline_mode = #tpu.pipeline_mode<synchronous>, transform_indices = @transform_1, window_bounds = array<i64: 256, 128>}, {pipeline_mode = #tpu.pipeline_mode<synchronous>, transform_indices = @transform_2, window_bounds = array<i64: 1, 128>}, {transform_indices = @transform_3, window_bounds = array<i64: 64, 128>}, {transform_indices = @transform_4, window_bounds = array<i64: 1, 1, 128>}, {transform_indices = @transform_5, window_bounds = array<i64: 1, 1, 128>}]} {
    %c0 = arith.constant 0 : index
    %c0_0 = arith.constant 0 : index
    %0 = vector.load %arg1[%c0, %c0_0] : memref<64x256xbf16, #tpu.memory_space<vmem>>, vector<64x256xbf16>
    %c0_1 = arith.constant 0 : index
    %c0_2 = arith.constant 0 : index
    %1 = vector.load %arg2[%c0_1, %c0_2] : memref<256x128xbf16, #tpu.memory_space<vmem>>, vector<256x128xbf16>
    %cst = arith.constant dense<0.000000e+00> : vector<64x128xf32>
    %2 = tpu.matmul %0, %1, %cst {dimension_numbers = #tpu.dot_dimension_numbers<[1], [0], [0], [1], [0, 0, 1, 1], [], []>} : vector<64x256xbf16>, vector<256x128xbf16>, vector<64x128xf32> -> vector<64x128xf32>
    %c0_3 = arith.constant 0 : index
    %c0_4 = arith.constant 0 : index
    %3 = vector.load %arg3[%c0_3, %c0_4] : memref<1x128xf32, #tpu.memory_space<vmem>>, vector<1x128xf32>
    %4 = vector.broadcast %3 : vector<1x128xf32> to vector<64x128xf32>
    %5 = arith.addf %2, %4 : vector<64x128xf32>
    %6 = arith.truncf %5 : vector<64x128xf32> to vector<64x128xbf16>
    %c0_5 = arith.constant 0 : index
    %c0_6 = arith.constant 0 : index
    %7 = vector.load %arg4[%c0_5, %c0_6] : memref<64x128xbf16, #tpu.memory_space<vmem>>, vector<64x128xbf16>
    tpu.vector_store %arg4[%c0_5, %c0_6], %6 {strides = array<i32>} : memref<64x128xbf16, #tpu.memory_space<vmem>>, vector<64x128xbf16>,
    %cst_7 = arith.constant dense<0.000000e+00> : vector<128xf32>
    %8 = vector.multi_reduction <add>, %5, %cst_7 [0] : vector<64x128xf32> to vector<128xf32>
    %9 = vector.shape_cast %8 : vector<128xf32> to vector<1x128xf32>
    %10 = vector.shape_cast %9 : vector<1x128xf32> to vector<1x1x128xf32>
    %c0_8 = arith.constant 0 : index
    %c0_9 = arith.constant 0 : index
    %c0_10 = arith.constant 0 : index
    %11 = vector.load %arg5[%c0_8, %c0_9, %c0_10] : memref<1x1x128xf32, #tpu.memory_space<vmem>>, vector<1x1x128xf32>
    tpu.vector_store %arg5[%c0_8, %c0_9, %c0_10], %10 {strides = array<i32>} : memref<1x1x128xf32, #tpu.memory_space<vmem>>, vector<1x1x128xf32>,
    %12 = arith.mulf %5, %5 : vector<64x128xf32>
    %cst_11 = arith.constant dense<0.000000e+00> : vector<128xf32>
    %13 = vector.multi_reduction <add>, %12, %cst_11 [0] : vector<64x128xf32> to vector<128xf32>
    %14 = vector.shape_cast %13 : vector<128xf32> to vector<1x128xf32>
    %15 = vector.shape_cast %14 : vector<1x128xf32> to vector<1x1x128xf32>
    %c0_12 = arith.constant 0 : index
    %c0_13 = arith.constant 0 : index
    %c0_14 = arith.constant 0 : index
    %16 = vector.load %arg6[%c0_12, %c0_13, %c0_14] : memref<1x1x128xf32, #tpu.memory_space<vmem>>, vector<1x1x128xf32>
    tpu.vector_store %arg6[%c0_12, %c0_13, %c0_14], %15 {strides = array<i32>} : memref<1x1x128xf32, #tpu.memory_space<vmem>>, vector<1x1x128xf32>,
    return
  }
  func.func @transform_0(%arg0: i32) -> (i32, i32) {
    %c0_i32 = arith.constant 0 : i32
    %c0_i32_0 = arith.constant 0 : i32
    return %arg0, %c0_i32 : i32, i32
  }
  func.func @transform_1(%arg0: i32) -> (i32, i32) {
    %c0_i32 = arith.constant 0 : i32
    %c0_i32_0 = arith.constant 0 : i32
    %c0_i32_1 = arith.constant 0 : i32
    return %c0_i32, %c0_i32_0 : i32, i32
  }
  func.func @transform_2(%arg0: i32) -> (i32, i32) {
    %c0_i32 = arith.constant 0 : i32
    %c0_i32_0 = arith.constant 0 : i32
    %c0_i32_1 = arith.constant 0 : i32
    return %c0_i32, %c0_i32_0 : i32, i32
  }
  func.func @transform_3(%arg0: i32) -> (i32, i32) {
    %c0_i32 = arith.constant 0 : i32
    %c0_i32_0 = arith.constant 0 : i32
    return %arg0, %c0_i32 : i32, i32
  }
  func.func @transform_4(%arg0: i32) -> (i32, i32, i32) {
    %c0_i32 = arith.constant 0 : i32
    %c0_i32_0 = arith.constant 0 : i32
    %c0_i32_1 = arith.constant 0 : i32
    return %arg0, %c0_i32, %c0_i32_0 : i32, i32, i32
  }
  func.func @transform_5(%arg0: i32) -> (i32, i32, i32) {
    %c0_i32 = arith.constant 0 : i32
    %c0_i32_0 = arith.constant 0 : i32
    %c0_i32_1 = arith.constant 0 : i32
    return %arg0, %c0_i32, %c0_i32_0 : i32, i32, i32
  }
}

module attributes {stable_mosaic.version = 11 : i64} {
  func.func @_mm_bias_stats_kernel(%arg0: i32, %arg1: memref<64x384xbf16, #tpu.memory_space<vmem>>, %arg2: memref<384x128xbf16, #tpu.memory_space<vmem>>, %arg3: memref<1x128xf32, #tpu.memory_space<vmem>>, %arg4: memref<64x128xbf16, #tpu.memory_space<vmem>>, %arg5: memref<1x1x128xf32, #tpu.memory_space<vmem>>, %arg6: memref<1x1x128xf32, #tpu.memory_space<vmem>>) attributes {dimension_semantics = [#tpu.dimension_semantics<parallel>], iteration_bounds = array<i64: 2>, scalar_prefetch = 0 : i64, scratch_operands = 0 : i64, tpu.core_type = #tpu.core_type<tc>, window_params = [{transform_indices = @transform_0, window_bounds = array<i64: 64, 384>}, {pipeline_mode = #tpu.pipeline_mode<synchronous>, transform_indices = @transform_1, window_bounds = array<i64: 384, 128>}, {pipeline_mode = #tpu.pipeline_mode<synchronous>, transform_indices = @transform_2, window_bounds = array<i64: 1, 128>}, {transform_indices = @transform_3, window_bounds = array<i64: 64, 128>}, {transform_indices = @transform_4, window_bounds = array<i64: 1, 1, 128>}, {transform_indices = @transform_5, window_bounds = array<i64: 1, 1, 128>}]} {
    %c0 = arith.constant 0 : index
    %c0_0 = arith.constant 0 : index
    %0 = vector.load %arg1[%c0, %c0_0] : memref<64x384xbf16, #tpu.memory_space<vmem>>, vector<64x384xbf16>
    %c0_1 = arith.constant 0 : index
    %c0_2 = arith.constant 0 : index
    %1 = vector.load %arg2[%c0_1, %c0_2] : memref<384x128xbf16, #tpu.memory_space<vmem>>, vector<384x128xbf16>
    %cst = arith.constant dense<0.000000e+00> : vector<64x128xf32>
    %2 = tpu.matmul %0, %1, %cst {dimension_numbers = #tpu.dot_dimension_numbers<[1], [0], [0], [1], [0, 0, 1, 1], [], []>} : vector<64x384xbf16>, vector<384x128xbf16>, vector<64x128xf32> -> vector<64x128xf32>
    %c0_3 = arith.constant 0 : index
    %c0_4 = arith.constant 0 : index
    %3 = vector.load %arg3[%c0_3, %c0_4] : memref<1x128xf32, #tpu.memory_space<vmem>>, vector<1x128xf32>
    %4 = vector.broadcast %3 : vector<1x128xf32> to vector<64x128xf32>
    %5 = arith.addf %2, %4 : vector<64x128xf32>
    %6 = arith.truncf %5 : vector<64x128xf32> to vector<64x128xbf16>
    %c0_5 = arith.constant 0 : index
    %c0_6 = arith.constant 0 : index
    %7 = vector.load %arg4[%c0_5, %c0_6] : memref<64x128xbf16, #tpu.memory_space<vmem>>, vector<64x128xbf16>
    tpu.vector_store %arg4[%c0_5, %c0_6], %6 {strides = array<i32>} : memref<64x128xbf16, #tpu.memory_space<vmem>>, vector<64x128xbf16>,
    %cst_7 = arith.constant dense<0.000000e+00> : vector<128xf32>
    %8 = vector.multi_reduction <add>, %5, %cst_7 [0] : vector<64x128xf32> to vector<128xf32>
    %9 = vector.shape_cast %8 : vector<128xf32> to vector<1x128xf32>
    %10 = vector.shape_cast %9 : vector<1x128xf32> to vector<1x1x128xf32>
    %c0_8 = arith.constant 0 : index
    %c0_9 = arith.constant 0 : index
    %c0_10 = arith.constant 0 : index
    %11 = vector.load %arg5[%c0_8, %c0_9, %c0_10] : memref<1x1x128xf32, #tpu.memory_space<vmem>>, vector<1x1x128xf32>
    tpu.vector_store %arg5[%c0_8, %c0_9, %c0_10], %10 {strides = array<i32>} : memref<1x1x128xf32, #tpu.memory_space<vmem>>, vector<1x1x128xf32>,
    %12 = arith.mulf %5, %5 : vector<64x128xf32>
    %cst_11 = arith.constant dense<0.000000e+00> : vector<128xf32>
    %13 = vector.multi_reduction <add>, %12, %cst_11 [0] : vector<64x128xf32> to vector<128xf32>
    %14 = vector.shape_cast %13 : vector<128xf32> to vector<1x128xf32>
    %15 = vector.shape_cast %14 : vector<1x128xf32> to vector<1x1x128xf32>
    %c0_12 = arith.constant 0 : index
    %c0_13 = arith.constant 0 : index
    %c0_14 = arith.constant 0 : index
    %16 = vector.load %arg6[%c0_12, %c0_13, %c0_14] : memref<1x1x128xf32, #tpu.memory_space<vmem>>, vector<1x1x128xf32>
    tpu.vector_store %arg6[%c0_12, %c0_13, %c0_14], %15 {strides = array<i32>} : memref<1x1x128xf32, #tpu.memory_space<vmem>>, vector<1x1x128xf32>,
    return
  }
  func.func @transform_0(%arg0: i32) -> (i32, i32) {
    %c0_i32 = arith.constant 0 : i32
    %c0_i32_0 = arith.constant 0 : i32
    return %arg0, %c0_i32 : i32, i32
  }
  func.func @transform_1(%arg0: i32) -> (i32, i32) {
    %c0_i32 = arith.constant 0 : i32
    %c0_i32_0 = arith.constant 0 : i32
    %c0_i32_1 = arith.constant 0 : i32
    return %c0_i32, %c0_i32_0 : i32, i32
  }
  func.func @transform_2(%arg0: i32) -> (i32, i32) {
    %c0_i32 = arith.constant 0 : i32
    %c0_i32_0 = arith.constant 0 : i32
    %c0_i32_1 = arith.constant 0 : i32
    return %c0_i32, %c0_i32_0 : i32, i32
  }
  func.func @transform_3(%arg0: i32) -> (i32, i32) {
    %c0_i32 = arith.constant 0 : i32
    %c0_i32_0 = arith.constant 0 : i32
    return %arg0, %c0_i32 : i32, i32
  }
  func.func @transform_4(%arg0: i32) -> (i32, i32, i32) {
    %c0_i32 = arith.constant 0 : i32
    %c0_i32_0 = arith.constant 0 : i32
    %c0_i32_1 = arith.constant 0 : i32
    return %arg0, %c0_i32, %c0_i32_0 : i32, i32, i32
  }
  func.func @transform_5(%arg0: i32) -> (i32, i32, i32) {
    %c0_i32 = arith.constant 0 : i32
    %c0_i32_0 = arith.constant 0 : i32
    %c0_i32_1 = arith.constant 0 : i32
    return %arg0, %c0_i32, %c0_i32_0 : i32, i32, i32
  }
}

module attributes {stable_mosaic.version = 11 : i64} {
  func.func @_mm_bias_stats_kernel(%arg0: i32, %arg1: memref<16x512xbf16, #tpu.memory_space<vmem>>, %arg2: memref<512x128xbf16, #tpu.memory_space<vmem>>, %arg3: memref<1x128xf32, #tpu.memory_space<vmem>>, %arg4: memref<16x128xbf16, #tpu.memory_space<vmem>>, %arg5: memref<1x1x128xf32, #tpu.memory_space<vmem>>, %arg6: memref<1x1x128xf32, #tpu.memory_space<vmem>>) attributes {dimension_semantics = [#tpu.dimension_semantics<parallel>], iteration_bounds = array<i64: 2>, scalar_prefetch = 0 : i64, scratch_operands = 0 : i64, tpu.core_type = #tpu.core_type<tc>, window_params = [{transform_indices = @transform_0, window_bounds = array<i64: 16, 512>}, {pipeline_mode = #tpu.pipeline_mode<synchronous>, transform_indices = @transform_1, window_bounds = array<i64: 512, 128>}, {pipeline_mode = #tpu.pipeline_mode<synchronous>, transform_indices = @transform_2, window_bounds = array<i64: 1, 128>}, {transform_indices = @transform_3, window_bounds = array<i64: 16, 128>}, {transform_indices = @transform_4, window_bounds = array<i64: 1, 1, 128>}, {transform_indices = @transform_5, window_bounds = array<i64: 1, 1, 128>}]} {
    %c0 = arith.constant 0 : index
    %c0_0 = arith.constant 0 : index
    %0 = vector.load %arg1[%c0, %c0_0] : memref<16x512xbf16, #tpu.memory_space<vmem>>, vector<16x512xbf16>
    %c0_1 = arith.constant 0 : index
    %c0_2 = arith.constant 0 : index
    %1 = vector.load %arg2[%c0_1, %c0_2] : memref<512x128xbf16, #tpu.memory_space<vmem>>, vector<512x128xbf16>
    %cst = arith.constant dense<0.000000e+00> : vector<16x128xf32>
    %2 = tpu.matmul %0, %1, %cst {dimension_numbers = #tpu.dot_dimension_numbers<[1], [0], [0], [1], [0, 0, 1, 1], [], []>} : vector<16x512xbf16>, vector<512x128xbf16>, vector<16x128xf32> -> vector<16x128xf32>
    %c0_3 = arith.constant 0 : index
    %c0_4 = arith.constant 0 : index
    %3 = vector.load %arg3[%c0_3, %c0_4] : memref<1x128xf32, #tpu.memory_space<vmem>>, vector<1x128xf32>
    %4 = vector.broadcast %3 : vector<1x128xf32> to vector<16x128xf32>
    %5 = arith.addf %2, %4 : vector<16x128xf32>
    %6 = arith.truncf %5 : vector<16x128xf32> to vector<16x128xbf16>
    %c0_5 = arith.constant 0 : index
    %c0_6 = arith.constant 0 : index
    %7 = vector.load %arg4[%c0_5, %c0_6] : memref<16x128xbf16, #tpu.memory_space<vmem>>, vector<16x128xbf16>
    tpu.vector_store %arg4[%c0_5, %c0_6], %6 {strides = array<i32>} : memref<16x128xbf16, #tpu.memory_space<vmem>>, vector<16x128xbf16>,
    %cst_7 = arith.constant dense<0.000000e+00> : vector<128xf32>
    %8 = vector.multi_reduction <add>, %5, %cst_7 [0] : vector<16x128xf32> to vector<128xf32>
    %9 = vector.shape_cast %8 : vector<128xf32> to vector<1x128xf32>
    %10 = vector.shape_cast %9 : vector<1x128xf32> to vector<1x1x128xf32>
    %c0_8 = arith.constant 0 : index
    %c0_9 = arith.constant 0 : index
    %c0_10 = arith.constant 0 : index
    %11 = vector.load %arg5[%c0_8, %c0_9, %c0_10] : memref<1x1x128xf32, #tpu.memory_space<vmem>>, vector<1x1x128xf32>
    tpu.vector_store %arg5[%c0_8, %c0_9, %c0_10], %10 {strides = array<i32>} : memref<1x1x128xf32, #tpu.memory_space<vmem>>, vector<1x1x128xf32>,
    %12 = arith.mulf %5, %5 : vector<16x128xf32>
    %cst_11 = arith.constant dense<0.000000e+00> : vector<128xf32>
    %13 = vector.multi_reduction <add>, %12, %cst_11 [0] : vector<16x128xf32> to vector<128xf32>
    %14 = vector.shape_cast %13 : vector<128xf32> to vector<1x128xf32>
    %15 = vector.shape_cast %14 : vector<1x128xf32> to vector<1x1x128xf32>
    %c0_12 = arith.constant 0 : index
    %c0_13 = arith.constant 0 : index
    %c0_14 = arith.constant 0 : index
    %16 = vector.load %arg6[%c0_12, %c0_13, %c0_14] : memref<1x1x128xf32, #tpu.memory_space<vmem>>, vector<1x1x128xf32>
    tpu.vector_store %arg6[%c0_12, %c0_13, %c0_14], %15 {strides = array<i32>} : memref<1x1x128xf32, #tpu.memory_space<vmem>>, vector<1x1x128xf32>,
    return
  }
  func.func @transform_0(%arg0: i32) -> (i32, i32) {
    %c0_i32 = arith.constant 0 : i32
    %c0_i32_0 = arith.constant 0 : i32
    return %arg0, %c0_i32 : i32, i32
  }
  func.func @transform_1(%arg0: i32) -> (i32, i32) {
    %c0_i32 = arith.constant 0 : i32
    %c0_i32_0 = arith.constant 0 : i32
    %c0_i32_1 = arith.constant 0 : i32
    return %c0_i32, %c0_i32_0 : i32, i32
  }
  func.func @transform_2(%arg0: i32) -> (i32, i32) {
    %c0_i32 = arith.constant 0 : i32
    %c0_i32_0 = arith.constant 0 : i32
    %c0_i32_1 = arith.constant 0 : i32
    return %c0_i32, %c0_i32_0 : i32, i32
  }
  func.func @transform_3(%arg0: i32) -> (i32, i32) {
    %c0_i32 = arith.constant 0 : i32
    %c0_i32_0 = arith.constant 0 : i32
    return %arg0, %c0_i32 : i32, i32
  }
  func.func @transform_4(%arg0: i32) -> (i32, i32, i32) {
    %c0_i32 = arith.constant 0 : i32
    %c0_i32_0 = arith.constant 0 : i32
    %c0_i32_1 = arith.constant 0 : i32
    return %arg0, %c0_i32, %c0_i32_0 : i32, i32, i32
  }
  func.func @transform_5(%arg0: i32) -> (i32, i32, i32) {
    %c0_i32 = arith.constant 0 : i32
    %c0_i32_0 = arith.constant 0 : i32
    %c0_i32_1 = arith.constant 0 : i32
    return %arg0, %c0_i32, %c0_i32_0 : i32, i32, i32
  }
}

module attributes {stable_mosaic.version = 11 : i64} {
  func.func @_scale_shift_lrelu_kernel(%arg0: i32, %arg1: memref<16x128xbf16, #tpu.memory_space<vmem>>, %arg2: memref<1x128xf32, #tpu.memory_space<vmem>>, %arg3: memref<1x128xf32, #tpu.memory_space<vmem>>, %arg4: memref<16x128xbf16, #tpu.memory_space<vmem>>) attributes {dimension_semantics = [#tpu.dimension_semantics<parallel>], iteration_bounds = array<i64: 2>, scalar_prefetch = 0 : i64, scratch_operands = 0 : i64, tpu.core_type = #tpu.core_type<tc>, window_params = [{transform_indices = @transform_0, window_bounds = array<i64: 16, 128>}, {pipeline_mode = #tpu.pipeline_mode<synchronous>, transform_indices = @transform_1, window_bounds = array<i64: 1, 128>}, {pipeline_mode = #tpu.pipeline_mode<synchronous>, transform_indices = @transform_2, window_bounds = array<i64: 1, 128>}, {transform_indices = @transform_3, window_bounds = array<i64: 16, 128>}]} {
    %c0 = arith.constant 0 : index
    %c0_0 = arith.constant 0 : index
    %0 = vector.load %arg1[%c0, %c0_0] : memref<16x128xbf16, #tpu.memory_space<vmem>>, vector<16x128xbf16>
    %1 = arith.extf %0 : vector<16x128xbf16> to vector<16x128xf32>
    %c0_1 = arith.constant 0 : index
    %c0_2 = arith.constant 0 : index
    %2 = vector.load %arg2[%c0_1, %c0_2] : memref<1x128xf32, #tpu.memory_space<vmem>>, vector<1x128xf32>
    %3 = vector.broadcast %2 : vector<1x128xf32> to vector<16x128xf32>
    %4 = arith.mulf %1, %3 : vector<16x128xf32>
    %c0_3 = arith.constant 0 : index
    %c0_4 = arith.constant 0 : index
    %5 = vector.load %arg3[%c0_3, %c0_4] : memref<1x128xf32, #tpu.memory_space<vmem>>, vector<1x128xf32>
    %6 = vector.broadcast %5 : vector<1x128xf32> to vector<16x128xf32>
    %7 = arith.addf %4, %6 : vector<16x128xf32>
    %cst = arith.constant 0.000000e+00 : f32
    %8 = vector.broadcast %cst : f32 to vector<16x128xf32>
    %9 = arith.cmpf oge, %7, %8 : vector<16x128xf32>
    %cst_5 = arith.constant 2.000000e-01 : f32
    %10 = vector.broadcast %cst_5 : f32 to vector<16x128xf32>
    %11 = arith.mulf %10, %7 : vector<16x128xf32>
    %12 = arith.select %9, %7, %11 : vector<16x128xi1>, vector<16x128xf32>
    %13 = arith.truncf %12 : vector<16x128xf32> to vector<16x128xbf16>
    %c0_6 = arith.constant 0 : index
    %c0_7 = arith.constant 0 : index
    %14 = vector.load %arg4[%c0_6, %c0_7] : memref<16x128xbf16, #tpu.memory_space<vmem>>, vector<16x128xbf16>
    tpu.vector_store %arg4[%c0_6, %c0_7], %13 {strides = array<i32>} : memref<16x128xbf16, #tpu.memory_space<vmem>>, vector<16x128xbf16>,
    return
  }
  func.func @transform_0(%arg0: i32) -> (i32, i32) {
    %c0_i32 = arith.constant 0 : i32
    %c0_i32_0 = arith.constant 0 : i32
    return %arg0, %c0_i32 : i32, i32
  }
  func.func @transform_1(%arg0: i32) -> (i32, i32) {
    %c0_i32 = arith.constant 0 : i32
    %c0_i32_0 = arith.constant 0 : i32
    %c0_i32_1 = arith.constant 0 : i32
    return %c0_i32, %c0_i32_0 : i32, i32
  }
  func.func @transform_2(%arg0: i32) -> (i32, i32) {
    %c0_i32 = arith.constant 0 : i32
    %c0_i32_0 = arith.constant 0 : i32
    %c0_i32_1 = arith.constant 0 : i32
    return %c0_i32, %c0_i32_0 : i32, i32
  }
  func.func @transform_3(%arg0: i32) -> (i32, i32) {
    %c0_i32 = arith.constant 0 : i32
    %c0_i32_0 = arith.constant 0 : i32
    return %arg0, %c0_i32 : i32, i32
  }
}

module attributes {stable_mosaic.version = 11 : i64} {
  func.func @_mm_bias_stats_kernel(%arg0: i32, %arg1: memref<16x640xbf16, #tpu.memory_space<vmem>>, %arg2: memref<640x128xbf16, #tpu.memory_space<vmem>>, %arg3: memref<1x128xf32, #tpu.memory_space<vmem>>, %arg4: memref<16x128xbf16, #tpu.memory_space<vmem>>, %arg5: memref<1x1x128xf32, #tpu.memory_space<vmem>>, %arg6: memref<1x1x128xf32, #tpu.memory_space<vmem>>) attributes {dimension_semantics = [#tpu.dimension_semantics<parallel>], iteration_bounds = array<i64: 2>, scalar_prefetch = 0 : i64, scratch_operands = 0 : i64, tpu.core_type = #tpu.core_type<tc>, window_params = [{transform_indices = @transform_0, window_bounds = array<i64: 16, 640>}, {pipeline_mode = #tpu.pipeline_mode<synchronous>, transform_indices = @transform_1, window_bounds = array<i64: 640, 128>}, {pipeline_mode = #tpu.pipeline_mode<synchronous>, transform_indices = @transform_2, window_bounds = array<i64: 1, 128>}, {transform_indices = @transform_3, window_bounds = array<i64: 16, 128>}, {transform_indices = @transform_4, window_bounds = array<i64: 1, 1, 128>}, {transform_indices = @transform_5, window_bounds = array<i64: 1, 1, 128>}]} {
    %c0 = arith.constant 0 : index
    %c0_0 = arith.constant 0 : index
    %0 = vector.load %arg1[%c0, %c0_0] : memref<16x640xbf16, #tpu.memory_space<vmem>>, vector<16x640xbf16>
    %c0_1 = arith.constant 0 : index
    %c0_2 = arith.constant 0 : index
    %1 = vector.load %arg2[%c0_1, %c0_2] : memref<640x128xbf16, #tpu.memory_space<vmem>>, vector<640x128xbf16>
    %cst = arith.constant dense<0.000000e+00> : vector<16x128xf32>
    %2 = tpu.matmul %0, %1, %cst {dimension_numbers = #tpu.dot_dimension_numbers<[1], [0], [0], [1], [0, 0, 1, 1], [], []>} : vector<16x640xbf16>, vector<640x128xbf16>, vector<16x128xf32> -> vector<16x128xf32>
    %c0_3 = arith.constant 0 : index
    %c0_4 = arith.constant 0 : index
    %3 = vector.load %arg3[%c0_3, %c0_4] : memref<1x128xf32, #tpu.memory_space<vmem>>, vector<1x128xf32>
    %4 = vector.broadcast %3 : vector<1x128xf32> to vector<16x128xf32>
    %5 = arith.addf %2, %4 : vector<16x128xf32>
    %6 = arith.truncf %5 : vector<16x128xf32> to vector<16x128xbf16>
    %c0_5 = arith.constant 0 : index
    %c0_6 = arith.constant 0 : index
    %7 = vector.load %arg4[%c0_5, %c0_6] : memref<16x128xbf16, #tpu.memory_space<vmem>>, vector<16x128xbf16>
    tpu.vector_store %arg4[%c0_5, %c0_6], %6 {strides = array<i32>} : memref<16x128xbf16, #tpu.memory_space<vmem>>, vector<16x128xbf16>,
    %cst_7 = arith.constant dense<0.000000e+00> : vector<128xf32>
    %8 = vector.multi_reduction <add>, %5, %cst_7 [0] : vector<16x128xf32> to vector<128xf32>
    %9 = vector.shape_cast %8 : vector<128xf32> to vector<1x128xf32>
    %10 = vector.shape_cast %9 : vector<1x128xf32> to vector<1x1x128xf32>
    %c0_8 = arith.constant 0 : index
    %c0_9 = arith.constant 0 : index
    %c0_10 = arith.constant 0 : index
    %11 = vector.load %arg5[%c0_8, %c0_9, %c0_10] : memref<1x1x128xf32, #tpu.memory_space<vmem>>, vector<1x1x128xf32>
    tpu.vector_store %arg5[%c0_8, %c0_9, %c0_10], %10 {strides = array<i32>} : memref<1x1x128xf32, #tpu.memory_space<vmem>>, vector<1x1x128xf32>,
    %12 = arith.mulf %5, %5 : vector<16x128xf32>
    %cst_11 = arith.constant dense<0.000000e+00> : vector<128xf32>
    %13 = vector.multi_reduction <add>, %12, %cst_11 [0] : vector<16x128xf32> to vector<128xf32>
    %14 = vector.shape_cast %13 : vector<128xf32> to vector<1x128xf32>
    %15 = vector.shape_cast %14 : vector<1x128xf32> to vector<1x1x128xf32>
    %c0_12 = arith.constant 0 : index
    %c0_13 = arith.constant 0 : index
    %c0_14 = arith.constant 0 : index
    %16 = vector.load %arg6[%c0_12, %c0_13, %c0_14] : memref<1x1x128xf32, #tpu.memory_space<vmem>>, vector<1x1x128xf32>
    tpu.vector_store %arg6[%c0_12, %c0_13, %c0_14], %15 {strides = array<i32>} : memref<1x1x128xf32, #tpu.memory_space<vmem>>, vector<1x1x128xf32>,
    return
  }
  func.func @transform_0(%arg0: i32) -> (i32, i32) {
    %c0_i32 = arith.constant 0 : i32
    %c0_i32_0 = arith.constant 0 : i32
    return %arg0, %c0_i32 : i32, i32
  }
  func.func @transform_1(%arg0: i32) -> (i32, i32) {
    %c0_i32 = arith.constant 0 : i32
    %c0_i32_0 = arith.constant 0 : i32
    %c0_i32_1 = arith.constant 0 : i32
    return %c0_i32, %c0_i32_0 : i32, i32
  }
  func.func @transform_2(%arg0: i32) -> (i32, i32) {
    %c0_i32 = arith.constant 0 : i32
    %c0_i32_0 = arith.constant 0 : i32
    %c0_i32_1 = arith.constant 0 : i32
    return %c0_i32, %c0_i32_0 : i32, i32
  }
  func.func @transform_3(%arg0: i32) -> (i32, i32) {
    %c0_i32 = arith.constant 0 : i32
    %c0_i32_0 = arith.constant 0 : i32
    return %arg0, %c0_i32 : i32, i32
  }
  func.func @transform_4(%arg0: i32) -> (i32, i32, i32) {
    %c0_i32 = arith.constant 0 : i32
    %c0_i32_0 = arith.constant 0 : i32
    %c0_i32_1 = arith.constant 0 : i32
    return %arg0, %c0_i32, %c0_i32_0 : i32, i32, i32
  }
  func.func @transform_5(%arg0: i32) -> (i32, i32, i32) {
    %c0_i32 = arith.constant 0 : i32
    %c0_i32_0 = arith.constant 0 : i32
    %c0_i32_1 = arith.constant 0 : i32
    return %arg0, %c0_i32, %c0_i32_0 : i32, i32, i32
  }
}

module attributes {stable_mosaic.version = 11 : i64} {
  func.func @_linear_head_kernel(%arg0: i32, %arg1: memref<2x2048xbf16, #tpu.memory_space<vmem>>, %arg2: memref<1x2048xf32, #tpu.memory_space<vmem>>, %arg3: memref<1x1xf32, #tpu.memory_space<vmem>>, %arg4: memref<2x1xf32, #tpu.memory_space<vmem>>) attributes {dimension_semantics = [#tpu.dimension_semantics<arbitrary>], iteration_bounds = array<i64: 1>, scalar_prefetch = 0 : i64, scratch_operands = 0 : i64, tpu.core_type = #tpu.core_type<tc>, window_params = [{pipeline_mode = #tpu.pipeline_mode<synchronous>, transform_indices = @transform_0, window_bounds = array<i64: 2, 2048>}, {pipeline_mode = #tpu.pipeline_mode<synchronous>, transform_indices = @transform_1, window_bounds = array<i64: 1, 2048>}, {pipeline_mode = #tpu.pipeline_mode<synchronous>, transform_indices = @transform_2, window_bounds = array<i64: 1, 1>}, {pipeline_mode = #tpu.pipeline_mode<synchronous>, transform_indices = @transform_3, window_bounds = array<i64: 2, 1>}]} {
    %c0 = arith.constant 0 : index
    %c0_0 = arith.constant 0 : index
    %0 = vector.load %arg1[%c0, %c0_0] : memref<2x2048xbf16, #tpu.memory_space<vmem>>, vector<2x2048xbf16>
    %1 = arith.extf %0 : vector<2x2048xbf16> to vector<2x2048xf32>
    %c0_1 = arith.constant 0 : index
    %c0_2 = arith.constant 0 : index
    %2 = vector.load %arg2[%c0_1, %c0_2] : memref<1x2048xf32, #tpu.memory_space<vmem>>, vector<1x2048xf32>
    %3 = vector.broadcast %2 : vector<1x2048xf32> to vector<2x2048xf32>
    %4 = arith.mulf %1, %3 : vector<2x2048xf32>
    %cst = arith.constant dense<0.000000e+00> : vector<2xf32>
    %5 = vector.multi_reduction <add>, %4, %cst [1] : vector<2x2048xf32> to vector<2xf32>
    %6 = vector.shape_cast %5 : vector<2xf32> to vector<2x1xf32>
    %c0_3 = arith.constant 0 : index
    %c0_4 = arith.constant 0 : index
    %7 = vector.load %arg3[%c0_3, %c0_4] : memref<1x1xf32, #tpu.memory_space<vmem>>, vector<1x1xf32>
    %8 = vector.broadcast %7 : vector<1x1xf32> to vector<2x1xf32>
    %9 = arith.addf %6, %8 : vector<2x1xf32>
    %c0_5 = arith.constant 0 : index
    %c0_6 = arith.constant 0 : index
    %10 = vector.load %arg4[%c0_5, %c0_6] : memref<2x1xf32, #tpu.memory_space<vmem>>, vector<2x1xf32>
    tpu.vector_store %arg4[%c0_5, %c0_6], %9 {strides = array<i32>} : memref<2x1xf32, #tpu.memory_space<vmem>>, vector<2x1xf32>,
    return
  }
  func.func @transform_0(%arg0: i32) -> (i32, i32) {
    %c0_i32 = arith.constant 0 : i32
    %c0_i32_0 = arith.constant 0 : i32
    %c0_i32_1 = arith.constant 0 : i32
    return %c0_i32, %c0_i32_0 : i32, i32
  }
  func.func @transform_1(%arg0: i32) -> (i32, i32) {
    %c0_i32 = arith.constant 0 : i32
    %c0_i32_0 = arith.constant 0 : i32
    %c0_i32_1 = arith.constant 0 : i32
    return %c0_i32, %c0_i32_0 : i32, i32
  }
  func.func @transform_2(%arg0: i32) -> (i32, i32) {
    %c0_i32 = arith.constant 0 : i32
    %c0_i32_0 = arith.constant 0 : i32
    %c0_i32_1 = arith.constant 0 : i32
    return %c0_i32, %c0_i32_0 : i32, i32
  }
  func.func @transform_3(%arg0: i32) -> (i32, i32) {
    %c0_i32 = arith.constant 0 : i32
    %c0_i32_0 = arith.constant 0 : i32
    %c0_i32_1 = arith.constant 0 : i32
    return %c0_i32, %c0_i32_0 : i32, i32
  }
}

</mosaic_0001>

<bundles_post_ra>
// kernel: discriminator_forward.14
= control target key start
LH: loop header
LB: loop body
LE: loop exit
PB: predicated region body
PF: predicated region fallthrough
CT: control target
= control target key end

     0   :  { %s3447_s12 = smov 0   ;;  %s3900_s0 = inlined_call_operand.vmem [shape: bf16[2048,128], index: 0, kind: input, shape index: {}]   ;;  %s3901_s1 = inlined_call_operand.vmem [shape: bf16[128,128], index: 1, kind: input, shape index: {}]   ;;  %s3902_s2 = inlined_call_operand.vmem [shape: f32[1,128], index: 2, kind: input, shape index: {}]   ;;  %s3903_s3 = inlined_call_operand.vmem [shape: bf16[2048,128], index: 3, kind: output, shape index: {}]  }
   0x1 LB: > { %s2383_s13 = sadd.s32 4294967295, %s3425_s12   ;;  %p2387_p0 = scmp.ge.s32.totalorder %s3425_s12, 1  ;;  %s3425_s12 = sphi %s3447_s12, %s13_s12  }
   0x2   : > { %p138_p1 = scmp.lt.s32.totalorder %s3425_s12, 3 }
   0x4   : > { %p139_p2 = pnand %p2387_p0, %p138_p1 }
   0x5   : > { %v3346_v0 = vld [vmem:[%s3901_s1] sm:$0xff] (!%p139_p2)   ;;  %s2388_s16 = sshll.u32 (!%p139_p2), %s2383_s13, 7  ;;  %v3347_v1 = vld [vmem:[%s3901_s1 + $0x8] sm:$0xff] (!%p139_p2)   ;;  %v3348_v2 = vld [vmem:[%s3901_s1 + $0x10] sm:$0xff] (!%p139_p2)  }
   0x6   : > { %142 = sbr.rel (%p139_p2) target bundleno = 399 (0x18f), region = 32  ;;  %p163_p3 = scmp.lt.s32.totalorder (!%p139_p2), %s2388_s16, 255  ;;  %3178 = vmatprep.subr.bf16.mxu0 (!%p139_p2), %v3346_v0  ;;  %3322 = vmatprep.subr.bf16.mxu1 (!%p139_p2), %v3346_v0  ;;  %v3349_v3 = vld [vmem:[%s3901_s1 + $0x18] sm:$0xff] (!%p139_p2)   ;;  %v3350_v6 = vld [vmem:[%s3901_s1 + $0x20] sm:$0xff] (!%p139_p2)   ;;  %v3351_v7 = vld [vmem:[%s3901_s1 + $0x28] sm:$0xff] (!%p139_p2)  }
   0x7   : > { %3179 = vmatpush3.bf16.msra.mxu0 (!%p139_p2), %v3346_v0  ;;  %3330 = vmatpush3.bf16.msra.mxu1 (!%p139_p2), %v3346_v0  ;;  %v3352_v8 = vld [vmem:[%s3901_s1 + $0x30] sm:$0xff] (!%p139_p2)   ;;  %v3353_v9 = vld [vmem:[%s3901_s1 + $0x38] sm:$0xff] (!%p139_p2)  }
   0x8   : > { %3180 = vmatprep.subr.bf16.mxu0 (!%p139_p2), %v3347_v1  ;;  %3323 = vmatprep.subr.bf16.mxu1 (!%p139_p2), %v3347_v1 }
   0xb   : > { %3181 = vmatpush3.bf16.msra.mxu0 (!%p139_p2), %v3347_v1  ;;  %3331 = vmatpush3.bf16.msra.mxu1 (!%p139_p2), %v3347_v1 }
   0xc   : > { %3182 = vmatprep.subr.bf16.mxu0 (!%p139_p2), %v3348_v2  ;;  %3324 = vmatprep.subr.bf16.mxu1 (!%p139_p2), %v3348_v2 }
   0xd   : > { %s3905_s16 = smov (!%p163_p3, %s2388_s16), 255 }
   0xe   : > { %s2389_s21 = sshll.u32 %s3905_s16, 2 }
   0xf   : > { %s3472_s24 = scalar_lea.vmem %s3900_s0, %s2389_s21  ;;  %3183 = vmatpush3.bf16.msra.mxu0 %v3348_v2  ;;  %3332 = vmatpush3.bf16.msra.mxu1 %v3348_v2  ;;  %s3573_s13 = scalar_lea.vmem %s3903_s3, %s2389_s21 }
  0x10   : > { %v3354_v4 = vld [vmem:[%s3472_s24] sm:$0xff]   ;;  %3184 = vmatprep.subr.bf16.mxu0 %v3349_v3  ;;  %3325 = vmatprep.subr.bf16.mxu1 %v3349_v3  ;;  %v3356_v10 = vld [vmem:[%s3472_s24 + $0x8] sm:$0xff]   ;;  %v3358_v12 = vld [vmem:[%s3472_s24 + $0x10] sm:$0xff]  }
  0x11   : > { %v3355_v5 = vld [vmem:[%s3472_s24 + $0x100] sm:$0xff]   ;;  %3194 = vmatprep.mubr.bf16.mxu0 %v3354_v4  ;;  %v3357_v11 = vld [vmem:[%s3472_s24 + $0x108] sm:$0xff]   ;;  %v3359_v13 = vld [vmem:[%s3472_s24 + $0x110] sm:$0xff]  }
  0x12   : > { %3258 = vmatprep.mubr.bf16.mxu1 %v3355_v5  ;;  %v3360_v14 = vld [vmem:[%s3472_s24 + $0x18] sm:$0xff]   ;;  %v3362_v16 = vld [vmem:[%s3472_s24 + $0x20] sm:$0xff]   ;;  %v3364_v18 = vld [vmem:[%s3472_s24 + $0x28] sm:$0xff]  }
  0x13   : > { %3185 = vmatpush3.bf16.msra.mxu0 %v3349_v3  ;;  %3333 = vmatpush3.bf16.msra.mxu1 %v3349_v3  ;;  %v3361_v15 = vld [vmem:[%s3472_s24 + $0x118] sm:$0xff]   ;;  %v3363_v17 = vld [vmem:[%s3472_s24 + $0x120] sm:$0xff]   ;;  %v3365_v19 = vld [vmem:[%s3472_s24 + $0x128] sm:$0xff]  }
  0x14   : > { %3186 = vmatprep.subr.bf16.mxu0 %v3350_v6  ;;  %3326 = vmatprep.subr.bf16.mxu1 %v3350_v6  ;;  %v3366_v20 = vld [vmem:[%s3472_s24 + $0x30] sm:$0xff]   ;;  %v3368_v22 = vld [vmem:[%s3472_s24 + $0x38] sm:$0xff]   ;;  %v3370_v24 = vld [vmem:[%s3472_s24 + $0x40] sm:$0xff]  }
  0x15   : > { %v3367_v21 = vld [vmem:[%s3472_s24 + $0x130] sm:$0xff]   ;;  %v3369_v23 = vld [vmem:[%s3472_s24 + $0x138] sm:$0xff]   ;;  %v3371_v25 = vld [vmem:[%s3472_s24 + $0x140] sm:$0xff]  }
  0x16   : > { %v3372_v26 = vld [vmem:[%s3472_s24 + $0x48] sm:$0xff]   ;;  %v3374_v28 = vld [vmem:[%s3472_s24 + $0x50] sm:$0xff]   ;;  %v3376_v30 = vld [vmem:[%s3472_s24 + $0x58] sm:$0xff]  }
  0x17   : > { %3187 = vmatpush3.bf16.msra.mxu0 %v3350_v6  ;;  %3334 = vmatpush3.bf16.msra.mxu1 %v3350_v6  ;;  %v3373_v27 = vld [vmem:[%s3472_s24 + $0x148] sm:$0xff]   ;;  %v3375_v29 = vld [vmem:[%s3472_s24 + $0x150] sm:$0xff]   ;;  %v3377_v31 = vld [vmem:[%s3472_s24 + $0x158] sm:$0xff]  }
  0x18   : > { %3188 = vmatprep.subr.bf16.mxu0 %v3351_v7  ;;  %3327 = vmatprep.subr.bf16.mxu1 %v3351_v7  ;;  %v3378_v32 = vld [vmem:[%s3472_s24 + $0x60] sm:$0xff]   ;;  %v3380_v34 = vld [vmem:[%s3472_s24 + $0x68] sm:$0xff]   ;;  %v3382_v36 = vld [vmem:[%s3472_s24 + $0x70] sm:$0xff]  }
  0x19   : > { %v3379_v33 = vld [vmem:[%s3472_s24 + $0x160] sm:$0xff]   ;;  %v3381_v35 = vld [vmem:[%s3472_s24 + $0x168] sm:$0xff]   ;;  %v3383_v37 = vld [vmem:[%s3472_s24 + $0x170] sm:$0xff]  }
  0x1a   : > { %v3384_v38 = vld [vmem:[%s3472_s24 + $0x78] sm:$0xff]   ;;  %v3386_v40 = vld [vmem:[%s3472_s24 + $0x80] sm:$0xff]   ;;  %v3388_v42 = vld [vmem:[%s3472_s24 + $0x88] sm:$0xff]  }
  0x1b   : > { %3189 = vmatpush3.bf16.msra.mxu0 %v3351_v7  ;;  %3335 = vmatpush3.bf16.msra.mxu1 %v3351_v7  ;;  %v3385_v39 = vld [vmem:[%s3472_s24 + $0x178] sm:$0xff]   ;;  %v3387_v41 = vld [vmem:[%s3472_s24 + $0x180] sm:$0xff]   ;;  %v3389_v43 = vld [vmem:[%s3472_s24 + $0x188] sm:$0xff]  }
  0x1c   : > { %3190 = vmatprep.subr.bf16.mxu0 %v3352_v8  ;;  %3328 = vmatprep.subr.bf16.mxu1 %v3352_v8  ;;  %v3390_v44 = vld [vmem:[%s3472_s24 + $0x90] sm:$0xff]   ;;  %v3392_v46 = vld [vmem:[%s3472_s24 + $0x98] sm:$0xff]   ;;  %v3394_v48 = vld [vmem:[%s3472_s24 + $0xa0] sm:$0xff]  }
  0x1d   : > { %v3391_v45 = vld [vmem:[%s3472_s24 + $0x190] sm:$0xff]   ;;  %v3393_v47 = vld [vmem:[%s3472_s24 + $0x198] sm:$0xff]   ;;  %v3395_v49 = vld [vmem:[%s3472_s24 + $0x1a0] sm:$0xff]  }
  0x1e   : > { %v3396_v50 = vld [vmem:[%s3472_s24 + $0xa8] sm:$0xff]   ;;  %v3398_v52 = vld [vmem:[%s3472_s24 + $0xb0] sm:$0xff]   ;;  %v3400_v54 = vld [vmem:[%s3472_s24 + $0xb8] sm:$0xff]  }
  0x1f   : > { %3191 = vmatpush3.bf16.msra.mxu0 %v3352_v8  ;;  %3336 = vmatpush3.bf16.msra.mxu1 %v3352_v8  ;;  %v3397_v51 = vld [vmem:[%s3472_s24 + $0x1a8] sm:$0xff]   ;;  %v3399_v53 = vld [vmem:[%s3472_s24 + $0x1b0] sm:$0xff]   ;;  %v3401_v55 = vld [vmem:[%s3472_s24 + $0x1b8] sm:$0xff]  }
  0x20   : > { %3192 = vmatprep.subr.bf16.mxu0 %v3353_v9  ;;  %3329 = vmatprep.subr.bf16.mxu1 %v3353_v9  ;;  %v3402_v56 = vld [vmem:[%s3472_s24 + $0xc0] sm:$0xff]   ;;  %v3404_v58 = vld [vmem:[%s3472_s24 + $0xc8] sm:$0xff]   ;;  %v3406_v60 = vld [vmem:[%s3472_s24 + $0xd0] sm:$0xff]  }
  0x21   : > { %v3403_v57 = vld [vmem:[%s3472_s24 + $0x1c0] sm:$0xff]   ;;  %v3405_v59 = vld [vmem:[%s3472_s24 + $0x1c8] sm:$0xff]   ;;  %v3407_v61 = vld [vmem:[%s3472_s24 + $0x1d0] sm:$0xff]  }
  0x22   : > { %v3408_v62 = vld [vmem:[%s3472_s24 + $0xd8] sm:$0xff]   ;;  %v3410_v0 = vld [vmem:[%s3472_s24 + $0xe0] sm:$0xff]   ;;  %v3412_v2 = vld [vmem:[%s3472_s24 + $0xe8] sm:$0xff]  }
  0x23   : > { %3193 = vmatpush3.bf16.msra.mxu0 %v3353_v9  ;;  %3337 = vmatpush3.bf16.msra.mxu1 %v3353_v9  ;;  %v3409_v63 = vld [vmem:[%s3472_s24 + $0x1d8] sm:$0xff]   ;;  %v3411_v1 = vld [vmem:[%s3472_s24 + $0x1e0] sm:$0xff]   ;;  %v3413_v3 = vld [vmem:[%s3472_s24 + $0x1e8] sm:$0xff]  }
  0x24   : > { %v3414_v4 = vld [vmem:[%s3472_s24 + $0xf0] sm:$0xff]   ;;  %v3416_v6 = vld [vmem:[%s3472_s24 + $0xf8] sm:$0xff]   ;;  %v3556_v8 = vld [vmem:[%s3902_s2] ss:$0 sm:$0xff] }
  0x25   : > { %v3415_v5 = vld [vmem:[%s3472_s24 + $0x1f0] sm:$0xff]   ;;  %v3417_v7 = vld [vmem:[%s3472_s24 + $0x1f8] sm:$0xff]  }
  0x26   : > { %3195 = vmatmul.mubr.bf16.vlgmr.msra.gmra.mrb[0].mxu0 %v3356_v10  ;;  %3259 = vmatmul.mubr.bf16.vlgmr.msra.gmra.mrb[0].mxu1 %v3357_v11 }
  0x27   : > { %3198 = vmatprep.mubr.bf16.mxu0 %v3358_v12  ;;  %3262 = vmatprep.mubr.bf16.mxu1 %v3359_v13 }
  0x2e   : > { %3199 = vmatmul.mubr.bf16.gmra.mrb[4].mxu0 %v3360_v14  ;;  %3263 = vmatmul.mubr.bf16.gmra.mrb[4].mxu1 %v3361_v15 }
  0x2f   : > { %3202 = vmatprep.mubr.bf16.mxu0 %v3362_v16  ;;  %3266 = vmatprep.mubr.bf16.mxu1 %v3363_v17 }
  0x36   : > { %3203 = vmatmul.mubr.bf16.gmra.mrb[8].mxu0 %v3364_v18  ;;  %3267 = vmatmul.mubr.bf16.gmra.mrb[8].mxu1 %v3365_v19 }
  0x37   : > { %3206 = vmatprep.mubr.bf16.mxu0 %v3366_v20  ;;  %3270 = vmatprep.mubr.bf16.mxu1 %v3367_v21 }
  0x3e   : > { %3207 = vmatmul.mubr.bf16.gmra.mrb[12].mxu0 %v3368_v22  ;;  %3271 = vmatmul.mubr.bf16.gmra.mrb[12].mxu1 %v3369_v23 }
  0x3f   : > { %3210 = vmatprep.mubr.bf16.mxu0 %v3370_v24  ;;  %3274 = vmatprep.mubr.bf16.mxu1 %v3371_v25 }
  0x46   : > { %3211 = vmatmul.mubr.bf16.gmra.mrb[16].mxu0 %v3372_v26  ;;  %3275 = vmatmul.mubr.bf16.gmra.mrb[16].mxu1 %v3373_v27 }
  0x47   : > { %3214 = vmatprep.mubr.bf16.mxu0 %v3374_v28  ;;  %3278 = vmatprep.mubr.bf16.mxu1 %v3375_v29 }
  0x4e   : > { %3215 = vmatmul.mubr.bf16.gmra.mrb[20].mxu0 %v3376_v30  ;;  %3279 = vmatmul.mubr.bf16.gmra.mrb[20].mxu1 %v3377_v31 }
  0x4f   : > { %3218 = vmatprep.mubr.bf16.mxu0 %v3378_v32  ;;  %3282 = vmatprep.mubr.bf16.mxu1 %v3379_v33 }
  0x56   : > { %3219 = vmatmul.mubr.bf16.gmra.mrb[24].mxu0 %v3380_v34  ;;  %3283 = vmatmul.mubr.bf16.gmra.mrb[24].mxu1 %v3381_v35 }
  0x57   : > { %3222 = vmatprep.mubr.bf16.mxu0 %v3382_v36  ;;  %3286 = vmatprep.mubr.bf16.mxu1 %v3383_v37 }
  0x5e   : > { %3223 = vmatmul.mubr.bf16.gmra.mrb[28].mxu0 %v3384_v38  ;;  %3287 = vmatmul.mubr.bf16.gmra.mrb[28].mxu1 %v3385_v39 }
  0x5f   : > { %3226 = vmatprep.mubr.bf16.mxu0 %v3386_v40  ;;  %3290 = vmatprep.mubr.bf16.mxu1 %v3387_v41 }
  0x66   : > { %3227 = vmatmul.mubr.bf16.gmra.mrb[32].mxu0 %v3388_v42  ;;  %3291 = vmatmul.mubr.bf16.gmra.mrb[32].mxu1 %v3389_v43 }
  0x67   : > { %3230 = vmatprep.mubr.bf16.mxu0 %v3390_v44  ;;  %3294 = vmatprep.mubr.bf16.mxu1 %v3391_v45 }
  0x6e   : > { %3231 = vmatmul.mubr.bf16.gmra.mrb[36].mxu0 %v3392_v46  ;;  %3295 = vmatmul.mubr.bf16.gmra.mrb[36].mxu1 %v3393_v47 }
  0x6f   : > { %3234 = vmatprep.mubr.bf16.mxu0 %v3394_v48  ;;  %3298 = vmatprep.mubr.bf16.mxu1 %v3395_v49 }
  0x76   : > { %3235 = vmatmul.mubr.bf16.gmra.mrb[40].mxu0 %v3396_v50  ;;  %3299 = vmatmul.mubr.bf16.gmra.mrb[40].mxu1 %v3397_v51 }
  0x77   : > { %3238 = vmatprep.mubr.bf16.mxu0 %v3398_v52  ;;  %3302 = vmatprep.mubr.bf16.mxu1 %v3399_v53 }
  0x7e   : > { %3239 = vmatmul.mubr.bf16.gmra.mrb[44].mxu0 %v3400_v54  ;;  %3303 = vmatmul.mubr.bf16.gmra.mrb[44].mxu1 %v3401_v55 }
  0x7f   : > { %3242 = vmatprep.mubr.bf16.mxu0 %v3402_v56  ;;  %3306 = vmatprep.mubr.bf16.mxu1 %v3403_v57 }
  0x86   : > { %3243 = vmatmul.mubr.bf16.gmra.mrb[48].mxu0 %v3404_v58  ;;  %3307 = vmatmul.mubr.bf16.gmra.mrb[48].mxu1 %v3405_v59 }
  0x87   : > { %3246 = vmatprep.mubr.bf16.mxu0 %v3406_v60  ;;  %3310 = vmatprep.mubr.bf16.mxu1 %v3407_v61 }
  0x8e   : > { %3247 = vmatmul.mubr.bf16.gmra.mrb[52].mxu0 %v3408_v62  ;;  %3311 = vmatmul.mubr.bf16.gmra.mrb[52].mxu1 %v3409_v63 }
  0x8f   : > { %3250 = vmatprep.mubr.bf16.mxu0 %v3410_v0  ;;  %3314 = vmatprep.mubr.bf16.mxu1 %v3411_v1 }
  0x96   : > { %3251 = vmatmul.mubr.bf16.gmra.mrb[56].mxu0 %v3412_v2  ;;  %3315 = vmatmul.mubr.bf16.gmra.mrb[56].mxu1 %v3413_v3 }
  0x97   : > { %3254 = vmatprep.mubr.bf16.mxu0 %v3414_v4  ;;  %3318 = vmatprep.mubr.bf16.mxu1 %v3415_v5 }
  0x9e   : > { %3255 = vmatmul.mubr.bf16.gmra.mrb[60].mxu0 %v3416_v6  ;;  %3319 = vmatmul.mubr.bf16.gmra.mrb[60].mxu1 %v3417_v7 }
  0xf9   : > { %v3196_v9 = vpop.f32.mrb[0].mxu0  ;;  %v3260_v10 = vpop.f32.mrb[0].mxu1 }
  0xfa   : > { %v801_v11 = vadd.f32 %v3196_v9, %v3556_v8  ;;  %v1057_v12 = vadd.f32 %v3260_v10, %v3556_v8  ;;  %v792_v13 = vpop.f32.mrb[1].mxu0  ;;  %v1048_v14 = vpop.f32.mrb[1].mxu1 }
  0xfb   : > { %v793_v15 = vadd.f32 %v3556_v8, %v792_v13  ;;  %v1049_v16 = vadd.f32 %v3556_v8, %v1048_v14  ;;  %v3197_v17 = vpop.f32.mrb[2].mxu0  ;;  %v3261_v18 = vpop.f32.mrb[2].mxu1 }
  0xfc   : > { %vm1305_vm0 = vcmp.ge.f32.partialorder %v801_v11, 0.0  ;;  %v1433_v19 = vmul.f32 0.2, %v801_v11  ;;  %vm1369_vm1 = vcmp.ge.f32.partialorder %v1057_v12, 0.0  ;;  %v1497_v20 = vmul.f32 0.2, %v1057_v12 }
  0xfd   : > { %vm1303_vm2 = vcmp.ge.f32.partialorder %v793_v15, 0.0  ;;  %v1431_v21 = vmul.f32 0.2, %v793_v15  ;;  %vm1367_vm3 = vcmp.ge.f32.partialorder %v1049_v16, 0.0  ;;  %v1495_v22 = vmul.f32 0.2, %v1049_v16 }
  0xfe   : > { %v804_v23 = vadd.f32 %v3197_v17, %v3556_v8  ;;  %v1060_v24 = vadd.f32 %v3261_v18, %v3556_v8  ;;  %v795_v25 = vpop.f32.mrb[3].mxu0  ;;  %v1051_v26 = vpop.f32.mrb[3].mxu1  ;;  %v1561_v27 = vsel %vm1305_vm0, %v801_v11, %v1433_v19  ;;  %v1625_v28 = vsel %vm1369_vm1, %v1057_v12, %v1497_v20 }
  0xff   : > { %v796_v29 = vadd.f32 %v3556_v8, %v795_v25  ;;  %v1052_v30 = vadd.f32 %v3556_v8, %v1051_v26  ;;  %v1559_v35 = vsel %vm1303_vm2, %v793_v15, %v1431_v21  ;;  %v1623_v36 = vsel %vm1367_vm3, %v1049_v16, %v1495_v22 }
 0x100   : > { %vm1306_vm4 = vcmp.ge.f32.partialorder %v804_v23, 0.0  ;;  %v1434_v31 = vmul.f32 0.2, %v804_v23  ;;  %vm1370_vm5 = vcmp.ge.f32.partialorder %v1060_v24, 0.0  ;;  %v1498_v32 = vmul.f32 0.2, %v1060_v24 }
 0x101   : > { %vm1304_vm6 = vcmp.ge.f32.partialorder %v796_v29, 0.0  ;;  %v1432_v33 = vmul.f32 0.2, %v796_v29  ;;  %vm1368_vm7 = vcmp.ge.f32.partialorder %v1052_v30, 0.0  ;;  %v1496_v34 = vmul.f32 0.2, %v1052_v30 }
 0x102   : > { %v1562_v37 = vsel %vm1306_vm4, %v804_v23, %v1434_v31  ;;  %v1626_v38 = vsel %vm1370_vm5, %v1060_v24, %v1498_v32  ;;  %v3200_v39 = vpop.f32.mrb[4].mxu0  ;;  %v3264_v40 = vpop.f32.mrb[4].mxu1 }
 0x103   : > { %v2731_v41 = vpack.c.bf16 %v1562_v37, %v1561_v27  ;;  %v2891_v42 = vpack.c.bf16 %v1626_v38, %v1625_v28  ;;  %v1560_v43 = vsel %vm1304_vm6, %v796_v29, %v1432_v33  ;;  %v1624_v44 = vsel %vm1368_vm7, %v1052_v30, %v1496_v34  ;;  %v808_v45 = vpop.f32.mrb[5].mxu0  ;;  %v1064_v46 = vpop.f32.mrb[5].mxu1 }
 0x104   : > { %v2726_v47 = vpack.c.bf16 %v1560_v43, %v1559_v35  ;;  %v2886_v48 = vpack.c.bf16 %v1624_v44, %v1623_v36  ;;  %v817_v49 = vadd.f32 %v3200_v39, %v3556_v8  ;;  %v1073_v50 = vadd.f32 %v3264_v40, %v3556_v8  ;;  %v3201_v51 = vpop.f32.mrb[6].mxu0  ;;  %v3265_v52 = vpop.f32.mrb[6].mxu1 }
 0x105   : > { %3043 = vst [vmem:[%s3573_s13 + $0x8] sm:$0xff] %v2731_v41   ;;  %3075 = vst [vmem:[%s3573_s13 + $0x108] sm:$0xff] %v2891_v42   ;;  %v809_v53 = vadd.f32 %v3556_v8, %v808_v45  ;;  %v1065_v54 = vadd.f32 %v3556_v8, %v1064_v46  ;;  %v820_v55 = vadd.f32 %v3201_v51, %v3556_v8  ;;  %v811_v57 = vpop.f32.mrb[7].mxu0  ;;  %v1067_v58 = vpop.f32.mrb[7].mxu1 }
 0x106   : > { %v1076_v56 = vadd.f32 %v3265_v52, %v3556_v8  ;;  %2727 = vst [vmem:[%s3573_s13] sm:$0xff] %v2726_v47   ;;  %3074 = vst [vmem:[%s3573_s13 + $0x100] sm:$0xff] %v2886_v48   ;;  %vm1309_vm8 = vcmp.ge.f32.partialorder %v817_v49, 0.0  ;;  %v1437_v59 = vmul.f32 0.2, %v817_v49  ;;  %vm1373_vm9 = vcmp.ge.f32.partialorder %v1073_v50, 0.0 }
 0x107   : > { %v1501_v60 = vmul.f32 0.2, %v1073_v50  ;;  %vm1307_vm10 = vcmp.ge.f32.partialorder %v809_v53, 0.0  ;;  %v1435_v61 = vmul.f32 0.2, %v809_v53  ;;  %vm1371_vm11 = vcmp.ge.f32.partialorder %v1065_v54, 0.0 }
 0x108   : > { %v1499_v62 = vmul.f32 0.2, %v1065_v54  ;;  %v1565_v63 = vsel %vm1309_vm8, %v817_v49, %v1437_v59  ;;  %vm1310_vm12 = vcmp.ge.f32.partialorder %v820_v55, 0.0  ;;  %v1438_v1 = vmul.f32 0.2, %v820_v55 }
 0x109   : > { %v1629_v0 = vsel %vm1373_vm9, %v1073_v50, %v1501_v60  ;;  %v1563_v2 = vsel %vm1307_vm10, %v809_v53, %v1435_v61  ;;  %vm1374_vm13 = vcmp.ge.f32.partialorder %v1076_v56, 0.0  ;;  %v1502_v4 = vmul.f32 0.2, %v1076_v56  ;;  %v3204_v5 = vpop.f32.mrb[8].mxu0  ;;  %v3268_v6 = vpop.f32.mrb[8].mxu1 }
 0x10a   : > { %v1627_v3 = vsel %vm1371_vm11, %v1065_v54, %v1499_v62  ;;  %v1566_v7 = vsel %vm1310_vm12, %v820_v55, %v1438_v1  ;;  %v812_v9 = vadd.f32 %v3556_v8, %v811_v57  ;;  %v1068_v10 = vadd.f32 %v3556_v8, %v1067_v58  ;;  %v824_v12 = vpop.f32.mrb[9].mxu0  ;;  %v1080_v13 = vpop.f32.mrb[9].mxu1 }
 0x10b   : > { %v833_v11 = vadd.f32 %v3204_v5, %v3556_v8  ;;  %v2741_v14 = vpack.c.bf16 %v1566_v7, %v1565_v63  ;;  %v1630_v15 = vsel %vm1374_vm13, %v1076_v56, %v1502_v4  ;;  %v1089_v16 = vadd.f32 %v3268_v6, %v3556_v8  ;;  %v3205_v18 = vpop.f32.mrb[10].mxu0  ;;  %v3269_v19 = vpop.f32.mrb[10].mxu1 }
 0x10c   : > { %v825_v17 = vadd.f32 %v3556_v8, %v824_v12  ;;  %v2901_v20 = vpack.c.bf16 %v1630_v15, %v1629_v0  ;;  %vm1308_vm14 = vcmp.ge.f32.partialorder %v812_v9, 0.0  ;;  %v1436_v21 = vmul.f32 0.2, %v812_v9  ;;  %v827_v22 = vpop.f32.mrb[11].mxu0  ;;  %v1083_v23 = vpop.f32.mrb[11].mxu1 }
 0x10d   : > { %vm1372_vm15 = vcmp.ge.f32.partialorder %v1068_v10, 0.0  ;;  %3045 = vst [vmem:[%s3573_s13 + $0x18] sm:$0xff] %v2741_v14   ;;  %v1500_v24 = vmul.f32 0.2, %v1068_v10  ;;  %vm1313_vm0 = vcmp.ge.f32.partialorder %v833_v11, 0.0  ;;  %vm1377_vm1 = vcmp.ge.f32.partialorder %v1089_v16, 0.0 }
 0x10e   : > { %v1441_v25 = vmul.f32 0.2, %v833_v11  ;;  %3077 = vst [vmem:[%s3573_s13 + $0x118] sm:$0xff] %v2901_v20   ;;  %v1564_v26 = vsel %vm1308_vm14, %v812_v9, %v1436_v21  ;;  %v1505_v27 = vmul.f32 0.2, %v1089_v16  ;;  %vm1311_vm2 = vcmp.ge.f32.partialorder %v825_v17, 0.0 }
 0x10f   : > { %v1439_v28 = vmul.f32 0.2, %v825_v17  ;;  %v2736_v29 = vpack.c.bf16 %v1564_v26, %v1563_v2  ;;  %v1628_v30 = vsel %vm1372_vm15, %v1068_v10, %v1500_v24  ;;  %v1081_v32 = vadd.f32 %v3556_v8, %v1080_v13 }
 0x110   : > { %v1569_v31 = vsel %vm1313_vm0, %v833_v11, %v1441_v25  ;;  %v2896_v33 = vpack.c.bf16 %v1628_v30, %v1627_v3  ;;  %v1633_v34 = vsel %vm1377_vm1, %v1089_v16, %v1505_v27  ;;  %v836_v36 = vadd.f32 %v3205_v18, %v3556_v8 }
 0x111   : > { %v1567_v35 = vsel %vm1311_vm2, %v825_v17, %v1439_v28  ;;  %3044 = vst [vmem:[%s3573_s13 + $0x10] sm:$0xff] %v2736_v29   ;;  %vm1375_vm3 = vcmp.ge.f32.partialorder %v1081_v32, 0.0  ;;  %v1503_v37 = vmul.f32 0.2, %v1081_v32  ;;  %v1092_v38 = vadd.f32 %v3269_v19, %v3556_v8  ;;  %v3208_v40 = vpop.f32.mrb[12].mxu0  ;;  %v3272_v41 = vpop.f32.mrb[12].mxu1 }
 0x112   : > { %v828_v39 = vadd.f32 %v3556_v8, %v827_v22  ;;  %3076 = vst [vmem:[%s3573_s13 + $0x110] sm:$0xff] %v2896_v33   ;;  %vm1314_vm4 = vcmp.ge.f32.partialorder %v836_v36, 0.0  ;;  %v1442_v42 = vmul.f32 0.2, %v836_v36  ;;  %v1084_v43 = vadd.f32 %v3556_v8, %v1083_v23  ;;  %v840_v45 = vpop.f32.mrb[13].mxu0  ;;  %v1096_v46 = vpop.f32.mrb[13].mxu1 }
 0x113   : > { %v849_v44 = vadd.f32 %v3208_v40, %v3556_v8  ;;  %v1631_v47 = vsel %vm1375_vm3, %v1081_v32, %v1503_v37  ;;  %vm1378_vm5 = vcmp.ge.f32.partialorder %v1092_v38, 0.0  ;;  %v1506_v48 = vmul.f32 0.2, %v1092_v38  ;;  %v3209_v49 = vpop.f32.mrb[14].mxu0  ;;  %v3273_v50 = vpop.f32.mrb[14].mxu1 }
 0x114   : > { %vm1312_vm6 = vcmp.ge.f32.partialorder %v828_v39, 0.0  ;;  %v1570_v51 = vsel %vm1314_vm4, %v836_v36, %v1442_v42  ;;  %v1440_v52 = vmul.f32 0.2, %v828_v39  ;;  %vm1376_vm7 = vcmp.ge.f32.partialorder %v1084_v43, 0.0  ;;  %v843_v54 = vpop.f32.mrb[15].mxu0  ;;  %v1099_v58 = vpop.f32.mrb[15].mxu1 }
 0x115   : > { %v1504_v53 = vmul.f32 0.2, %v1084_v43  ;;  %v2751_v55 = vpack.c.bf16 %v1570_v51, %v1569_v31  ;;  %v1634_v56 = vsel %vm1378_vm5, %v1092_v38, %v1506_v48  ;;  %vm1317_vm8 = vcmp.ge.f32.partialorder %v849_v44, 0.0 }
 0x116   : > { %v1445_v57 = vmul.f32 0.2, %v849_v44  ;;  %v2911_v59 = vpack.c.bf16 %v1634_v56, %v1633_v34  ;;  %v1568_v60 = vsel %vm1312_vm6, %v828_v39, %v1440_v52  ;;  %v1105_v62 = vadd.f32 %v3272_v41, %v3556_v8 }
 0x117   : > { %v1632_v61 = vsel %vm1376_vm7, %v1084_v43, %v1504_v53  ;;  %3047 = vst [vmem:[%s3573_s13 + $0x28] sm:$0xff] %v2751_v55   ;;  %v2746_v63 = vpack.c.bf16 %v1568_v60, %v1567_v35  ;;  %v841_v2 = vadd.f32 %v3556_v8, %v840_v45  ;;  %v1097_v4 = vadd.f32 %v3556_v8, %v1096_v46 }
 0x118   : > { %v2906_v0 = vpack.c.bf16 %v1632_v61, %v1631_v47  ;;  %v1573_v1 = vsel %vm1317_vm8, %v849_v44, %v1445_v57  ;;  %3079 = vst [vmem:[%s3573_s13 + $0x128] sm:$0xff] %v2911_v59   ;;  %vm1381_vm9 = vcmp.ge.f32.partialorder %v1105_v62, 0.0  ;;  %v1509_v3 = vmul.f32 0.2, %v1105_v62 }
 0x119   : > { %v852_v5 = vadd.f32 %v3209_v49, %v3556_v8  ;;  %3046 = vst [vmem:[%s3573_s13 + $0x20] sm:$0xff] %v2746_v63   ;;  %vm1315_vm10 = vcmp.ge.f32.partialorder %v841_v2, 0.0  ;;  %v1443_v6 = vmul.f32 0.2, %v841_v2  ;;  %v1108_v7 = vadd.f32 %v3273_v50, %v3556_v8  ;;  %v3212_v10 = vpop.f32.mrb[16].mxu0  ;;  %v3276_v11 = vpop.f32.mrb[16].mxu1 }
 0x11a   : > { %3078 = vst [vmem:[%s3573_s13 + $0x120] sm:$0xff] %v2906_v0   ;;  %v844_v9 = vadd.f32 %v3556_v8, %v843_v54  ;;  %v1637_v12 = vsel %vm1381_vm9, %v1105_v62, %v1509_v3  ;;  %vm1379_vm11 = vcmp.ge.f32.partialorder %v1097_v4, 0.0  ;;  %v1507_v13 = vmul.f32 0.2, %v1097_v4  ;;  %v856_v14 = vpop.f32.mrb[17].mxu0  ;;  %v1112_v15 = vpop.f32.mrb[17].mxu1 }
 0x11b   : > { %vm1318_vm12 = vcmp.ge.f32.partialorder %v852_v5, 0.0  ;;  %v1571_v16 = vsel %vm1315_vm10, %v841_v2, %v1443_v6  ;;  %v1446_v17 = vmul.f32 0.2, %v852_v5  ;;  %vm1382_vm13 = vcmp.ge.f32.partialorder %v1108_v7, 0.0  ;;  %v3213_v19 = vpop.f32.mrb[18].mxu0  ;;  %v3277_v23 = vpop.f32.mrb[18].mxu1 }
 0x11c   : > { %v1510_v18 = vmul.f32 0.2, %v1108_v7  ;;  %v1635_v20 = vsel %vm1379_vm11, %v1097_v4, %v1507_v13  ;;  %vm1316_vm14 = vcmp.ge.f32.partialorder %v844_v9, 0.0  ;;  %v1444_v21 = vmul.f32 0.2, %v844_v9  ;;  %v859_v24 = vpop.f32.mrb[19].mxu0 }
 0x11d   : > { %v1100_v22 = vadd.f32 %v3556_v8, %v1099_v58  ;;  %v1574_v25 = vsel %vm1318_vm12, %v852_v5, %v1446_v17  ;;  %v865_v27 = vadd.f32 %v3212_v10, %v3556_v8  ;;  %v1121_v28 = vadd.f32 %v3276_v11, %v3556_v8  ;;  %v1115_v29 = vpop.f32.mrb[19].mxu1 }
 0x11e   : > { %v1638_v26 = vsel %vm1382_vm13, %v1108_v7, %v1510_v18  ;;  %v2761_v30 = vpack.c.bf16 %v1574_v25, %v1573_v1  ;;  %v1572_v32 = vsel %vm1316_vm14, %v844_v9, %v1444_v21  ;;  %v857_v37 = vadd.f32 %v3556_v8, %v856_v14 }
 0x11f   : > { %v2921_v31 = vpack.c.bf16 %v1638_v26, %v1637_v12  ;;  %vm1380_vm15 = vcmp.ge.f32.partialorder %v1100_v22, 0.0  ;;  %v2756_v33 = vpack.c.bf16 %v1572_v32, %v1571_v16  ;;  %v1508_v34 = vmul.f32 0.2, %v1100_v22 }
 0x120   : > { %vm1321_vm0 = vcmp.ge.f32.partialorder %v865_v27, 0.0  ;;  %v1449_v35 = vmul.f32 0.2, %v865_v27  ;;  %3049 = vst [vmem:[%s3573_s13 + $0x38] sm:$0xff] %v2761_v30   ;;  %vm1385_vm1 = vcmp.ge.f32.partialorder %v1121_v28, 0.0  ;;  %v1113_v38 = vadd.f32 %v3556_v8, %v1112_v15 }
 0x121   : > { %3081 = vst [vmem:[%s3573_s13 + $0x138] sm:$0xff] %v2921_v31   ;;  %v1513_v36 = vmul.f32 0.2, %v1121_v28  ;;  %3048 = vst [vmem:[%s3573_s13 + $0x30] sm:$0xff] %v2756_v33   ;;  %v1636_v39 = vsel %vm1380_vm15, %v1100_v22, %v1508_v34  ;;  %v868_v41 = vadd.f32 %v3213_v19, %v3556_v8  ;;  %v1124_v42 = vadd.f32 %v3277_v23, %v3556_v8  ;;  %v3216_v43 = vpop.f32.mrb[20].mxu0  ;;  %v3280_v44 = vpop.f32.mrb[20].mxu1 }
 0x122   : > { %v1577_v40 = vsel %vm1321_vm0, %v865_v27, %v1449_v35  ;;  %v2916_v45 = vpack.c.bf16 %v1636_v39, %v1635_v20  ;;  %vm1319_vm2 = vcmp.ge.f32.partialorder %v857_v37, 0.0  ;;  %v1447_v47 = vmul.f32 0.2, %v857_v37  ;;  %v872_v48 = vpop.f32.mrb[21].mxu0  ;;  %v1128_v49 = vpop.f32.mrb[21].mxu1 }
 0x123   : > { %v1641_v46 = vsel %vm1385_vm1, %v1121_v28, %v1513_v36  ;;  %vm1383_vm3 = vcmp.ge.f32.partialorder %v1113_v38, 0.0  ;;  %v1511_v50 = vmul.f32 0.2, %v1113_v38  ;;  %vm1322_vm4 = vcmp.ge.f32.partialorder %v868_v41, 0.0  ;;  %v3217_v55 = vpop.f32.mrb[22].mxu0  ;;  %v3281_v56 = vpop.f32.mrb[22].mxu1 }
 0x124   : > { %v1450_v51 = vmul.f32 0.2, %v868_v41  ;;  %3080 = vst [vmem:[%s3573_s13 + $0x130] sm:$0xff] %v2916_v45   ;;  %v1575_v52 = vsel %vm1319_vm2, %v857_v37, %v1447_v47  ;;  %vm1386_vm5 = vcmp.ge.f32.partialorder %v1124_v42, 0.0  ;;  %v1514_v53 = vmul.f32 0.2, %v1124_v42 }
 0x125   : > { %v860_v54 = vadd.f32 %v3556_v8, %v859_v24  ;;  %v1639_v57 = vsel %vm1383_vm3, %v1113_v38, %v1511_v50  ;;  %v1116_v59 = vadd.f32 %v3556_v8, %v1115_v29  ;;  %v881_v60 = vadd.f32 %v3216_v43, %v3556_v8  ;;  %v875_v61 = vpop.f32.mrb[23].mxu0  ;;  %v1131_v62 = vpop.f32.mrb[23].mxu1 }
 0x126   : > { %v1578_v58 = vsel %vm1322_vm4, %v868_v41, %v1450_v51  ;;  %v1642_v0 = vsel %vm1386_vm5, %v1124_v42, %v1514_v53  ;;  %v1137_v6 = vadd.f32 %v3280_v44, %v3556_v8  ;;  %v873_v7 = vadd.f32 %v3556_v8, %v872_v48 }
 0x127   : > { %v2771_v63 = vpack.c.bf16 %v1578_v58, %v1577_v40  ;;  %vm1320_vm6 = vcmp.ge.f32.partialorder %v860_v54, 0.0  ;;  %v1448_v1 = vmul.f32 0.2, %v860_v54  ;;  %v2931_v2 = vpack.c.bf16 %v1642_v0, %v1641_v46 }
 0x128   : > { %vm1384_vm7 = vcmp.ge.f32.partialorder %v1116_v59, 0.0  ;;  %v1512_v3 = vmul.f32 0.2, %v1116_v59  ;;  %vm1325_vm8 = vcmp.ge.f32.partialorder %v881_v60, 0.0  ;;  %v1453_v5 = vmul.f32 0.2, %v881_v60 }
 0x129   : > { %3051 = vst [vmem:[%s3573_s13 + $0x48] sm:$0xff] %v2771_v63   ;;  %v1576_v4 = vsel %vm1320_vm6, %v860_v54, %v1448_v1  ;;  %3083 = vst [vmem:[%s3573_s13 + $0x148] sm:$0xff] %v2931_v2   ;;  %v1129_v11 = vadd.f32 %v3556_v8, %v1128_v49  ;;  %v884_v12 = vadd.f32 %v3217_v55, %v3556_v8  ;;  %v3220_v13 = vpop.f32.mrb[24].mxu0  ;;  %v3284_v14 = vpop.f32.mrb[24].mxu1  ;;  %vm1389_vm9 = vcmp.ge.f32.partialorder %v1137_v6, 0.0 }
 0x12a   : > { %v2766_v9 = vpack.c.bf16 %v1576_v4, %v1575_v52  ;;  %v1640_v10 = vsel %vm1384_vm7, %v1116_v59, %v1512_v3  ;;  %v1581_v16 = vsel %vm1325_vm8, %v881_v60, %v1453_v5  ;;  %v1517_v17 = vmul.f32 0.2, %v1137_v6  ;;  %v888_v18 = vpop.f32.mrb[25].mxu0  ;;  %v1144_v19 = vpop.f32.mrb[25].mxu1 }
 0x12b   : > { %v2926_v15 = vpack.c.bf16 %v1640_v10, %v1639_v57  ;;  %vm1323_vm10 = vcmp.ge.f32.partialorder %v873_v7, 0.0  ;;  %v1451_v20 = vmul.f32 0.2, %v873_v7  ;;  %vm1387_vm11 = vcmp.ge.f32.partialorder %v1129_v11, 0.0  ;;  %v3221_v25 = vpop.f32.mrb[26].mxu0  ;;  %v3285_v26 = vpop.f32.mrb[26].mxu1 }
 0x12c   : > { %3050 = vst [vmem:[%s3573_s13 + $0x40] sm:$0xff] %v2766_v9   ;;  %v1515_v21 = vmul.f32 0.2, %v1129_v11  ;;  %v1645_v22 = vsel %vm1389_vm9, %v1137_v6, %v1517_v17  ;;  %vm1326_vm12 = vcmp.ge.f32.partialorder %v884_v12, 0.0  ;;  %v1454_v23 = vmul.f32 0.2, %v884_v12 }
 0x12d   : > { %3082 = vst [vmem:[%s3573_s13 + $0x140] sm:$0xff] %v2926_v15   ;;  %v1140_v24 = vadd.f32 %v3281_v56, %v3556_v8  ;;  %v1579_v27 = vsel %vm1323_vm10, %v873_v7, %v1451_v20  ;;  %v876_v29 = vadd.f32 %v3556_v8, %v875_v61  ;;  %v1132_v30 = vadd.f32 %v3556_v8, %v1131_v62  ;;  %v891_v31 = vpop.f32.mrb[27].mxu0  ;;  %v1147_v32 = vpop.f32.mrb[27].mxu1 }
 0x12e   : > { %v1643_v28 = vsel %vm1387_vm11, %v1129_v11, %v1515_v21  ;;  %v1582_v33 = vsel %vm1326_vm12, %v884_v12, %v1454_v23  ;;  %v897_v35 = vadd.f32 %v3220_v13, %v3556_v8  ;;  %v1153_v43 = vadd.f32 %v3284_v14, %v3556_v8 }
 0x12f   : > { %vm1390_vm13 = vcmp.ge.f32.partialorder %v1140_v24, 0.0  ;;  %v1518_v34 = vmul.f32 0.2, %v1140_v24  ;;  %v2781_v36 = vpack.c.bf16 %v1582_v33, %v1581_v16  ;;  %vm1324_vm14 = vcmp.ge.f32.partialorder %v876_v29, 0.0 }
 0x130   : > { %v1452_v37 = vmul.f32 0.2, %v876_v29  ;;  %vm1388_vm15 = vcmp.ge.f32.partialorder %v1132_v30, 0.0  ;;  %v1516_v39 = vmul.f32 0.2, %v1132_v30  ;;  %vm1329_vm0 = vcmp.ge.f32.partialorder %v897_v35, 0.0 }
 0x131   : > { %v1646_v38 = vsel %vm1390_vm13, %v1140_v24, %v1518_v34  ;;  %v1457_v40 = vmul.f32 0.2, %v897_v35  ;;  %3053 = vst [vmem:[%s3573_s13 + $0x58] sm:$0xff] %v2781_v36   ;;  %v889_v44 = vadd.f32 %v3556_v8, %v888_v18  ;;  %v3224_v45 = vpop.f32.mrb[28].mxu0  ;;  %v3288_v46 = vpop.f32.mrb[28].mxu1  ;;  %v1145_v50 = vadd.f32 %v3556_v8, %v1144_v19 }
 0x132   : > { %v2941_v41 = vpack.c.bf16 %v1646_v38, %v1645_v22  ;;  %v1580_v42 = vsel %vm1324_vm14, %v876_v29, %v1452_v37  ;;  %v1644_v48 = vsel %vm1388_vm15, %v1132_v30, %v1516_v39  ;;  %v904_v51 = vpop.f32.mrb[29].mxu0  ;;  %v1160_v52 = vpop.f32.mrb[29].mxu1  ;;  %vm1393_vm1 = vcmp.ge.f32.partialorder %v1153_v43, 0.0 }
 0x133   : > { %v2776_v47 = vpack.c.bf16 %v1580_v42, %v1579_v27  ;;  %v1585_v49 = vsel %vm1329_vm0, %v897_v35, %v1457_v40  ;;  %v2936_v53 = vpack.c.bf16 %v1644_v48, %v1643_v28  ;;  %v1521_v54 = vmul.f32 0.2, %v1153_v43  ;;  %v3225_v55 = vpop.f32.mrb[30].mxu0  ;;  %v3289_v56 = vpop.f32.mrb[30].mxu1 }
 0x134   : > { %3085 = vst [vmem:[%s3573_s13 + $0x158] sm:$0xff] %v2941_v41   ;;  %vm1327_vm2 = vcmp.ge.f32.partialorder %v889_v44, 0.0  ;;  %v1455_v57 = vmul.f32 0.2, %v889_v44  ;;  %vm1391_vm3 = vcmp.ge.f32.partialorder %v1145_v50, 0.0  ;;  %v900_v59 = vadd.f32 %v3221_v25, %v3556_v8  ;;  %v907_v60 = vpop.f32.mrb[31].mxu0 }
 0x135   : > { %3052 = vst [vmem:[%s3573_s13 + $0x50] sm:$0xff] %v2776_v47   ;;  %v1519_v58 = vmul.f32 0.2, %v1145_v50  ;;  %3084 = vst [vmem:[%s3573_s13 + $0x150] sm:$0xff] %v2936_v53   ;;  %v1649_v61 = vsel %vm1393_vm1, %v1153_v43, %v1521_v54  ;;  %v1156_v62 = vadd.f32 %v3285_v26, %v3556_v8  ;;  %v892_v63 = vadd.f32 %v3556_v8, %v891_v31  ;;  %v1163_v1 = vpop.f32.mrb[31].mxu1 }
 0x136   : > { %v1148_v0 = vadd.f32 %v3556_v8, %v1147_v32  ;;  %v1583_v2 = vsel %vm1327_vm2, %v889_v44, %v1455_v57  ;;  %vm1330_vm4 = vcmp.ge.f32.partialorder %v900_v59, 0.0  ;;  %v1458_v4 = vmul.f32 0.2, %v900_v59 }
 0x137   : > { %v1647_v3 = vsel %vm1391_vm3, %v1145_v50, %v1519_v58  ;;  %vm1394_vm5 = vcmp.ge.f32.partialorder %v1156_v62, 0.0  ;;  %v1522_v5 = vmul.f32 0.2, %v1156_v62  ;;  %vm1328_vm6 = vcmp.ge.f32.partialorder %v892_v63, 0.0 }
 0x138   : > { %v1456_v6 = vmul.f32 0.2, %v892_v63  ;;  %v1586_v7 = vsel %vm1330_vm4, %v900_v59, %v1458_v4  ;;  %vm1392_vm7 = vcmp.ge.f32.partialorder %v1148_v0, 0.0  ;;  %v1520_v9 = vmul.f32 0.2, %v1148_v0 }
 0x139   : > { %v913_v10 = vadd.f32 %v3224_v45, %v3556_v8  ;;  %v2791_v11 = vpack.c.bf16 %v1586_v7, %v1585_v49  ;;  %v1650_v12 = vsel %vm1394_vm5, %v1156_v62, %v1522_v5  ;;  %v1169_v14 = vadd.f32 %v3288_v46, %v3556_v8  ;;  %v3228_v15 = vpop.f32.mrb[32].mxu0  ;;  %v3292_v16 = vpop.f32.mrb[32].mxu1 }
 0x13a   : > { %v1584_v13 = vsel %vm1328_vm6, %v892_v63, %v1456_v6  ;;  %v2951_v17 = vpack.c.bf16 %v1650_v12, %v1649_v61  ;;  %v1648_v19 = vsel %vm1392_vm7, %v1148_v0, %v1520_v9  ;;  %v920_v20 = vpop.f32.mrb[33].mxu0  ;;  %v1176_v21 = vpop.f32.mrb[33].mxu1  ;;  %v905_v26 = vadd.f32 %v3556_v8, %v904_v51 }
 0x13b   : > { %v2786_v18 = vpack.c.bf16 %v1584_v13, %v1583_v2  ;;  %vm1333_vm8 = vcmp.ge.f32.partialorder %v913_v10, 0.0  ;;  %3055 = vst [vmem:[%s3573_s13 + $0x68] sm:$0xff] %v2791_v11   ;;  %v2946_v22 = vpack.c.bf16 %v1648_v19, %v1647_v3  ;;  %v1461_v23 = vmul.f32 0.2, %v913_v10  ;;  %v3229_v25 = vpop.f32.mrb[34].mxu0  ;;  %v3293_v30 = vpop.f32.mrb[34].mxu1 }
 0x13c   : > { %vm1397_vm9 = vcmp.ge.f32.partialorder %v1169_v14, 0.0  ;;  %v1525_v24 = vmul.f32 0.2, %v1169_v14  ;;  %3087 = vst [vmem:[%s3573_s13 + $0x168] sm:$0xff] %v2951_v17   ;;  %v1161_v27 = vadd.f32 %v3556_v8, %v1160_v52  ;;  %v916_v28 = vadd.f32 %v3225_v55, %v3556_v8  ;;  %v923_v31 = vpop.f32.mrb[35].mxu0  ;;  %v1179_v36 = vpop.f32.mrb[35].mxu1 }
 0x13d   : > { %3054 = vst [vmem:[%s3573_s13 + $0x60] sm:$0xff] %v2786_v18   ;;  %v1172_v29 = vadd.f32 %v3289_v56, %v3556_v8  ;;  %3086 = vst [vmem:[%s3573_s13 + $0x160] sm:$0xff] %v2946_v22   ;;  %v1589_v32 = vsel %vm1333_vm8, %v913_v10, %v1461_v23  ;;  %v908_v34 = vadd.f32 %v3556_v8, %v907_v60  ;;  %vm1331_vm10 = vcmp.ge.f32.partialorder %v905_v26, 0.0 }
 0x13e   : > { %v1653_v33 = vsel %vm1397_vm9, %v1169_v14, %v1525_v24  ;;  %v1164_v35 = vadd.f32 %v3556_v8, %v1163_v1  ;;  %v1459_v37 = vmul.f32 0.2, %v905_v26  ;;  %vm1395_vm11 = vcmp.ge.f32.partialorder %v1161_v27, 0.0 }
 0x13f   : > { %v1523_v38 = vmul.f32 0.2, %v1161_v27  ;;  %vm1334_vm12 = vcmp.ge.f32.partialorder %v916_v28, 0.0  ;;  %v1462_v39 = vmul.f32 0.2, %v916_v28  ;;  %vm1398_vm13 = vcmp.ge.f32.partialorder %v1172_v29, 0.0 }
 0x140   : > { %v1526_v40 = vmul.f32 0.2, %v1172_v29  ;;  %v1587_v41 = vsel %vm1331_vm10, %v905_v26, %v1459_v37  ;;  %vm1332_vm14 = vcmp.ge.f32.partialorder %v908_v34, 0.0  ;;  %v1460_v43 = vmul.f32 0.2, %v908_v34 }
 0x141   : > { %v1651_v42 = vsel %vm1395_vm11, %v1161_v27, %v1523_v38  ;;  %v1590_v44 = vsel %vm1334_vm12, %v916_v28, %v1462_v39  ;;  %vm1396_vm15 = vcmp.ge.f32.partialorder %v1164_v35, 0.0  ;;  %v1524_v46 = vmul.f32 0.2, %v1164_v35  ;;  %v3232_v47 = vpop.f32.mrb[36].mxu0  ;;  %v3296_v48 = vpop.f32.mrb[36].mxu1 }
 0x142   : > { %v1654_v45 = vsel %vm1398_vm13, %v1172_v29, %v1526_v40  ;;  %v2801_v49 = vpack.c.bf16 %v1590_v44, %v1589_v32  ;;  %v1588_v51 = vsel %vm1332_vm14, %v908_v34, %v1460_v43  ;;  %v929_v52 = vadd.f32 %v3228_v15, %v3556_v8  ;;  %v3661_v53 = vpop.f32.mrb[37].mxu0  ;;  %v3663_v54 = vpop.f32.mrb[37].mxu1 }
 0x143   : > { %v2961_v50 = vpack.c.bf16 %v1654_v45, %v1653_v33  ;;  %v2796_v55 = vpack.c.bf16 %v1588_v51, %v1587_v41  ;;  %v1652_v56 = vsel %vm1396_vm15, %v1164_v35, %v1524_v46  ;;  %v1185_v57 = vadd.f32 %v3292_v16, %v3556_v8  ;;  %v3233_v59 = vpop.f32.mrb[38].mxu0  ;;  %v3297_v60 = vpop.f32.mrb[38].mxu1 }
 0x144   : > { %v921_v58 = vadd.f32 %v3556_v8, %v920_v20  ;;  %3057 = vst [vmem:[%s3573_s13 + $0x78] sm:$0xff] %v2801_v49   ;;  %v2956_v61 = vpack.c.bf16 %v1652_v56, %v1651_v42  ;;  %vm1337_vm0 = vcmp.ge.f32.partialorder %v929_v52, 0.0  ;;  %v1465_v62 = vmul.f32 0.2, %v929_v52  ;;  %v939_v0 = vpop.f32.mrb[39].mxu0  ;;  %v1195_v1 = vpop.f32.mrb[39].mxu1 }
 0x145   : > { %3089 = vst [vmem:[%s3573_s13 + $0x178] sm:$0xff] %v2961_v50   ;;  %v1177_v63 = vadd.f32 %v3556_v8, %v1176_v21  ;;  %3056 = vst [vmem:[%s3573_s13 + $0x70] sm:$0xff] %v2796_v55   ;;  %vm1401_vm1 = vcmp.ge.f32.partialorder %v1185_v57, 0.0  ;;  %v1529_v2 = vmul.f32 0.2, %v1185_v57  ;;  %v932_v6 = vadd.f32 %v3229_v25, %v3556_v8 }
 0x146   : > { %vm1335_vm2 = vcmp.ge.f32.partialorder %v921_v58, 0.0  ;;  %v1463_v3 = vmul.f32 0.2, %v921_v58  ;;  %3088 = vst [vmem:[%s3573_s13 + $0x170] sm:$0xff] %v2956_v61   ;;  %v1593_v4 = vsel %vm1337_vm0, %v929_v52, %v1465_v62  ;;  %v1188_v10 = vadd.f32 %v3293_v30, %v3556_v8 }
 0x147   : > { %vm1399_vm3 = vcmp.ge.f32.partialorder %v1177_v63, 0.0  ;;  %v1527_v5 = vmul.f32 0.2, %v1177_v63  ;;  %v1657_v7 = vsel %vm1401_vm1, %v1185_v57, %v1529_v2  ;;  %v924_v11 = vadd.f32 %v3556_v8, %v923_v31 }
 0x148   : > { %v1591_v9 = vsel %vm1335_vm2, %v921_v58, %v1463_v3  ;;  %vm1338_vm4 = vcmp.ge.f32.partialorder %v932_v6, 0.0  ;;  %v1466_v13 = vmul.f32 0.2, %v932_v6  ;;  %v1180_v14 = vadd.f32 %v3556_v8, %v1179_v36 }
 0x149   : > { %v1655_v12 = vsel %vm1399_vm3, %v1177_v63, %v1527_v5  ;;  %vm1402_vm5 = vcmp.ge.f32.partialorder %v1188_v10, 0.0  ;;  %v1530_v15 = vmul.f32 0.2, %v1188_v10  ;;  %vm1336_vm6 = vcmp.ge.f32.partialorder %v924_v11, 0.0  ;;  %v3236_v20 = vpop.f32.mrb[40].mxu0  ;;  %v3300_v21 = vpop.f32.mrb[40].mxu1 }
 0x14a   : > { %v1464_v16 = vmul.f32 0.2, %v924_v11  ;;  %v1594_v17 = vsel %vm1338_vm4, %v932_v6, %v1466_v13  ;;  %vm1400_vm7 = vcmp.ge.f32.partialorder %v1180_v14, 0.0  ;;  %v1528_v18 = vmul.f32 0.2, %v1180_v14  ;;  %v952_v26 = vpop.f32.mrb[41].mxu0 }
 0x14b   : > { %v945_v19 = vadd.f32 %v3232_v47, %v3556_v8  ;;  %v2811_v22 = vpack.c.bf16 %v1594_v17, %v1593_v4  ;;  %v1658_v23 = vsel %vm1402_vm5, %v1188_v10, %v1530_v15  ;;  %v1201_v25 = vadd.f32 %v3296_v48, %v3556_v8  ;;  %v1208_v27 = vpop.f32.mrb[41].mxu1  ;;  %v3678_v31 = vpop.f32.mrb[42].mxu0 }
 0x14c   : > { %v1592_v24 = vsel %vm1336_vm6, %v924_v11, %v1464_v16  ;;  %v2971_v28 = vpack.c.bf16 %v1658_v23, %v1657_v7  ;;  %v1656_v30 = vsel %vm1400_vm7, %v1180_v14, %v1528_v18  ;;  %v3680_v32 = vpop.f32.mrb[42].mxu1  ;;  %v3683_v36 = vpop.f32.mrb[43].mxu0  ;;  %v937_v37 = vadd.f32 %v3556_v8, %v3661_v53 }
 0x14d   : > { %v2806_v29 = vpack.c.bf16 %v1592_v24, %v1591_v9  ;;  %vm1341_vm8 = vcmp.ge.f32.partialorder %v945_v19, 0.0  ;;  %3059 = vst [vmem:[%s3573_s13 + $0x88] sm:$0xff] %v2811_v22   ;;  %v2966_v33 = vpack.c.bf16 %v1656_v30, %v1655_v12  ;;  %v1469_v34 = vmul.f32 0.2, %v945_v19  ;;  %v3693_v41 = vpop.f32.mrb[43].mxu1 }
 0x14e   : > { %vm1405_vm9 = vcmp.ge.f32.partialorder %v1201_v25, 0.0  ;;  %v1533_v35 = vmul.f32 0.2, %v1201_v25  ;;  %3091 = vst [vmem:[%s3573_s13 + $0x188] sm:$0xff] %v2971_v28   ;;  %v1193_v38 = vadd.f32 %v3556_v8, %v3663_v54  ;;  %v948_v39 = vadd.f32 %v3233_v59, %v3556_v8 }
 0x14f   : > { %3058 = vst [vmem:[%s3573_s13 + $0x80] sm:$0xff] %v2806_v29   ;;  %v1204_v40 = vadd.f32 %v3297_v60, %v3556_v8  ;;  %3090 = vst [vmem:[%s3573_s13 + $0x180] sm:$0xff] %v2966_v33   ;;  %v1597_v42 = vsel %vm1341_vm8, %v945_v19, %v1469_v34  ;;  %v940_v44 = vadd.f32 %v3556_v8, %v939_v0  ;;  %vm1339_vm10 = vcmp.ge.f32.partialorder %v937_v37, 0.0  ;;  %v3724_v19 = vld [vmem:[%s3902_s2] ss:$0 sm:$0xff] }
 0x150   : > { %v1661_v43 = vsel %vm1405_vm9, %v1201_v25, %v1533_v35  ;;  %v1196_v45 = vadd.f32 %v3556_v8, %v1195_v1  ;;  %v1467_v46 = vmul.f32 0.2, %v937_v37  ;;  %vm1403_vm11 = vcmp.ge.f32.partialorder %v1193_v38, 0.0 }
 0x151   : > { %v1531_v47 = vmul.f32 0.2, %v1193_v38  ;;  %vm1342_vm12 = vcmp.ge.f32.partialorder %v948_v39, 0.0  ;;  %v1470_v48 = vmul.f32 0.2, %v948_v39  ;;  %vm1406_vm13 = vcmp.ge.f32.partialorder %v1204_v40, 0.0 }
 0x152   : > { %v1534_v49 = vmul.f32 0.2, %v1204_v40  ;;  %v1595_v50 = vsel %vm1339_vm10, %v937_v37, %v1467_v46  ;;  %vm1340_vm14 = vcmp.ge.f32.partialorder %v940_v44, 0.0  ;;  %v1468_v52 = vmul.f32 0.2, %v940_v44  ;;  %v3240_v53 = vpop.f32.mrb[44].mxu0 }
 0x153   : > { %v1659_v51 = vsel %vm1403_vm11, %v1193_v38, %v1531_v47  ;;  %v3304_v54 = vpop.f32.mrb[44].mxu1  ;;  %v1598_v55 = vsel %vm1342_vm12, %v948_v39, %v1470_v48  ;;  %vm1404_vm15 = vcmp.ge.f32.partialorder %v1196_v45, 0.0  ;;  %v1532_v57 = vmul.f32 0.2, %v1196_v45  ;;  %v3699_v58 = vpop.f32.mrb[45].mxu0 }
 0x154   : > { %v1662_v56 = vsel %vm1406_vm13, %v1204_v40, %v1534_v49  ;;  %v3701_v59 = vpop.f32.mrb[45].mxu1  ;;  %v2821_v60 = vpack.c.bf16 %v1598_v55, %v1597_v42  ;;  %v1596_v62 = vsel %vm1340_vm14, %v940_v44, %v1468_v52  ;;  %v961_v63 = vadd.f32 %v3236_v20, %v3556_v8  ;;  %v3704_v0 = vpop.f32.mrb[46].mxu0 }
 0x155   : > { %v2981_v61 = vpack.c.bf16 %v1662_v56, %v1661_v43  ;;  %v3706_v1 = vpop.f32.mrb[46].mxu1  ;;  %v2816_v2 = vpack.c.bf16 %v1596_v62, %v1595_v50  ;;  %v1660_v3 = vsel %vm1404_vm15, %v1196_v45, %v1532_v57  ;;  %v1217_v4 = vadd.f32 %v3300_v21, %v3556_v8  ;;  %v3710_v6 = vpop.f32.mrb[47].mxu0 }
 0x156   : > { %v953_v5 = vadd.f32 %v3556_v8, %v952_v26  ;;  %v3712_v7 = vpop.f32.mrb[47].mxu1  ;;  %3061 = vst [vmem:[%s3573_s13 + $0x98] sm:$0xff] %v2821_v60   ;;  %v2976_v9 = vpack.c.bf16 %v1660_v3, %v1659_v51  ;;  %vm1345_vm0 = vcmp.ge.f32.partialorder %v961_v63, 0.0  ;;  %v1473_v10 = vmul.f32 0.2, %v961_v63 }
 0x157   : > { %3093 = vst [vmem:[%s3573_s13 + $0x198] sm:$0xff] %v2981_v61   ;;  %v1209_v11 = vadd.f32 %v3556_v8, %v1208_v27  ;;  %3060 = vst [vmem:[%s3573_s13 + $0x90] sm:$0xff] %v2816_v2   ;;  %vm1409_vm1 = vcmp.ge.f32.partialorder %v1217_v4, 0.0  ;;  %v1537_v12 = vmul.f32 0.2, %v1217_v4  ;;  %v964_v16 = vadd.f32 %v3678_v31, %v3556_v8 }
 0x158   : > { %vm1343_vm2 = vcmp.ge.f32.partialorder %v953_v5, 0.0  ;;  %v1471_v13 = vmul.f32 0.2, %v953_v5  ;;  %3092 = vst [vmem:[%s3573_s13 + $0x190] sm:$0xff] %v2976_v9   ;;  %v1601_v14 = vsel %vm1345_vm0, %v961_v63, %v1473_v10  ;;  %v1220_v20 = vadd.f32 %v3724_v19, %v3680_v32 }
 0x159   : > { %vm1407_vm3 = vcmp.ge.f32.partialorder %v1209_v11, 0.0  ;;  %v1535_v15 = vmul.f32 0.2, %v1209_v11  ;;  %v1665_v17 = vsel %vm1409_vm1, %v1217_v4, %v1537_v12  ;;  %v956_v21 = vadd.f32 %v3724_v19, %v3683_v36  ;;  %v3730_v22 = vpop.f32.mrb[48].mxu0  ;;  %v3732_v23 = vpop.f32.mrb[48].mxu1 }
 0x15a   : > { %v1599_v18 = vsel %vm1343_vm2, %v953_v5, %v1471_v13  ;;  %vm1346_vm4 = vcmp.ge.f32.partialorder %v964_v16, 0.0  ;;  %v1474_v8 = vmul.f32 0.2, %v964_v16  ;;  %v1212_v25 = vadd.f32 %v3724_v19, %v3693_v41  ;;  %v3736_v26 = vpop.f32.mrb[49].mxu0  ;;  %v3738_v27 = vpop.f32.mrb[49].mxu1 }
 0x15b   : > { %v1663_v24 = vsel %vm1407_vm3, %v1209_v11, %v1535_v15  ;;  %vm1410_vm5 = vcmp.ge.f32.partialorder %v1220_v20, 0.0  ;;  %v1538_v28 = vmul.f32 0.2, %v1220_v20  ;;  %vm1344_vm6 = vcmp.ge.f32.partialorder %v956_v21, 0.0  ;;  %v3741_v33 = vpop.f32.mrb[50].mxu0  ;;  %v3743_v34 = vpop.f32.mrb[50].mxu1 }
 0x15c   : > { %v1472_v29 = vmul.f32 0.2, %v956_v21  ;;  %v1602_v30 = vsel %vm1346_vm4, %v964_v16, %v1474_v8  ;;  %vm1408_vm7 = vcmp.ge.f32.partialorder %v1212_v25, 0.0  ;;  %v1536_v31 = vmul.f32 0.2, %v1212_v25  ;;  %v3746_v39 = vpop.f32.mrb[51].mxu0 }
 0x15d   : > { %v977_v32 = vadd.f32 %v3724_v19, %v3240_v53  ;;  %v2831_v35 = vpack.c.bf16 %v1602_v30, %v1601_v14  ;;  %v1666_v36 = vsel %vm1410_vm5, %v1220_v20, %v1538_v28  ;;  %v1233_v38 = vadd.f32 %v3724_v19, %v3304_v54  ;;  %v3748_v40 = vpop.f32.mrb[51].mxu1 }
 0x15e   : > { %v1600_v37 = vsel %vm1344_vm6, %v956_v21, %v1472_v29  ;;  %v2991_v41 = vpack.c.bf16 %v1666_v36, %v1665_v17  ;;  %v1664_v43 = vsel %vm1408_vm7, %v1212_v25, %v1536_v31  ;;  %v969_v47 = vadd.f32 %v3724_v19, %v3699_v58 }
 0x15f   : > { %v2826_v42 = vpack.c.bf16 %v1600_v37, %v1599_v18  ;;  %vm1349_vm8 = vcmp.ge.f32.partialorder %v977_v32, 0.0  ;;  %3063 = vst [vmem:[%s3573_s13 + $0xa8] sm:$0xff] %v2831_v35   ;;  %v2986_v44 = vpack.c.bf16 %v1664_v43, %v1663_v24  ;;  %v1477_v45 = vmul.f32 0.2, %v977_v32 }
 0x160   : > { %vm1413_vm9 = vcmp.ge.f32.partialorder %v1233_v38, 0.0  ;;  %v1541_v46 = vmul.f32 0.2, %v1233_v38  ;;  %3095 = vst [vmem:[%s3573_s13 + $0x1a8] sm:$0xff] %v2991_v41   ;;  %v1225_v48 = vadd.f32 %v3724_v19, %v3701_v59  ;;  %v980_v49 = vadd.f32 %v3724_v19, %v3704_v0 }
 0x161   : > { %3062 = vst [vmem:[%s3573_s13 + $0xa0] sm:$0xff] %v2826_v42   ;;  %v1236_v50 = vadd.f32 %v3724_v19, %v3706_v1  ;;  %3094 = vst [vmem:[%s3573_s13 + $0x1a0] sm:$0xff] %v2986_v44   ;;  %v1605_v51 = vsel %vm1349_vm8, %v977_v32, %v1477_v45  ;;  %v972_v53 = vadd.f32 %v3724_v19, %v3710_v6  ;;  %v3766_v55 = vpop.f32.mrb[52].mxu0  ;;  %v3768_v56 = vpop.f32.mrb[52].mxu1  ;;  %vm1347_vm10 = vcmp.ge.f32.partialorder %v969_v47, 0.0 }
 0x162   : > { %v1669_v52 = vsel %vm1413_vm9, %v1233_v38, %v1541_v46  ;;  %v1228_v54 = vadd.f32 %v3724_v19, %v3712_v7  ;;  %v1475_v57 = vmul.f32 0.2, %v969_v47  ;;  %vm1411_vm11 = vcmp.ge.f32.partialorder %v1225_v48, 0.0  ;;  %v3770_v0 = vpop.f32.mrb[53].mxu0  ;;  %v3772_v1 = vpop.f32.mrb[53].mxu1 }
 0x163   : > { %v1539_v58 = vmul.f32 0.2, %v1225_v48  ;;  %vm1350_vm12 = vcmp.ge.f32.partialorder %v980_v49, 0.0  ;;  %v1478_v59 = vmul.f32 0.2, %v980_v49  ;;  %vm1414_vm13 = vcmp.ge.f32.partialorder %v1236_v50, 0.0 }
 0x164   : > { %v1542_v60 = vmul.f32 0.2, %v1236_v50  ;;  %v1603_v61 = vsel %vm1347_vm10, %v969_v47, %v1475_v57  ;;  %vm1348_vm14 = vcmp.ge.f32.partialorder %v972_v53, 0.0  ;;  %v1476_v63 = vmul.f32 0.2, %v972_v53  ;;  %v3774_v5 = vpop.f32.mrb[54].mxu0 }
 0x165   : > { %v1667_v62 = vsel %vm1411_vm11, %v1225_v48, %v1539_v58  ;;  %v1606_v2 = vsel %vm1350_vm12, %v980_v49, %v1478_v59  ;;  %vm1412_vm15 = vcmp.ge.f32.partialorder %v1228_v54, 0.0  ;;  %v1540_v4 = vmul.f32 0.2, %v1228_v54  ;;  %v3776_v6 = vpop.f32.mrb[54].mxu1  ;;  %v3780_v12 = vpop.f32.mrb[55].mxu0 }
 0x166   : > { %v1670_v3 = vsel %vm1414_vm13, %v1236_v50, %v1542_v60  ;;  %v2841_v7 = vpack.c.bf16 %v1606_v2, %v1605_v51  ;;  %v1604_v10 = vsel %vm1348_vm14, %v972_v53, %v1476_v63  ;;  %v993_v11 = vadd.f32 %v3724_v19, %v3730_v22  ;;  %v3782_v13 = vpop.f32.mrb[55].mxu1 }
 0x167   : > { %v3001_v9 = vpack.c.bf16 %v1670_v3, %v1669_v52  ;;  %v2836_v14 = vpack.c.bf16 %v1604_v10, %v1603_v61  ;;  %v1668_v15 = vsel %vm1412_vm15, %v1228_v54, %v1540_v4  ;;  %v1249_v16 = vadd.f32 %v3724_v19, %v3732_v23 }
 0x168   : > { %v985_v17 = vadd.f32 %v3724_v19, %v3736_v26  ;;  %3065 = vst [vmem:[%s3573_s13 + $0xb8] sm:$0xff] %v2841_v7   ;;  %v2996_v18 = vpack.c.bf16 %v1668_v15, %v1667_v62  ;;  %vm1353_vm0 = vcmp.ge.f32.partialorder %v993_v11, 0.0  ;;  %v1481_v20 = vmul.f32 0.2, %v993_v11 }
 0x169   : > { %3097 = vst [vmem:[%s3573_s13 + $0x1b8] sm:$0xff] %v3001_v9   ;;  %v1241_v21 = vadd.f32 %v3724_v19, %v3738_v27  ;;  %3064 = vst [vmem:[%s3573_s13 + $0xb0] sm:$0xff] %v2836_v14   ;;  %vm1417_vm1 = vcmp.ge.f32.partialorder %v1249_v16, 0.0  ;;  %v1545_v22 = vmul.f32 0.2, %v1249_v16  ;;  %v996_v25 = vadd.f32 %v3724_v19, %v3741_v33  ;;  %v3796_v26 = vpop.f32.mrb[56].mxu0 }
 0x16a   : > { %vm1351_vm2 = vcmp.ge.f32.partialorder %v985_v17, 0.0  ;;  %v1479_v24 = vmul.f32 0.2, %v985_v17  ;;  %3096 = vst [vmem:[%s3573_s13 + $0x1b0] sm:$0xff] %v2996_v18   ;;  %v1609_v8 = vsel %vm1353_vm0, %v993_v11, %v1481_v20  ;;  %v3798_v28 = vpop.f32.mrb[56].mxu1  ;;  %v1252_v27 = vadd.f32 %v3724_v19, %v3743_v34  ;;  %v3804_v32 = vpop.f32.mrb[57].mxu0 }
 0x16b   : > { %vm1415_vm3 = vcmp.ge.f32.partialorder %v1241_v21, 0.0  ;;  %v1543_v23 = vmul.f32 0.2, %v1241_v21  ;;  %v1673_v29 = vsel %vm1417_vm1, %v1249_v16, %v1545_v22  ;;  %v988_v31 = vadd.f32 %v3724_v19, %v3746_v39  ;;  %v3806_v35 = vpop.f32.mrb[57].mxu1  ;;  %v3810_v38 = vpop.f32.mrb[58].mxu0 }
 0x16c   : > { %v1607_v30 = vsel %vm1351_vm2, %v985_v17, %v1479_v24  ;;  %vm1354_vm4 = vcmp.ge.f32.partialorder %v996_v25, 0.0  ;;  %v1482_v37 = vmul.f32 0.2, %v996_v25  ;;  %v1244_v33 = vadd.f32 %v3724_v19, %v3748_v40  ;;  %v3812_v41 = vpop.f32.mrb[58].mxu1  ;;  %v3816_v45 = vpop.f32.mrb[59].mxu0 }
 0x16d   : > { %v1671_v36 = vsel %vm1415_vm3, %v1241_v21, %v1543_v23  ;;  %vm1418_vm5 = vcmp.ge.f32.partialorder %v1252_v27, 0.0  ;;  %v1546_v42 = vmul.f32 0.2, %v1252_v27  ;;  %vm1352_vm6 = vcmp.ge.f32.partialorder %v988_v31, 0.0  ;;  %v3818_v46 = vpop.f32.mrb[59].mxu1 }
 0x16e   : > { %v1480_v34 = vmul.f32 0.2, %v988_v31  ;;  %v1610_v39 = vsel %vm1354_vm4, %v996_v25, %v1482_v37  ;;  %vm1416_vm7 = vcmp.ge.f32.partialorder %v1244_v33, 0.0  ;;  %v1544_v43 = vmul.f32 0.2, %v1244_v33 }
 0x16f   : > { %v1009_v44 = vadd.f32 %v3724_v19, %v3766_v55  ;;  %v2851_v40 = vpack.c.bf16 %v1610_v39, %v1609_v8  ;;  %v1674_v47 = vsel %vm1418_vm5, %v1252_v27, %v1546_v42  ;;  %v1265_v49 = vadd.f32 %v3724_v19, %v3768_v56 }
 0x170   : > { %v1608_v48 = vsel %vm1352_vm6, %v988_v31, %v1480_v34  ;;  %v3011_v50 = vpack.c.bf16 %v1674_v47, %v1673_v29  ;;  %v1672_v52 = vsel %vm1416_vm7, %v1244_v33, %v1544_v43  ;;  %v1001_v58 = vadd.f32 %v3724_v19, %v3770_v0 }
 0x171   : > { %v2846_v51 = vpack.c.bf16 %v1608_v48, %v1607_v30  ;;  %vm1357_vm8 = vcmp.ge.f32.partialorder %v1009_v44, 0.0  ;;  %3067 = vst [vmem:[%s3573_s13 + $0xc8] sm:$0xff] %v2851_v40   ;;  %v3006_v53 = vpack.c.bf16 %v1672_v52, %v1671_v36  ;;  %v1485_v54 = vmul.f32 0.2, %v1009_v44  ;;  %v3823_v57 = vpop.f32.mrb[60].mxu0  ;;  %v3835_v61 = vpop.f32.mrb[60].mxu1 }
 0x172   : > { %vm1421_vm9 = vcmp.ge.f32.partialorder %v1265_v49, 0.0  ;;  %v1549_v55 = vmul.f32 0.2, %v1265_v49  ;;  %3099 = vst [vmem:[%s3573_s13 + $0x1c8] sm:$0xff] %v3011_v50   ;;  %v1257_v56 = vadd.f32 %v3724_v19, %v3772_v1  ;;  %v1012_v59 = vadd.f32 %v3724_v19, %v3774_v5  ;;  %v3837_v62 = vpop.f32.mrb[61].mxu0  ;;  %v3845_v3 = vpop.f32.mrb[61].mxu1 }
 0x173   : > { %3066 = vst [vmem:[%s3573_s13 + $0xc0] sm:$0xff] %v2846_v51   ;;  %v1268_v60 = vadd.f32 %v3724_v19, %v3776_v6  ;;  %3098 = vst [vmem:[%s3573_s13 + $0x1c0] sm:$0xff] %v3006_v53   ;;  %v1613_v63 = vsel %vm1357_vm8, %v1009_v44, %v1485_v54  ;;  %v1004_v0 = vadd.f32 %v3724_v19, %v3780_v12  ;;  %v3847_v4 = vpop.f32.mrb[62].mxu0  ;;  %vm1355_vm10 = vcmp.ge.f32.partialorder %v1001_v58, 0.0  ;;  %v3849_v12 = vpop.f32.mrb[62].mxu1 }
 0x174   : > { %v1677_v2 = vsel %vm1421_vm9, %v1265_v49, %v1549_v55  ;;  %v1260_v1 = vadd.f32 %v3724_v19, %v3782_v13  ;;  %v1483_v5 = vmul.f32 0.2, %v1001_v58  ;;  %vm1419_vm11 = vcmp.ge.f32.partialorder %v1257_v56, 0.0  ;;  %v3851_v13 = vpop.f32.mrb[63].mxu0  ;;  %v1291_v18 = vpop.f32.mrb[63].mxu1 }
 0x175   : > { %v1547_v6 = vmul.f32 0.2, %v1257_v56  ;;  %vm1358_vm12 = vcmp.ge.f32.partialorder %v1012_v59, 0.0  ;;  %v1486_v7 = vmul.f32 0.2, %v1012_v59  ;;  %vm1422_vm13 = vcmp.ge.f32.partialorder %v1268_v60, 0.0 }
 0x176   : > { %v1550_v9 = vmul.f32 0.2, %v1268_v60  ;;  %v1611_v10 = vsel %vm1355_vm10, %v1001_v58, %v1483_v5  ;;  %vm1356_vm14 = vcmp.ge.f32.partialorder %v1004_v0, 0.0  ;;  %v1484_v14 = vmul.f32 0.2, %v1004_v0 }
 0x177   : > { %v1675_v11 = vsel %vm1419_vm11, %v1257_v56, %v1547_v6  ;;  %v1614_v15 = vsel %vm1358_vm12, %v1012_v59, %v1486_v7  ;;  %vm1420_vm15 = vcmp.ge.f32.partialorder %v1260_v1, 0.0  ;;  %v1548_v17 = vmul.f32 0.2, %v1260_v1 }
 0x178   : > { %v1678_v16 = vsel %vm1422_vm13, %v1268_v60, %v1550_v9  ;;  %v2861_v20 = vpack.c.bf16 %v1614_v15, %v1613_v63  ;;  %v1612_v22 = vsel %vm1356_vm14, %v1004_v0, %v1484_v14  ;;  %v1025_v24 = vadd.f32 %v3724_v19, %v3796_v26 }
 0x179   : > { %v3021_v21 = vpack.c.bf16 %v1678_v16, %v1677_v2  ;;  %v2856_v8 = vpack.c.bf16 %v1612_v22, %v1611_v10  ;;  %v1676_v23 = vsel %vm1420_vm15, %v1260_v1, %v1548_v17  ;;  %v1281_v25 = vadd.f32 %v3724_v19, %v3798_v28 }
 0x17a   : > { %v1017_v29 = vadd.f32 %v3724_v19, %v3804_v32  ;;  %3069 = vst [vmem:[%s3573_s13 + $0xd8] sm:$0xff] %v2861_v20   ;;  %v3016_v30 = vpack.c.bf16 %v1676_v23, %v1675_v11  ;;  %vm1361_vm0 = vcmp.ge.f32.partialorder %v1025_v24, 0.0  ;;  %v1489_v27 = vmul.f32 0.2, %v1025_v24 }
 0x17b   : > { %3101 = vst [vmem:[%s3573_s13 + $0x1d8] sm:$0xff] %v3021_v21   ;;  %v1273_v31 = vadd.f32 %v3724_v19, %v3806_v35  ;;  %3068 = vst [vmem:[%s3573_s13 + $0xd0] sm:$0xff] %v2856_v8   ;;  %vm1425_vm1 = vcmp.ge.f32.partialorder %v1281_v25, 0.0  ;;  %v1553_v26 = vmul.f32 0.2, %v1281_v25  ;;  %v1028_v28 = vadd.f32 %v3724_v19, %v3810_v38 }
 0x17c   : > { %vm1359_vm2 = vcmp.ge.f32.partialorder %v1017_v29, 0.0  ;;  %v1487_v36 = vmul.f32 0.2, %v1017_v29  ;;  %3100 = vst [vmem:[%s3573_s13 + $0x1d0] sm:$0xff] %v3016_v30   ;;  %v1617_v37 = vsel %vm1361_vm0, %v1025_v24, %v1489_v27  ;;  %v1284_v42 = vadd.f32 %v3724_v19, %v3812_v41 }
 0x17d   : > { %vm1423_vm3 = vcmp.ge.f32.partialorder %v1273_v31, 0.0  ;;  %v1681_v32 = vsel %vm1425_vm1, %v1281_v25, %v1553_v26  ;;  %v1551_v33 = vmul.f32 0.2, %v1273_v31  ;;  %v1020_v34 = vadd.f32 %v3724_v19, %v3816_v45 }
 0x17e   : > { %v1615_v35 = vsel %vm1359_vm2, %v1017_v29, %v1487_v36  ;;  %vm1362_vm4 = vcmp.ge.f32.partialorder %v1028_v28, 0.0  ;;  %v1490_v39 = vmul.f32 0.2, %v1028_v28  ;;  %v1276_v43 = vadd.f32 %v3724_v19, %v3818_v46 }
 0x17f   : > { %vm1426_vm5 = vcmp.ge.f32.partialorder %v1284_v42, 0.0  ;;  %v1554_v44 = vmul.f32 0.2, %v1284_v42  ;;  %vm1360_vm6 = vcmp.ge.f32.partialorder %v1020_v34, 0.0  ;;  %v1488_v40 = vmul.f32 0.2, %v1020_v34 }
 0x180   : > { %v1618_v38 = vsel %vm1362_vm4, %v1028_v28, %v1490_v39  ;;  %vm1424_vm7 = vcmp.ge.f32.partialorder %v1276_v43, 0.0  ;;  %v1552_v47 = vmul.f32 0.2, %v1276_v43  ;;  %v1041_v41 = vadd.f32 %v3724_v19, %v3823_v57 }
 0x181   : > { %v2871_v45 = vpack.c.bf16 %v1618_v38, %v1617_v37  ;;  %v1682_v48 = vsel %vm1426_vm5, %v1284_v42, %v1554_v44  ;;  %v1616_v49 = vsel %vm1360_vm6, %v1020_v34, %v1488_v40  ;;  %v1297_v50 = vadd.f32 %v3724_v19, %v3835_v61 }
 0x182   : > { %v1679_v46 = vsel %vm1423_vm3, %v1273_v31, %v1551_v33  ;;  %v3031_v51 = vpack.c.bf16 %v1682_v48, %v1681_v32  ;;  %v2866_v52 = vpack.c.bf16 %v1616_v49, %v1615_v35  ;;  %v1680_v53 = vsel %vm1424_vm7, %v1276_v43, %v1552_v47 }
 0x183   : > { %3071 = vst [vmem:[%s3573_s13 + $0xe8] sm:$0xff] %v2871_v45   ;;  %v3026_v54 = vpack.c.bf16 %v1680_v53, %v1679_v46  ;;  %vm1365_vm8 = vcmp.ge.f32.partialorder %v1041_v41, 0.0  ;;  %v1493_v55 = vmul.f32 0.2, %v1041_v41  ;;  %v1557_v58 = vmul.f32 0.2, %v1297_v50 }
 0x184   : > { %3103 = vst [vmem:[%s3573_s13 + $0x1e8] sm:$0xff] %v3031_v51   ;;  %3070 = vst [vmem:[%s3573_s13 + $0xe0] sm:$0xff] %v2866_v52   ;;  %v1033_v57 = vadd.f32 %v3724_v19, %v3837_v62  ;;  %v1289_v56 = vadd.f32 %v3724_v19, %v3845_v3  ;;  %v1044_v59 = vadd.f32 %v3724_v19, %v3847_v4  ;;  %vm1429_vm9 = vcmp.ge.f32.partialorder %v1297_v50, 0.0 }
 0x185   : > { %v1300_v60 = vadd.f32 %v3724_v19, %v3849_v12  ;;  %3102 = vst [vmem:[%s3573_s13 + $0x1e0] sm:$0xff] %v3026_v54   ;;  %v1036_v61 = vadd.f32 %v3724_v19, %v3851_v13  ;;  %v1292_v63 = vadd.f32 %v3724_v19, %v1291_v18  ;;  %v1621_v2 = vsel %vm1365_vm8, %v1041_v41, %v1493_v55 }
 0x186   : > { %vm1363_vm10 = vcmp.ge.f32.partialorder %v1033_v57, 0.0  ;;  %v1491_v0 = vmul.f32 0.2, %v1033_v57  ;;  %v1555_v62 = vmul.f32 0.2, %v1289_v56  ;;  %vm1366_vm11 = vcmp.ge.f32.partialorder %v1044_v59, 0.0 }
 0x187   : > { %v1494_v1 = vmul.f32 0.2, %v1044_v59  ;;  %vm1430_vm12 = vcmp.ge.f32.partialorder %v1300_v60, 0.0  ;;  %v1558_v3 = vmul.f32 0.2, %v1300_v60  ;;  %v1685_v4 = vsel %vm1429_vm9, %v1297_v50, %v1557_v58 }
 0x188   : > { %vm1427_vm13 = vcmp.ge.f32.partialorder %v1289_v56, 0.0  ;;  %vm1364_vm14 = vcmp.ge.f32.partialorder %v1036_v61, 0.0  ;;  %v1492_v5 = vmul.f32 0.2, %v1036_v61  ;;  %vm1428_vm15 = vcmp.ge.f32.partialorder %v1292_v63, 0.0 }
 0x189   : > { %v1622_v6 = vsel %vm1366_vm11, %v1044_v59, %v1494_v1  ;;  %v1686_v7 = vsel %vm1430_vm12, %v1300_v60, %v1558_v3  ;;  %v1556_v19 = vmul.f32 0.2, %v1292_v63  ;;  %v1619_v9 = vsel %vm1363_vm10, %v1033_v57, %v1491_v0 }
 0x18a   : > { %v2881_v10 = vpack.c.bf16 %v1622_v6, %v1621_v2  ;;  %v3041_v11 = vpack.c.bf16 %v1686_v7, %v1685_v4  ;;  %v1620_v14 = vsel %vm1364_vm14, %v1036_v61, %v1492_v5  ;;  %v1683_v12 = vsel %vm1427_vm13, %v1289_v56, %v1555_v62 }
 0x18b   : > { %v2876_v13 = vpack.c.bf16 %v1620_v14, %v1619_v9  ;;  %v1684_v15 = vsel %vm1428_vm15, %v1292_v63, %v1556_v19 }
 0x18c   : > { %3073 = vst [vmem:[%s3573_s13 + $0xf8] sm:$0xff] %v2881_v10   ;;  %3105 = vst [vmem:[%s3573_s13 + $0x1f8] sm:$0xff] %v3041_v11   ;;  %v3036_v16 = vpack.c.bf16 %v1684_v15, %v1683_v12 }
 0x18d   : > { %3072 = vst [vmem:[%s3573_s13 + $0xf0] sm:$0xff] %v2876_v13  }
 0x18e   : > { %3104 = vst [vmem:[%s3573_s13 + $0x1f0] sm:$0xff] %v3036_v16  }
 0x18f PF: > { %s13_s12 = sadd.s32 1, %s3425_s12  }
 0x190   : > { %p10_p4 = scmp.ge.s32.totalorder %s13_s12, 4  }
 0x192   :  { %12 = sbr.rel (!%p10_p4) target bundleno = 1 (0x1), region = 62 }

// kernel: discriminator_forward.15
= control target key start
LH: loop header
LB: loop body
LE: loop exit
PB: predicated region body
PF: predicated region fallthrough
CT: control target
= control target key end

     0   :  { %s1333_s18 = smov 0   ;;  %s1549_s0 = inlined_call_operand.vmem [shape: bf16[512,128], index: 0, kind: input, shape index: {}]   ;;  %s1550_s1 = inlined_call_operand.vmem [shape: bf16[128,128], index: 1, kind: input, shape index: {}]   ;;  %s1551_s2 = inlined_call_operand.vmem [shape: f32[1,128], index: 2, kind: input, shape index: {}]   ;;  %s1552_s3 = inlined_call_operand.vmem [shape: bf16[512,128], index: 3, kind: output, shape index: {0}]   ;;  %s1553_s4 = inlined_call_operand.vmem [shape: f32[2,1,128], index: 4, kind: output, shape index: {1}]   ;;  %s1554_s5 = inlined_call_operand.vmem [shape: f32[2,1,128], index: 5, kind: output, shape index: {2}]  }
   0x1 LB: > { %s1339_s19 = sadd.s32 4294967295, %s1301_s18   ;;  %p984_p0 = scmp.ge.s32.totalorder %s1301_s18, 1  ;;  %s1301_s18 = sphi %s1333_s18, %s16_s18  }
   0x2   : > { %p193_p1 = scmp.lt.s32.totalorder %s1301_s18, 3 }
   0x4   : > { %p194_p2 = pnand %p984_p0, %p193_p1 }
   0x5   : > { %v1271_v0 = vld [vmem:[%s1550_s1] sm:$0xff] (!%p194_p2)   ;;  %s985_s22 = sshll.u32 (!%p194_p2), %s1339_s19, 5  ;;  %v1272_v1 = vld [vmem:[%s1550_s1 + $0x8] sm:$0xff] (!%p194_p2)   ;;  %v1273_v2 = vld [vmem:[%s1550_s1 + $0x10] sm:$0xff] (!%p194_p2)   ;;  %p239_p4 = scmp.lt.s32.totalorder (!%p194_p2), %s1339_s19, 1 }
   0x6   : > { %197 = sbr.rel (%p194_p2) target bundleno = 332 (0x14c), region = 32  ;;  %p228_p3 = scmp.lt.s32.totalorder (!%p194_p2), %s985_s22, 63  ;;  %1199 = vmatprep.subr.bf16.mxu0 (!%p194_p2), %v1271_v0  ;;  %1247 = vmatprep.subr.bf16.mxu1 (!%p194_p2), %v1271_v0  ;;  %v1274_v3 = vld [vmem:[%s1550_s1 + $0x18] sm:$0xff] (!%p194_p2)   ;;  %v1275_v5 = vld [vmem:[%s1550_s1 + $0x20] sm:$0xff] (!%p194_p2)   ;;  %v1276_v6 = vld [vmem:[%s1550_s1 + $0x28] sm:$0xff] (!%p194_p2)  }
   0x7   : > { %1200 = vmatpush3.bf16.msra.mxu0 (!%p194_p2), %v1271_v0  ;;  %1255 = vmatpush3.bf16.msra.mxu1 (!%p194_p2), %v1271_v0  ;;  %v1277_v8 = vld [vmem:[%s1550_s1 + $0x30] sm:$0xff] (!%p194_p2)   ;;  %v1278_v9 = vld [vmem:[%s1550_s1 + $0x38] sm:$0xff] (!%p194_p2)   ;;  %v1397_v24 = vld [vmem:[%s1551_s2] ss:$0 sm:$0xff] (!%p194_p2) }
   0x8   : > { %1201 = vmatprep.subr.bf16.mxu0 (!%p194_p2), %v1272_v1  ;;  %1248 = vmatprep.subr.bf16.mxu1 (!%p194_p2), %v1272_v1 }
   0xb   : > { %1202 = vmatpush3.bf16.msra.mxu0 (!%p194_p2), %v1272_v1  ;;  %1256 = vmatpush3.bf16.msra.mxu1 (!%p194_p2), %v1272_v1 }
   0xc   : > { %1203 = vmatprep.subr.bf16.mxu0 (!%p194_p2), %v1273_v2  ;;  %1249 = vmatprep.subr.bf16.mxu1 (!%p194_p2), %v1273_v2 }
   0xd   : > { %s1556_s22 = smov (!%p228_p3, %s985_s22), 63  ;;  %s1558_s19 = smov (!%p239_p4, %s1339_s19), 1 }
   0xe   : > { %s986_s27 = sshll.u32 %s1556_s22, 2  ;;  %s241_s25 = scalar_lea.vmem %s1553_s4, %s1558_s19 }
   0xf   : > { %s1361_s30 = scalar_lea.vmem %s1549_s0, %s986_s27  ;;  %1204 = vmatpush3.bf16.msra.mxu0 %v1273_v2  ;;  %1257 = vmatpush3.bf16.msra.mxu1 %v1273_v2  ;;  %s1416_s23 = scalar_lea.vmem %s1552_s3, %s986_s27 }
  0x10   : > { %v1279_v4 = vld [vmem:[%s1361_s30] sm:$0xff]   ;;  %1205 = vmatprep.subr.bf16.mxu0 %v1274_v3  ;;  %1250 = vmatprep.subr.bf16.mxu1 %v1274_v3  ;;  %v1280_v10 = vld [vmem:[%s1361_s30 + $0x8] sm:$0xff]   ;;  %v1281_v12 = vld [vmem:[%s1361_s30 + $0x10] sm:$0xff]   ;;  %s244_s28 = scalar_lea.vmem %s1554_s5, %s1558_s19 }
  0x11   : > { %1215 = vmatprep.mubr.bf16.mxu0 %v1279_v4  ;;  %v1287_v7 = vld [vmem:[%s1361_s30 + $0x40] sm:$0xff]   ;;  %v1288_v11 = vld [vmem:[%s1361_s30 + $0x48] sm:$0xff]   ;;  %v1289_v13 = vld [vmem:[%s1361_s30 + $0x50] sm:$0xff]  }
  0x12   : > { %1231 = vmatprep.mubr.bf16.mxu1 %v1287_v7  ;;  %v1282_v14 = vld [vmem:[%s1361_s30 + $0x18] sm:$0xff]   ;;  %v1283_v16 = vld [vmem:[%s1361_s30 + $0x20] sm:$0xff]   ;;  %v1284_v18 = vld [vmem:[%s1361_s30 + $0x28] sm:$0xff]  }
  0x13   : > { %1206 = vmatpush3.bf16.msra.mxu0 %v1274_v3  ;;  %1258 = vmatpush3.bf16.msra.mxu1 %v1274_v3  ;;  %v1290_v15 = vld [vmem:[%s1361_s30 + $0x58] sm:$0xff]   ;;  %v1291_v17 = vld [vmem:[%s1361_s30 + $0x60] sm:$0xff]   ;;  %v1292_v19 = vld [vmem:[%s1361_s30 + $0x68] sm:$0xff]  }
  0x14   : > { %1207 = vmatprep.subr.bf16.mxu0 %v1275_v5  ;;  %1251 = vmatprep.subr.bf16.mxu1 %v1275_v5  ;;  %v1285_v20 = vld [vmem:[%s1361_s30 + $0x30] sm:$0xff]   ;;  %v1286_v22 = vld [vmem:[%s1361_s30 + $0x38] sm:$0xff]  }
  0x15   : > { %v1293_v21 = vld [vmem:[%s1361_s30 + $0x70] sm:$0xff]   ;;  %v1294_v23 = vld [vmem:[%s1361_s30 + $0x78] sm:$0xff]  }
  0x17   : > { %1208 = vmatpush3.bf16.msra.mxu0 %v1275_v5  ;;  %1259 = vmatpush3.bf16.msra.mxu1 %v1275_v5 }
  0x18   : > { %1209 = vmatprep.subr.bf16.mxu0 %v1276_v6  ;;  %1252 = vmatprep.subr.bf16.mxu1 %v1276_v6 }
  0x1b   : > { %1210 = vmatpush3.bf16.msra.mxu0 %v1276_v6  ;;  %1260 = vmatpush3.bf16.msra.mxu1 %v1276_v6 }
  0x1c   : > { %1211 = vmatprep.subr.bf16.mxu0 %v1277_v8  ;;  %1253 = vmatprep.subr.bf16.mxu1 %v1277_v8 }
  0x1f   : > { %1212 = vmatpush3.bf16.msra.mxu0 %v1277_v8  ;;  %1261 = vmatpush3.bf16.msra.mxu1 %v1277_v8 }
  0x20   : > { %1213 = vmatprep.subr.bf16.mxu0 %v1278_v9  ;;  %1254 = vmatprep.subr.bf16.mxu1 %v1278_v9 }
  0x23   : > { %1214 = vmatpush3.bf16.msra.mxu0 %v1278_v9  ;;  %1262 = vmatpush3.bf16.msra.mxu1 %v1278_v9 }
  0x26   : > { %1216 = vmatmul.mubr.bf16.vlgmr.msra.gmra.mrb[0].mxu0 %v1280_v10  ;;  %1232 = vmatmul.mubr.bf16.vlgmr.msra.gmra.mrb[0].mxu1 %v1288_v11 }
  0x27   : > { %1219 = vmatprep.mubr.bf16.mxu0 %v1281_v12  ;;  %1235 = vmatprep.mubr.bf16.mxu1 %v1289_v13 }
  0x2e   : > { %1220 = vmatmul.mubr.bf16.gmra.mrb[4].mxu0 %v1282_v14  ;;  %1236 = vmatmul.mubr.bf16.gmra.mrb[4].mxu1 %v1290_v15 }
  0x2f   : > { %1223 = vmatprep.mubr.bf16.mxu0 %v1283_v16  ;;  %1239 = vmatprep.mubr.bf16.mxu1 %v1291_v17 }
  0x36   : > { %1224 = vmatmul.mubr.bf16.gmra.mrb[8].mxu0 %v1284_v18  ;;  %1240 = vmatmul.mubr.bf16.gmra.mrb[8].mxu1 %v1292_v19 }
  0x37   : > { %1227 = vmatprep.mubr.bf16.mxu0 %v1285_v20  ;;  %1243 = vmatprep.mubr.bf16.mxu1 %v1293_v21 }
  0x3e   : > { %1228 = vmatmul.mubr.bf16.gmra.mrb[12].mxu0 %v1286_v22  ;;  %1244 = vmatmul.mubr.bf16.gmra.mrb[12].mxu1 %v1294_v23 }
  0xf9   : > { %v1217_v25 = vpop.f32.mrb[0].mxu0  ;;  %v1233_v26 = vpop.f32.mrb[0].mxu1 }
  0xfa   : > { %v479_v27 = vpop.f32.mrb[1].mxu0  ;;  %v1400_v28 = vadd.f32 %v1233_v26, %v1397_v24  ;;  %v543_v29 = vpop.f32.mrb[1].mxu1  ;;  %v488_v34 = vadd.f32 %v1217_v25, %v1397_v24 }
  0xfb   : > { %v480_v30 = vadd.f32 %v1397_v24, %v479_v27  ;;  %v1218_v31 = vpop.f32.mrb[2].mxu0  ;;  %v1404_v32 = vadd.f32 %v1397_v24, %v543_v29  ;;  %v1234_v33 = vpop.f32.mrb[2].mxu1 }
  0xfc   : > { %v491_v35 = vadd.f32 %v1218_v31, %v1397_v24  ;;  %v482_v36 = vpop.f32.mrb[3].mxu0  ;;  %v1409_v37 = vadd.f32 %v1234_v33, %v1397_v24  ;;  %v546_v38 = vpop.f32.mrb[3].mxu1  ;;  %v806_v48 = vmul.f32 %v488_v34, %v488_v34 }
  0xfd   : > { %v483_v39 = vadd.f32 %v1397_v24, %v482_v36  ;;  %v1420_v40 = vadd.f32 %v1397_v24, %v546_v38  ;;  %v804_v41 = vmul.f32 %v480_v30, %v480_v30 }
  0xfe   : > { %v1088_v42 = vpack.c.bf16 %v491_v35, %v488_v34  ;;  %v1128_v43 = vpack.c.bf16 %v1409_v37, %v1400_v28  ;;  %v807_v56 = vmul.f32 %v491_v35, %v491_v35 }
  0xff   : > { %v1083_v44 = vpack.c.bf16 %v483_v39, %v480_v30  ;;  %v766_v45 = vadd.f32 %v483_v39, %v480_v30  ;;  %v805_v46 = vmul.f32 %v483_v39, %v483_v39  ;;  %v1123_v47 = vpack.c.bf16 %v1420_v40, %v1404_v32 }
 0x100   : > { %1160 = vst [vmem:[%s1416_s23 + $0x8] sm:$0xff] %v1088_v42   ;;  %1168 = vst [vmem:[%s1416_s23 + $0x48] sm:$0xff] %v1128_v43  }
 0x101   : > { %1084 = vst [vmem:[%s1416_s23] sm:$0xff] %v1083_v44   ;;  %v767_v49 = vadd.f32 %v766_v45, %v488_v34  ;;  %v836_v50 = vadd.f32 %v805_v46, %v804_v41  ;;  %v1221_v51 = vpop.f32.mrb[4].mxu0  ;;  %1167 = vst [vmem:[%s1416_s23 + $0x40] sm:$0xff] %v1123_v47   ;;  %v1237_v52 = vpop.f32.mrb[4].mxu1 }
 0x102   : > { %v495_v53 = vpop.f32.mrb[5].mxu0  ;;  %v1431_v54 = vadd.f32 %v1237_v52, %v1397_v24  ;;  %v559_v55 = vpop.f32.mrb[5].mxu1  ;;  %v504_v62 = vadd.f32 %v1221_v51, %v1397_v24 }
 0x103   : > { %v837_v57 = vadd.f32 %v836_v50, %v806_v48  ;;  %v496_v58 = vadd.f32 %v1397_v24, %v495_v53  ;;  %v768_v59 = vadd.f32 %v767_v49, %v491_v35  ;;  %v1222_v60 = vpop.f32.mrb[6].mxu0  ;;  %v1238_v61 = vpop.f32.mrb[6].mxu1  ;;  %v1441_v8 = vadd.f32 %v1397_v24, %v559_v55 }
 0x104   : > { %v507_v63 = vadd.f32 %v1222_v60, %v1397_v24  ;;  %v498_v0 = vpop.f32.mrb[7].mxu0  ;;  %v1437_v1 = vadd.f32 %v1238_v61, %v1397_v24  ;;  %v562_v2 = vpop.f32.mrb[7].mxu1  ;;  %v810_v15 = vmul.f32 %v504_v62, %v504_v62 }
 0x105   : > { %v769_v3 = vadd.f32 %v768_v59, %v496_v58  ;;  %v808_v4 = vmul.f32 %v496_v58, %v496_v58  ;;  %v838_v5 = vadd.f32 %v837_v57, %v807_v56  ;;  %v499_v6 = vadd.f32 %v1397_v24, %v498_v0 }
 0x106   : > { %v1098_v7 = vpack.c.bf16 %v507_v63, %v504_v62  ;;  %v1138_v9 = vpack.c.bf16 %v1437_v1, %v1431_v54  ;;  %v1448_v14 = vadd.f32 %v1397_v24, %v562_v2  ;;  %v811_v25 = vmul.f32 %v507_v63, %v507_v63 }
 0x107   : > { %v839_v10 = vadd.f32 %v838_v5, %v808_v4  ;;  %v1093_v11 = vpack.c.bf16 %v499_v6, %v496_v58  ;;  %v770_v12 = vadd.f32 %v769_v3, %v499_v6  ;;  %v809_v13 = vmul.f32 %v499_v6, %v499_v6 }
 0x108   : > { %1162 = vst [vmem:[%s1416_s23 + $0x18] sm:$0xff] %v1098_v7   ;;  %1170 = vst [vmem:[%s1416_s23 + $0x58] sm:$0xff] %v1138_v9   ;;  %v1133_v21 = vpack.c.bf16 %v1448_v14, %v1441_v8 }
 0x109   : > { %1161 = vst [vmem:[%s1416_s23 + $0x10] sm:$0xff] %v1093_v11   ;;  %v771_v16 = vadd.f32 %v770_v12, %v504_v62  ;;  %v840_v17 = vadd.f32 %v839_v10, %v809_v13  ;;  %v1225_v18 = vpop.f32.mrb[8].mxu0  ;;  %v1241_v19 = vpop.f32.mrb[8].mxu1 }
 0x10a   : > { %v511_v20 = vpop.f32.mrb[9].mxu0  ;;  %v1454_v22 = vadd.f32 %v1241_v19, %v1397_v24  ;;  %v575_v23 = vpop.f32.mrb[9].mxu1  ;;  %v520_v33 = vadd.f32 %v1225_v18, %v1397_v24  ;;  %1169 = vst [vmem:[%s1416_s23 + $0x50] sm:$0xff] %v1133_v21  }
 0x10b   : > { %v841_v26 = vadd.f32 %v840_v17, %v810_v15  ;;  %v512_v27 = vadd.f32 %v1397_v24, %v511_v20  ;;  %v772_v29 = vadd.f32 %v771_v16, %v507_v63  ;;  %v1226_v30 = vpop.f32.mrb[10].mxu0  ;;  %v1242_v31 = vpop.f32.mrb[10].mxu1  ;;  %v1465_v45 = vadd.f32 %v1397_v24, %v575_v23 }
 0x10c   : > { %v523_v34 = vadd.f32 %v1226_v30, %v1397_v24  ;;  %v514_v35 = vpop.f32.mrb[11].mxu0  ;;  %v1461_v36 = vadd.f32 %v1242_v31, %v1397_v24  ;;  %v578_v38 = vpop.f32.mrb[11].mxu1  ;;  %v814_v52 = vmul.f32 %v520_v33, %v520_v33 }
 0x10d   : > { %v773_v39 = vadd.f32 %v772_v29, %v512_v27  ;;  %v812_v41 = vmul.f32 %v512_v27, %v512_v27  ;;  %v842_v42 = vadd.f32 %v841_v26, %v811_v25  ;;  %v515_v43 = vadd.f32 %v1397_v24, %v514_v35 }
 0x10e   : > { %v1108_v44 = vpack.c.bf16 %v523_v34, %v520_v33  ;;  %v1148_v46 = vpack.c.bf16 %v1461_v36, %v1454_v22  ;;  %v1472_v51 = vadd.f32 %v1397_v24, %v578_v38  ;;  %v815_v62 = vmul.f32 %v523_v34, %v523_v34 }
 0x10f   : > { %v843_v47 = vadd.f32 %v842_v42, %v812_v41  ;;  %v1103_v48 = vpack.c.bf16 %v515_v43, %v512_v27  ;;  %v774_v49 = vadd.f32 %v773_v39, %v515_v43  ;;  %v813_v50 = vmul.f32 %v515_v43, %v515_v43 }
 0x110   : > { %1164 = vst [vmem:[%s1416_s23 + $0x28] sm:$0xff] %v1108_v44   ;;  %1172 = vst [vmem:[%s1416_s23 + $0x68] sm:$0xff] %v1148_v46   ;;  %v1143_v59 = vpack.c.bf16 %v1472_v51, %v1465_v45  ;;  %v820_v35 = vmul.f32 %v1404_v32, %v1404_v32  ;;  %v822_v43 = vmul.f32 %v1400_v28, %v1400_v28 }
 0x111   : > { %1163 = vst [vmem:[%s1416_s23 + $0x20] sm:$0xff] %v1103_v48   ;;  %v775_v53 = vadd.f32 %v774_v49, %v520_v33  ;;  %v844_v55 = vadd.f32 %v843_v47, %v813_v50  ;;  %v1229_v56 = vpop.f32.mrb[12].mxu0  ;;  %v1245_v57 = vpop.f32.mrb[12].mxu1  ;;  %v823_v47 = vmul.f32 %v1409_v37, %v1409_v37 }
 0x112   : > { %v527_v58 = vpop.f32.mrb[13].mxu0  ;;  %v1478_v60 = vadd.f32 %v1245_v57, %v1397_v24  ;;  %v591_v61 = vpop.f32.mrb[13].mxu1  ;;  %v536_v5 = vadd.f32 %v1229_v56, %v1397_v24  ;;  %1171 = vst [vmem:[%s1416_s23 + $0x60] sm:$0xff] %v1143_v59  }
 0x113   : > { %v845_v63 = vadd.f32 %v844_v55, %v814_v52  ;;  %v528_v0 = vadd.f32 %v1397_v24, %v527_v58  ;;  %v776_v2 = vadd.f32 %v775_v53, %v523_v34  ;;  %v1230_v3 = vpop.f32.mrb[14].mxu0  ;;  %v1246_v4 = vpop.f32.mrb[14].mxu1  ;;  %v592_v17 = vadd.f32 %v1397_v24, %v591_v61 }
 0x114   : > { %v539_v6 = vadd.f32 %v1230_v3, %v1397_v24  ;;  %v530_v7 = vpop.f32.mrb[15].mxu0  ;;  %v1485_v9 = vadd.f32 %v1246_v4, %v1397_v24  ;;  %v594_v10 = vpop.f32.mrb[15].mxu1  ;;  %v818_v26 = vmul.f32 %v536_v5, %v536_v5  ;;  %v825_v55 = vmul.f32 %v1448_v14, %v1448_v14 }
 0x115   : > { %v777_v11 = vadd.f32 %v776_v2, %v528_v0  ;;  %v816_v12 = vmul.f32 %v528_v0, %v528_v0  ;;  %v846_v13 = vadd.f32 %v845_v63, %v815_v62  ;;  %v531_v15 = vadd.f32 %v1397_v24, %v530_v7 }
 0x116   : > { %v1118_v16 = vpack.c.bf16 %v539_v6, %v536_v5  ;;  %v1158_v18 = vpack.c.bf16 %v1485_v9, %v1478_v60  ;;  %v595_v25 = vadd.f32 %v1397_v24, %v594_v10  ;;  %v819_v31 = vmul.f32 %v539_v6, %v539_v6 }
 0x117   : > { %v847_v19 = vadd.f32 %v846_v13, %v816_v12  ;;  %v1113_v20 = vpack.c.bf16 %v531_v15, %v528_v0  ;;  %v778_v21 = vadd.f32 %v777_v11, %v531_v15  ;;  %v817_v23 = vmul.f32 %v531_v15, %v531_v15 }
 0x118   : > { %1166 = vst [vmem:[%s1416_s23 + $0x38] sm:$0xff] %v1118_v16   ;;  %1174 = vst [vmem:[%s1416_s23 + $0x78] sm:$0xff] %v1158_v18   ;;  %v1153_v30 = vpack.c.bf16 %v595_v25, %v592_v17  ;;  %v821_v24 = vmul.f32 %v1420_v40, %v1420_v40  ;;  %v829_v0 = vmul.f32 %v1472_v51, %v1472_v51 }
 0x119   : > { %1165 = vst [vmem:[%s1416_s23 + $0x30] sm:$0xff] %v1113_v20   ;;  %v779_v27 = vadd.f32 %v778_v21, %v536_v5  ;;  %v848_v29 = vadd.f32 %v847_v19, %v817_v23  ;;  %v832_v5 = vmul.f32 %v592_v17, %v592_v17  ;;  %v834_v12 = vmul.f32 %v1478_v60, %v1478_v60 }
 0x11a   : > { %1173 = vst [vmem:[%s1416_s23 + $0x70] sm:$0xff] %v1153_v30   ;;  %v835_v15 = vmul.f32 %v1485_v9, %v1485_v9 }
 0x11b   : > { %v849_v33 = vadd.f32 %v848_v29, %v818_v26  ;;  %v780_v34 = vadd.f32 %v779_v27, %v539_v6 }
 0x11d   : > { %v781_v38 = vadd.f32 %v780_v34, %v1404_v32  ;;  %v850_v39 = vadd.f32 %v849_v33, %v819_v31  ;;  %v824_v32 = vmul.f32 %v1441_v8, %v1441_v8 }
 0x11f   : > { %v851_v41 = vadd.f32 %v850_v39, %v820_v35  ;;  %v782_v42 = vadd.f32 %v781_v38, %v1420_v40 }
 0x121   : > { %v783_v44 = vadd.f32 %v782_v42, %v1400_v28  ;;  %v852_v46 = vadd.f32 %v851_v41, %v821_v24  ;;  %v826_v28 = vmul.f32 %v1431_v54, %v1431_v54 }
 0x123   : > { %v853_v48 = vadd.f32 %v852_v46, %v822_v43  ;;  %v784_v49 = vadd.f32 %v783_v44, %v1409_v37  ;;  %v827_v37 = vmul.f32 %v1437_v1, %v1437_v1 }
 0x125   : > { %v785_v50 = vadd.f32 %v784_v49, %v1441_v8  ;;  %v854_v52 = vadd.f32 %v853_v48, %v823_v47  ;;  %v828_v8 = vmul.f32 %v1465_v45, %v1465_v45 }
 0x127   : > { %v855_v53 = vadd.f32 %v854_v52, %v824_v32  ;;  %v786_v40 = vadd.f32 %v785_v50, %v1448_v14 }
 0x129   : > { %v787_v56 = vadd.f32 %v786_v40, %v1431_v54  ;;  %v856_v57 = vadd.f32 %v855_v53, %v825_v55  ;;  %v830_v54 = vmul.f32 %v1454_v22, %v1454_v22 }
 0x12b   : > { %v857_v58 = vadd.f32 %v856_v57, %v826_v28  ;;  %v788_v59 = vadd.f32 %v787_v56, %v1437_v1  ;;  %v831_v1 = vmul.f32 %v1461_v36, %v1461_v36 }
 0x12d   : > { %v789_v61 = vadd.f32 %v788_v59, %v1465_v45  ;;  %v858_v62 = vadd.f32 %v857_v58, %v827_v37 }
 0x12f   : > { %v859_v63 = vadd.f32 %v858_v62, %v828_v8  ;;  %v790_v14 = vadd.f32 %v789_v61, %v1472_v51  ;;  %v833_v51 = vmul.f32 %v595_v25, %v595_v25 }
 0x131   : > { %v791_v2 = vadd.f32 %v790_v14, %v1454_v22  ;;  %v860_v3 = vadd.f32 %v859_v63, %v829_v0 }
 0x133   : > { %v861_v4 = vadd.f32 %v860_v3, %v830_v54  ;;  %v792_v45 = vadd.f32 %v791_v2, %v1461_v36 }
 0x135   : > { %v793_v6 = vadd.f32 %v792_v45, %v592_v17  ;;  %v862_v7 = vadd.f32 %v861_v4, %v831_v1 }
 0x137   : > { %v863_v10 = vadd.f32 %v862_v7, %v832_v5  ;;  %v794_v11 = vadd.f32 %v793_v6, %v595_v25 }
 0x139   : > { %v795_v22 = vadd.f32 %v794_v11, %v1478_v60  ;;  %v864_v13 = vadd.f32 %v863_v10, %v833_v51 }
 0x13b   : > { %v796_v16 = vadd.f32 %v795_v22, %v1485_v9  ;;  %v865_v18 = vadd.f32 %v864_v13, %v834_v12 }
 0x13d   : > { %v797_v36 = vrot.slane %v796_v16, 4  ;;  %v866_v19 = vadd.f32 %v865_v18, %v835_v15 }
 0x13f   : > { %v798_v17 = vadd.f32 %v797_v36, %v796_v16  ;;  %v867_v20 = vrot.slane %v866_v19, 4 }
 0x141   : > { %v799_v21 = vrot.slane %v798_v17, 2  ;;  %v868_v23 = vadd.f32 %v867_v20, %v866_v19 }
 0x143   : > { %v800_v25 = vadd.f32 %v799_v21, %v798_v17  ;;  %v869_v26 = vrot.slane %v868_v23, 2 }
 0x145   : > { %v801_v27 = vrot.slane %v800_v25, 1  ;;  %v870_v29 = vadd.f32 %v869_v26, %v868_v23 }
 0x147   : > { %v802_v60 = vadd.f32 %v801_v27, %v800_v25  ;;  %v871_v30 = vrot.slane %v870_v29, 1 }
 0x149   : > { %803 = vst [vmem:[%s241_s25] sm:$0x1] %v802_v60  ;;  %v872_v9 = vadd.f32 %v871_v30, %v870_v29 }
 0x14b   : > { %873 = vst [vmem:[%s244_s28] sm:$0x1] %v872_v9 }
 0x14c PF: > { %s16_s18 = sadd.s32 1, %s1301_s18  }
 0x14d   : > { %p13_p5 = scmp.ge.s32.totalorder %s16_s18, 4  }
 0x14f   :  { %15 = sbr.rel (!%p13_p5) target bundleno = 1 (0x1), region = 86 }

// kernel: discriminator_forward.16
= control target key start
LH: loop header
LB: loop body
LE: loop exit
PB: predicated region body
PF: predicated region fallthrough
CT: control target
= control target key end

     0   :  { %s915_s12 = smov 0   ;;  %s1050_s0 = inlined_call_operand.vmem [shape: bf16[512,128], index: 0, kind: input, shape index: {}]   ;;  %s1051_s1 = inlined_call_operand.vmem [shape: f32[1,128], index: 1, kind: input, shape index: {}]   ;;  %s1052_s2 = inlined_call_operand.vmem [shape: f32[1,128], index: 2, kind: input, shape index: {}]   ;;  %s1053_s3 = inlined_call_operand.vmem [shape: bf16[512,128], index: 3, kind: output, shape index: {}]  }
   0x1 LB: > { %s628_s13 = sadd.s32 4294967295, %s893_s12   ;;  %p632_p0 = scmp.ge.s32.totalorder %s893_s12, 1  ;;  %s893_s12 = sphi %s915_s12, %s13_s12  }
   0x2   : > { %p138_p1 = scmp.lt.s32.totalorder %s893_s12, 3 }
   0x4   : > { %p139_p2 = pnand %p632_p0, %p138_p1 }
   0x5   : > { %s633_s14 = sshll.u32 (!%p139_p2), %s628_s13, 5  ;;  %v936_v0 = vld [vmem:[%s1051_s1] ss:$0 sm:$0xff] (!%p139_p2) }
   0x6   : > { %142 = sbr.rel (%p139_p2) target bundleno = 76 (0x4c), region = 32  ;;  %p163_p3 = scmp.lt.s32.totalorder (!%p139_p2), %s633_s14, 63  ;;  %v945_v9 = vld [vmem:[%s1052_s2] ss:$0 sm:$0xff] (!%p139_p2) }
   0xd   : > { %s1055_s14 = smov (!%p163_p3, %s633_s14), 63 }
   0xe   : > { %s634_s15 = sshll.u32 %s1055_s14, 2 }
   0xf   : > { %s931_s18 = scalar_lea.vmem %s1050_s0, %s634_s15  ;;  %s968_s25 = scalar_lea.vmem %s1053_s3, %s634_s15 }
  0x10   : > { %v706_v1 = vld [vmem:[%s931_s18] sm:$0xff]   ;;  %v849_v2 = vld [vmem:[%s931_s18 + $0x8] sm:$0xff]   ;;  %v850_v3 = vld [vmem:[%s931_s18 + $0x10] sm:$0xff]  }
  0x11   : > { %v707_v4 = vunpack.c.l.bf16 %v706_v1  ;;  %v708_v5 = vunpack.c.h.bf16 %v706_v1  ;;  %v711_v6 = vunpack.c.l.bf16 %v849_v2  ;;  %v712_v7 = vunpack.c.h.bf16 %v849_v2  ;;  %v851_v8 = vld [vmem:[%s931_s18 + $0x18] sm:$0xff]   ;;  %v852_v36 = vld [vmem:[%s931_s18 + $0x20] sm:$0xff]   ;;  %v853_v41 = vld [vmem:[%s931_s18 + $0x28] sm:$0xff]  }
  0x12   : > { %v715_v10 = vunpack.c.l.bf16 %v850_v3  ;;  %v716_v11 = vunpack.c.h.bf16 %v850_v3  ;;  %v719_v12 = vunpack.c.l.bf16 %v851_v8  ;;  %v720_v13 = vunpack.c.h.bf16 %v851_v8  ;;  %v854_v52 = vld [vmem:[%s931_s18 + $0x30] sm:$0xff]   ;;  %v855_v53 = vld [vmem:[%s931_s18 + $0x38] sm:$0xff]  }
  0x13   : > { %v245_v14 = vmul.f32 %v707_v4, %v936_v0  ;;  %v246_v15 = vmul.f32 %v708_v5, %v936_v0  ;;  %v247_v16 = vmul.f32 %v711_v6, %v936_v0  ;;  %v248_v17 = vmul.f32 %v712_v7, %v936_v0 }
  0x14   : > { %v249_v18 = vmul.f32 %v715_v10, %v936_v0  ;;  %v250_v19 = vmul.f32 %v716_v11, %v936_v0  ;;  %v251_v20 = vmul.f32 %v719_v12, %v936_v0  ;;  %v252_v21 = vmul.f32 %v720_v13, %v936_v0 }
  0x15   : > { %v284_v22 = vadd.f32 %v945_v9, %v245_v14  ;;  %v285_v23 = vadd.f32 %v945_v9, %v246_v15  ;;  %v286_v24 = vadd.f32 %v945_v9, %v247_v16  ;;  %v287_v25 = vadd.f32 %v945_v9, %v248_v17 }
  0x16   : > { %v288_v26 = vadd.f32 %v945_v9, %v249_v18  ;;  %v289_v27 = vadd.f32 %v945_v9, %v250_v19  ;;  %v290_v28 = vadd.f32 %v945_v9, %v251_v20  ;;  %v291_v29 = vadd.f32 %v945_v9, %v252_v21  ;;  %v856_v20 = vld [vmem:[%s931_s18 + $0x40] sm:$0xff]  }
  0x17   : > { %vm316_vm0 = vcmp.ge.f32.partialorder %v284_v22, 0.0  ;;  %vm317_vm1 = vcmp.ge.f32.partialorder %v285_v23, 0.0  ;;  %v348_v30 = vmul.f32 0.2, %v284_v22  ;;  %v349_v31 = vmul.f32 0.2, %v285_v23 }
  0x18   : > { %vm318_vm2 = vcmp.ge.f32.partialorder %v286_v24, 0.0  ;;  %vm319_vm3 = vcmp.ge.f32.partialorder %v287_v25, 0.0  ;;  %v350_v32 = vmul.f32 0.2, %v286_v24  ;;  %v351_v33 = vmul.f32 0.2, %v287_v25 }
  0x19   : > { %v380_v34 = vsel %vm316_vm0, %v284_v22, %v348_v30  ;;  %v381_v35 = vsel %vm317_vm1, %v285_v23, %v349_v31  ;;  %vm320_vm4 = vcmp.ge.f32.partialorder %v288_v26, 0.0  ;;  %vm321_vm5 = vcmp.ge.f32.partialorder %v289_v27, 0.0 }
  0x1a   : > { %v772_v37 = vpack.c.bf16 %v381_v35, %v380_v34  ;;  %v382_v38 = vsel %vm318_vm2, %v286_v24, %v350_v32  ;;  %v383_v39 = vsel %vm319_vm3, %v287_v25, %v351_v33  ;;  %v352_v40 = vmul.f32 0.2, %v288_v26  ;;  %v857_v24 = vld [vmem:[%s931_s18 + $0x48] sm:$0xff]  }
  0x1b   : > { %v777_v42 = vpack.c.bf16 %v383_v39, %v382_v38  ;;  %v353_v43 = vmul.f32 0.2, %v289_v27  ;;  %vm322_vm6 = vcmp.ge.f32.partialorder %v290_v28, 0.0  ;;  %vm323_vm7 = vcmp.ge.f32.partialorder %v291_v29, 0.0 }
  0x1c   : > { %773 = vst [vmem:[%s968_s25] sm:$0xff] %v772_v37   ;;  %v384_v44 = vsel %vm320_vm4, %v288_v26, %v352_v40  ;;  %v354_v45 = vmul.f32 0.2, %v290_v28  ;;  %v355_v46 = vmul.f32 0.2, %v291_v29  ;;  %v723_v47 = vunpack.c.l.bf16 %v852_v36 }
  0x1d   : > { %864 = vst [vmem:[%s968_s25 + $0x8] sm:$0xff] %v777_v42   ;;  %v385_v48 = vsel %vm321_vm5, %v289_v27, %v353_v43  ;;  %v724_v49 = vunpack.c.h.bf16 %v852_v36  ;;  %v727_v50 = vunpack.c.l.bf16 %v853_v41  ;;  %v728_v51 = vunpack.c.h.bf16 %v853_v41  ;;  %v858_v36 = vld [vmem:[%s931_s18 + $0x50] sm:$0xff]  }
  0x1e   : > { %v782_v54 = vpack.c.bf16 %v385_v48, %v384_v44  ;;  %v386_v55 = vsel %vm322_vm6, %v290_v28, %v354_v45  ;;  %v387_v56 = vsel %vm323_vm7, %v291_v29, %v355_v46  ;;  %v253_v57 = vmul.f32 %v723_v47, %v936_v0 }
  0x1f   : > { %v787_v58 = vpack.c.bf16 %v387_v56, %v386_v55  ;;  %v254_v59 = vmul.f32 %v724_v49, %v936_v0  ;;  %v255_v60 = vmul.f32 %v727_v50, %v936_v0  ;;  %v256_v61 = vmul.f32 %v728_v51, %v936_v0  ;;  %v859_v55 = vld [vmem:[%s931_s18 + $0x58] sm:$0xff]  }
  0x20   : > { %865 = vst [vmem:[%s968_s25 + $0x10] sm:$0xff] %v782_v54   ;;  %v292_v62 = vadd.f32 %v945_v9, %v253_v57  ;;  %v731_v63 = vunpack.c.l.bf16 %v854_v52  ;;  %v732_v1 = vunpack.c.h.bf16 %v854_v52  ;;  %v735_v2 = vunpack.c.l.bf16 %v855_v53 }
  0x21   : > { %866 = vst [vmem:[%s968_s25 + $0x18] sm:$0xff] %v787_v58   ;;  %v293_v3 = vadd.f32 %v945_v9, %v254_v59  ;;  %v294_v4 = vadd.f32 %v945_v9, %v255_v60  ;;  %v295_v5 = vadd.f32 %v945_v9, %v256_v61  ;;  %v736_v6 = vunpack.c.h.bf16 %v855_v53 }
  0x22   : > { %vm324_vm8 = vcmp.ge.f32.partialorder %v292_v62, 0.0  ;;  %v356_v7 = vmul.f32 0.2, %v292_v62  ;;  %v257_v8 = vmul.f32 %v731_v63, %v936_v0  ;;  %v258_v10 = vmul.f32 %v732_v1, %v936_v0  ;;  %v860_v1 = vld [vmem:[%s931_s18 + $0x60] sm:$0xff]  }
  0x23   : > { %vm325_vm9 = vcmp.ge.f32.partialorder %v293_v3, 0.0  ;;  %v357_v11 = vmul.f32 0.2, %v293_v3  ;;  %vm326_vm10 = vcmp.ge.f32.partialorder %v294_v4, 0.0  ;;  %vm327_vm11 = vcmp.ge.f32.partialorder %v295_v5, 0.0 }
  0x24   : > { %v388_v12 = vsel %vm324_vm8, %v292_v62, %v356_v7  ;;  %v358_v13 = vmul.f32 0.2, %v294_v4  ;;  %v359_v14 = vmul.f32 0.2, %v295_v5  ;;  %v296_v15 = vadd.f32 %v945_v9, %v257_v8 }
  0x25   : > { %v389_v16 = vsel %vm325_vm9, %v293_v3, %v357_v11  ;;  %v297_v17 = vadd.f32 %v945_v9, %v258_v10  ;;  %v259_v18 = vmul.f32 %v735_v2, %v936_v0  ;;  %v260_v19 = vmul.f32 %v736_v6, %v936_v0  ;;  %v861_v6 = vld [vmem:[%s931_s18 + $0x68] sm:$0xff]  }
  0x26   : > { %v792_v21 = vpack.c.bf16 %v389_v16, %v388_v12  ;;  %v390_v22 = vsel %vm326_vm10, %v294_v4, %v358_v13  ;;  %v391_v23 = vsel %vm327_vm11, %v295_v5, %v359_v14  ;;  %vm328_vm12 = vcmp.ge.f32.partialorder %v296_v15, 0.0 }
  0x27   : > { %v797_v25 = vpack.c.bf16 %v391_v23, %v390_v22  ;;  %vm329_vm13 = vcmp.ge.f32.partialorder %v297_v17, 0.0  ;;  %v360_v26 = vmul.f32 0.2, %v296_v15  ;;  %v361_v27 = vmul.f32 0.2, %v297_v17  ;;  %v862_v22 = vld [vmem:[%s931_s18 + $0x70] sm:$0xff]  }
  0x28   : > { %867 = vst [vmem:[%s968_s25 + $0x20] sm:$0xff] %v792_v21   ;;  %v298_v28 = vadd.f32 %v945_v9, %v259_v18  ;;  %v299_v29 = vadd.f32 %v945_v9, %v260_v19  ;;  %v739_v30 = vunpack.c.l.bf16 %v856_v20  ;;  %v740_v31 = vunpack.c.h.bf16 %v856_v20 }
  0x29   : > { %868 = vst [vmem:[%s968_s25 + $0x28] sm:$0xff] %v797_v25   ;;  %v392_v32 = vsel %vm328_vm12, %v296_v15, %v360_v26  ;;  %v393_v33 = vsel %vm329_vm13, %v297_v17, %v361_v27  ;;  %v743_v34 = vunpack.c.l.bf16 %v857_v24  ;;  %v744_v35 = vunpack.c.h.bf16 %v857_v24 }
  0x2a   : > { %v802_v37 = vpack.c.bf16 %v393_v33, %v392_v32  ;;  %vm330_vm14 = vcmp.ge.f32.partialorder %v298_v28, 0.0  ;;  %vm331_vm15 = vcmp.ge.f32.partialorder %v299_v29, 0.0  ;;  %v362_v38 = vmul.f32 0.2, %v298_v28 }
  0x2b   : > { %v363_v39 = vmul.f32 0.2, %v299_v29  ;;  %v261_v40 = vmul.f32 %v739_v30, %v936_v0  ;;  %v262_v41 = vmul.f32 %v740_v31, %v936_v0  ;;  %v263_v42 = vmul.f32 %v743_v34, %v936_v0 }
  0x2c   : > { %869 = vst [vmem:[%s968_s25 + $0x30] sm:$0xff] %v802_v37   ;;  %v394_v43 = vsel %vm330_vm14, %v298_v28, %v362_v38  ;;  %v264_v44 = vmul.f32 %v744_v35, %v936_v0  ;;  %v747_v45 = vunpack.c.l.bf16 %v858_v36  ;;  %v748_v46 = vunpack.c.h.bf16 %v858_v36 }
  0x2d   : > { %v395_v47 = vsel %vm331_vm15, %v299_v29, %v363_v39  ;;  %v300_v48 = vadd.f32 %v945_v9, %v261_v40  ;;  %v301_v49 = vadd.f32 %v945_v9, %v262_v41  ;;  %v302_v50 = vadd.f32 %v945_v9, %v263_v42  ;;  %v863_v41 = vld [vmem:[%s931_s18 + $0x78] sm:$0xff]  }
  0x2e   : > { %v807_v51 = vpack.c.bf16 %v395_v47, %v394_v43  ;;  %v303_v52 = vadd.f32 %v945_v9, %v264_v44  ;;  %v265_v53 = vmul.f32 %v747_v45, %v936_v0  ;;  %v266_v54 = vmul.f32 %v748_v46, %v936_v0 }
  0x2f   : > { %vm332_vm0 = vcmp.ge.f32.partialorder %v300_v48, 0.0  ;;  %vm333_vm1 = vcmp.ge.f32.partialorder %v301_v49, 0.0  ;;  %v364_v56 = vmul.f32 0.2, %v300_v48  ;;  %v365_v57 = vmul.f32 0.2, %v301_v49 }
  0x30   : > { %870 = vst [vmem:[%s968_s25 + $0x38] sm:$0xff] %v807_v51   ;;  %vm334_vm2 = vcmp.ge.f32.partialorder %v302_v50, 0.0  ;;  %vm335_vm3 = vcmp.ge.f32.partialorder %v303_v52, 0.0  ;;  %v366_v58 = vmul.f32 0.2, %v302_v50  ;;  %v304_v62 = vadd.f32 %v945_v9, %v265_v53 }
  0x31   : > { %v367_v59 = vmul.f32 0.2, %v303_v52  ;;  %v396_v60 = vsel %vm332_vm0, %v300_v48, %v364_v56  ;;  %v397_v61 = vsel %vm333_vm1, %v301_v49, %v365_v57  ;;  %v305_v63 = vadd.f32 %v945_v9, %v266_v54 }
  0x32   : > { %v812_v2 = vpack.c.bf16 %v397_v61, %v396_v60  ;;  %v398_v3 = vsel %vm334_vm2, %v302_v50, %v366_v58  ;;  %v751_v5 = vunpack.c.l.bf16 %v859_v55  ;;  %vm336_vm4 = vcmp.ge.f32.partialorder %v304_v62, 0.0 }
  0x33   : > { %v399_v4 = vsel %vm335_vm3, %v303_v52, %v367_v59  ;;  %vm337_vm5 = vcmp.ge.f32.partialorder %v305_v63, 0.0  ;;  %v368_v8 = vmul.f32 0.2, %v304_v62  ;;  %v369_v10 = vmul.f32 0.2, %v305_v63 }
  0x34   : > { %v817_v7 = vpack.c.bf16 %v399_v4, %v398_v3  ;;  %871 = vst [vmem:[%s968_s25 + $0x40] sm:$0xff] %v812_v2   ;;  %v752_v11 = vunpack.c.h.bf16 %v859_v55  ;;  %v267_v12 = vmul.f32 %v751_v5, %v936_v0  ;;  %v755_v13 = vunpack.c.l.bf16 %v860_v1 }
  0x35   : > { %v400_v14 = vsel %vm336_vm4, %v304_v62, %v368_v8  ;;  %v756_v15 = vunpack.c.h.bf16 %v860_v1  ;;  %v759_v16 = vunpack.c.l.bf16 %v861_v6  ;;  %v760_v17 = vunpack.c.h.bf16 %v861_v6 }
  0x36   : > { %872 = vst [vmem:[%s968_s25 + $0x48] sm:$0xff] %v817_v7   ;;  %v401_v18 = vsel %vm337_vm5, %v305_v63, %v369_v10  ;;  %v268_v19 = vmul.f32 %v752_v11, %v936_v0  ;;  %v306_v20 = vadd.f32 %v945_v9, %v267_v12  ;;  %v269_v21 = vmul.f32 %v755_v13, %v936_v0 }
  0x37   : > { %v822_v23 = vpack.c.bf16 %v401_v18, %v400_v14  ;;  %v270_v24 = vmul.f32 %v756_v15, %v936_v0  ;;  %v271_v25 = vmul.f32 %v759_v16, %v936_v0  ;;  %v272_v26 = vmul.f32 %v760_v17, %v936_v0 }
  0x38   : > { %v307_v27 = vadd.f32 %v945_v9, %v268_v19  ;;  %vm338_vm6 = vcmp.ge.f32.partialorder %v306_v20, 0.0  ;;  %v370_v28 = vmul.f32 0.2, %v306_v20  ;;  %v308_v29 = vadd.f32 %v945_v9, %v269_v21 }
  0x39   : > { %873 = vst [vmem:[%s968_s25 + $0x50] sm:$0xff] %v822_v23   ;;  %v309_v30 = vadd.f32 %v945_v9, %v270_v24  ;;  %v310_v31 = vadd.f32 %v945_v9, %v271_v25  ;;  %v311_v32 = vadd.f32 %v945_v9, %v272_v26  ;;  %v763_v33 = vunpack.c.l.bf16 %v862_v22 }
  0x3a   : > { %vm339_vm7 = vcmp.ge.f32.partialorder %v307_v27, 0.0  ;;  %v371_v34 = vmul.f32 0.2, %v307_v27  ;;  %v402_v35 = vsel %vm338_vm6, %v306_v20, %v370_v28  ;;  %vm340_vm8 = vcmp.ge.f32.partialorder %v308_v29, 0.0 }
  0x3b   : > { %vm341_vm9 = vcmp.ge.f32.partialorder %v309_v30, 0.0  ;;  %v372_v36 = vmul.f32 0.2, %v308_v29  ;;  %v373_v37 = vmul.f32 0.2, %v309_v30  ;;  %vm342_vm10 = vcmp.ge.f32.partialorder %v310_v31, 0.0 }
  0x3c   : > { %v403_v38 = vsel %vm339_vm7, %v307_v27, %v371_v34  ;;  %vm343_vm11 = vcmp.ge.f32.partialorder %v311_v32, 0.0  ;;  %v374_v39 = vmul.f32 0.2, %v310_v31  ;;  %v375_v40 = vmul.f32 0.2, %v311_v32 }
  0x3d   : > { %v827_v42 = vpack.c.bf16 %v403_v38, %v402_v35  ;;  %v404_v43 = vsel %vm340_vm8, %v308_v29, %v372_v36  ;;  %v405_v44 = vsel %vm341_vm9, %v309_v30, %v373_v37  ;;  %v764_v45 = vunpack.c.h.bf16 %v862_v22 }
  0x3e   : > { %v832_v46 = vpack.c.bf16 %v405_v44, %v404_v43  ;;  %v406_v47 = vsel %vm342_vm10, %v310_v31, %v374_v39  ;;  %v407_v48 = vsel %vm343_vm11, %v311_v32, %v375_v40  ;;  %v273_v49 = vmul.f32 %v763_v33, %v936_v0 }
  0x3f   : > { %874 = vst [vmem:[%s968_s25 + $0x58] sm:$0xff] %v827_v42   ;;  %v837_v50 = vpack.c.bf16 %v407_v48, %v406_v47  ;;  %v274_v51 = vmul.f32 %v764_v45, %v936_v0  ;;  %v767_v52 = vunpack.c.l.bf16 %v863_v41  ;;  %v768_v53 = vunpack.c.h.bf16 %v863_v41 }
  0x40   : > { %875 = vst [vmem:[%s968_s25 + $0x60] sm:$0xff] %v832_v46   ;;  %v312_v54 = vadd.f32 %v945_v9, %v273_v49 }
  0x41   : > { %876 = vst [vmem:[%s968_s25 + $0x68] sm:$0xff] %v837_v50   ;;  %v313_v55 = vadd.f32 %v945_v9, %v274_v51  ;;  %v275_v56 = vmul.f32 %v767_v52, %v936_v0  ;;  %v276_v57 = vmul.f32 %v768_v53, %v936_v0 }
  0x42   : > { %vm344_vm12 = vcmp.ge.f32.partialorder %v312_v54, 0.0  ;;  %v376_v58 = vmul.f32 0.2, %v312_v54 }
  0x43   : > { %vm345_vm13 = vcmp.ge.f32.partialorder %v313_v55, 0.0  ;;  %v377_v59 = vmul.f32 0.2, %v313_v55  ;;  %v314_v60 = vadd.f32 %v945_v9, %v275_v56  ;;  %v315_v61 = vadd.f32 %v945_v9, %v276_v57 }
  0x44   : > { %v408_v62 = vsel %vm344_vm12, %v312_v54, %v376_v58 }
  0x45   : > { %v409_v63 = vsel %vm345_vm13, %v313_v55, %v377_v59  ;;  %vm346_vm14 = vcmp.ge.f32.partialorder %v314_v60, 0.0  ;;  %vm347_vm15 = vcmp.ge.f32.partialorder %v315_v61, 0.0  ;;  %v378_v1 = vmul.f32 0.2, %v314_v60 }
  0x46   : > { %v842_v2 = vpack.c.bf16 %v409_v63, %v408_v62  ;;  %v379_v3 = vmul.f32 0.2, %v315_v61 }
  0x47   : > { %v410_v4 = vsel %vm346_vm14, %v314_v60, %v378_v1 }
  0x48   : > { %877 = vst [vmem:[%s968_s25 + $0x70] sm:$0xff] %v842_v2   ;;  %v411_v5 = vsel %vm347_vm15, %v315_v61, %v379_v3 }
  0x49   : > { %v847_v0 = vpack.c.bf16 %v411_v5, %v410_v4 }
  0x4b   : > { %878 = vst [vmem:[%s968_s25 + $0x78] sm:$0xff] %v847_v0  }
  0x4c PF: > { %s13_s12 = sadd.s32 1, %s893_s12  }
  0x4d   : > { %p10_p4 = scmp.ge.s32.totalorder %s13_s12, 4  }
  0x4f   :  { %12 = sbr.rel (!%p10_p4) target bundleno = 1 (0x1), region = 62 }

// kernel: discriminator_forward.17
= control target key start
LH: loop header
LB: loop body
LE: loop exit
PB: predicated region body
PF: predicated region fallthrough
CT: control target
= control target key end

     0   :  { %s1570_s18 = smov 0   ;;  %s1823_s0 = inlined_call_operand.vmem [shape: bf16[512,256], index: 0, kind: input, shape index: {}]   ;;  %s1824_s1 = inlined_call_operand.vmem [shape: bf16[256,128], index: 1, kind: input, shape index: {}]   ;;  %s1825_s2 = inlined_call_operand.vmem [shape: f32[1,128], index: 2, kind: input, shape index: {}]   ;;  %s1826_s3 = inlined_call_operand.vmem [shape: bf16[512,128], index: 3, kind: output, shape index: {0}]   ;;  %s1827_s4 = inlined_call_operand.vmem [shape: f32[2,1,128], index: 4, kind: output, shape index: {1}]   ;;  %s1828_s5 = inlined_call_operand.vmem [shape: f32[2,1,128], index: 5, kind: output, shape index: {2}]  }
   0x1 LB: > { %s1576_s19 = sadd.s32 4294967295, %s1538_s18   ;;  %p1115_p0 = scmp.ge.s32.totalorder %s1538_s18, 1  ;;  %s1538_s18 = sphi %s1570_s18, %s16_s18  }
   0x2   : > { %p194_p1 = scmp.lt.s32.totalorder %s1538_s18, 3 }
   0x4   : > { %p195_p2 = pnand %p1115_p0, %p194_p1 }
   0x5   : > { %v1468_v0 = vld [vmem:[%s1824_s1 + $0x40] sm:$0xff] (!%p195_p2)   ;;  %s1116_s22 = sshll.u32 (!%p195_p2), %s1576_s19, 5  ;;  %v1470_v2 = vld [vmem:[%s1824_s1 + $0x48] sm:$0xff] (!%p195_p2)   ;;  %v1472_v4 = vld [vmem:[%s1824_s1 + $0x50] sm:$0xff] (!%p195_p2)   ;;  %p242_p4 = scmp.lt.s32.totalorder (!%p195_p2), %s1576_s19, 1 }
   0x6   : > { %198 = sbr.rel (%p195_p2) target bundleno = 362 (0x16a), region = 32  ;;  %v1469_v1 = vld [vmem:[%s1824_s1] sm:$0xff] (!%p195_p2)   ;;  %1332 = vmatprep.subr.bf16.mxu0 (!%p195_p2), %v1468_v0  ;;  %1444 = vmatprep.subr.bf16.mxu1 (!%p195_p2), %v1468_v0  ;;  %v1471_v3 = vld [vmem:[%s1824_s1 + $0x8] sm:$0xff] (!%p195_p2)   ;;  %p230_p3 = scmp.lt.s32.totalorder (!%p195_p2), %s1116_s22, 63  ;;  %v1473_v5 = vld [vmem:[%s1824_s1 + $0x10] sm:$0xff] (!%p195_p2)  }
   0x7   : > { %1333 = vmatpush3.bf16.msra.mxu0 (!%p195_p2), %v1469_v1  ;;  %1452 = vmatpush3.bf16.msra.mxu1 (!%p195_p2), %v1469_v1  ;;  %v1474_v6 = vld [vmem:[%s1824_s1 + $0x58] sm:$0xff] (!%p195_p2)   ;;  %v1476_v8 = vld [vmem:[%s1824_s1 + $0x60] sm:$0xff] (!%p195_p2)   ;;  %v1478_v10 = vld [vmem:[%s1824_s1 + $0x68] sm:$0xff] (!%p195_p2)  }
   0x8   : > { %1334 = vmatprep.subr.bf16.mxu0 (!%p195_p2), %v1470_v2  ;;  %1445 = vmatprep.subr.bf16.mxu1 (!%p195_p2), %v1470_v2  ;;  %v1475_v7 = vld [vmem:[%s1824_s1 + $0x18] sm:$0xff] (!%p195_p2)   ;;  %v1477_v9 = vld [vmem:[%s1824_s1 + $0x20] sm:$0xff] (!%p195_p2)   ;;  %v1479_v12 = vld [vmem:[%s1824_s1 + $0x28] sm:$0xff] (!%p195_p2)  }
   0x9   : > { %v1480_v13 = vld [vmem:[%s1824_s1 + $0x70] sm:$0xff] (!%p195_p2)   ;;  %v1482_v16 = vld [vmem:[%s1824_s1 + $0x78] sm:$0xff] (!%p195_p2)   ;;  %v1672_v49 = vld [vmem:[%s1825_s2] ss:$0 sm:$0xff] (!%p195_p2) }
   0xa   : > { %v1481_v15 = vld [vmem:[%s1824_s1 + $0x30] sm:$0xff] (!%p195_p2)   ;;  %v1483_v17 = vld [vmem:[%s1824_s1 + $0x38] sm:$0xff] (!%p195_p2)  }
   0xb   : > { %1335 = vmatpush3.bf16.msra.mxu0 (!%p195_p2), %v1471_v3  ;;  %1453 = vmatpush3.bf16.msra.mxu1 (!%p195_p2), %v1471_v3 }
   0xc   : > { %1336 = vmatprep.subr.bf16.mxu0 (!%p195_p2), %v1472_v4  ;;  %1446 = vmatprep.subr.bf16.mxu1 (!%p195_p2), %v1472_v4 }
   0xd   : > { %s1830_s22 = smov (!%p230_p3, %s1116_s22), 63  ;;  %s1832_s19 = smov (!%p242_p4, %s1576_s19), 1 }
   0xe   : > { %s1204_s12 = sshll.u32 %s1830_s22, 3  ;;  %s247_s23 = scalar_lea.vmem %s1828_s5, %s1832_s19 }
   0xf   : > { %1337 = vmatpush3.bf16.msra.mxu0 %v1473_v5  ;;  %1454 = vmatpush3.bf16.msra.mxu1 %v1473_v5  ;;  %s1614_s17 = scalar_lea.vmem %s1823_s0, %s1204_s12  ;;  %s1120_s12 = sshll.u32 %s1830_s22, 2 }
  0x10   : > { %1338 = vmatprep.subr.bf16.mxu0 %v1474_v6  ;;  %1447 = vmatprep.subr.bf16.mxu1 %v1474_v6  ;;  %v1486_v11 = vld [vmem:[%s1614_s17 + $0x4] ss:$8 sps:$4 sm:$0xff]   ;;  %v1484_v18 = vld [vmem:[%s1614_s17] ss:$8 sps:$4 sm:$0xff]   ;;  %v1487_v19 = vld [vmem:[%s1614_s17 + $0x14] ss:$8 sps:$4 sm:$0xff]   ;;  %s1683_s15 = scalar_lea.vmem %s1826_s3, %s1120_s12 }
  0x11   : > { %608 = vmatprep.mubr.bf16.mxu0 %v1486_v11  ;;  %v1498_v14 = vld [vmem:[%s1614_s17 + $0x84] ss:$8 sps:$4 sm:$0xff]   ;;  %v1496_v20 = vld [vmem:[%s1614_s17 + $0x80] ss:$8 sps:$4 sm:$0xff]   ;;  %v1502_v21 = vld [vmem:[%s1614_s17 + $0x94] ss:$8 sps:$4 sm:$0xff]  }
  0x12   : > { %672 = vmatprep.mubr.bf16.mxu1 %v1498_v14  ;;  %v1489_v22 = vld [vmem:[%s1614_s17 + $0x10] ss:$8 sps:$4 sm:$0xff]   ;;  %v1490_v23 = vld [vmem:[%s1614_s17 + $0x24] ss:$8 sps:$4 sm:$0xff]   ;;  %v1492_v26 = vld [vmem:[%s1614_s17 + $0x20] ss:$8 sps:$4 sm:$0xff]  }
  0x13   : > { %1339 = vmatpush3.bf16.msra.mxu0 %v1475_v7  ;;  %1455 = vmatpush3.bf16.msra.mxu1 %v1475_v7  ;;  %v1504_v24 = vld [vmem:[%s1614_s17 + $0x90] ss:$8 sps:$4 sm:$0xff]   ;;  %v1508_v25 = vld [vmem:[%s1614_s17 + $0xa4] ss:$8 sps:$4 sm:$0xff]   ;;  %v1493_v27 = vld [vmem:[%s1614_s17 + $0x34] ss:$8 sps:$4 sm:$0xff]  }
  0x14   : > { %1340 = vmatprep.subr.bf16.mxu0 %v1476_v8  ;;  %1448 = vmatprep.subr.bf16.mxu1 %v1476_v8  ;;  %v1510_v28 = vld [vmem:[%s1614_s17 + $0xa0] ss:$8 sps:$4 sm:$0xff]   ;;  %v1514_v29 = vld [vmem:[%s1614_s17 + $0xb4] ss:$8 sps:$4 sm:$0xff]   ;;  %v1495_v30 = vld [vmem:[%s1614_s17 + $0x30] ss:$8 sps:$4 sm:$0xff]  }
  0x15   : > { %v1499_v31 = vld [vmem:[%s1614_s17 + $0x44] ss:$8 sps:$4 sm:$0xff]   ;;  %v1516_v32 = vld [vmem:[%s1614_s17 + $0xb0] ss:$8 sps:$4 sm:$0xff]   ;;  %v1501_v34 = vld [vmem:[%s1614_s17 + $0x40] ss:$8 sps:$4 sm:$0xff]  }
  0x16   : > { %v1520_v33 = vld [vmem:[%s1614_s17 + $0xc4] ss:$8 sps:$4 sm:$0xff]   ;;  %v1505_v35 = vld [vmem:[%s1614_s17 + $0x54] ss:$8 sps:$4 sm:$0xff]   ;;  %v1522_v36 = vld [vmem:[%s1614_s17 + $0xc0] ss:$8 sps:$4 sm:$0xff]  }
  0x17   : > { %1341 = vmatpush3.bf16.msra.mxu0 %v1477_v9  ;;  %1456 = vmatpush3.bf16.msra.mxu1 %v1477_v9  ;;  %v1523_v37 = vld [vmem:[%s1614_s17 + $0xd4] ss:$8 sps:$4 sm:$0xff]   ;;  %v1507_v38 = vld [vmem:[%s1614_s17 + $0x50] ss:$8 sps:$4 sm:$0xff]   ;;  %v1511_v39 = vld [vmem:[%s1614_s17 + $0x64] ss:$8 sps:$4 sm:$0xff]  }
  0x18   : > { %1342 = vmatprep.subr.bf16.mxu0 %v1478_v10  ;;  %1449 = vmatprep.subr.bf16.mxu1 %v1478_v10  ;;  %v1525_v40 = vld [vmem:[%s1614_s17 + $0xd0] ss:$8 sps:$4 sm:$0xff]   ;;  %v1526_v41 = vld [vmem:[%s1614_s17 + $0xe4] ss:$8 sps:$4 sm:$0xff]   ;;  %v1513_v42 = vld [vmem:[%s1614_s17 + $0x60] ss:$8 sps:$4 sm:$0xff]  }
  0x19   : > { %v1517_v43 = vld [vmem:[%s1614_s17 + $0x74] ss:$8 sps:$4 sm:$0xff]   ;;  %v1528_v44 = vld [vmem:[%s1614_s17 + $0xe0] ss:$8 sps:$4 sm:$0xff]   ;;  %v1519_v46 = vld [vmem:[%s1614_s17 + $0x70] ss:$8 sps:$4 sm:$0xff]  }
  0x1a   : > { %v1529_v45 = vld [vmem:[%s1614_s17 + $0xf4] ss:$8 sps:$4 sm:$0xff]   ;;  %v1531_v47 = vld [vmem:[%s1614_s17 + $0xf0] ss:$8 sps:$4 sm:$0xff]   ;;  %s244_s17 = scalar_lea.vmem %s1827_s4, %s1832_s19 }
  0x1b   : > { %1343 = vmatpush3.bf16.msra.mxu0 %v1479_v12  ;;  %1457 = vmatpush3.bf16.msra.mxu1 %v1479_v12 }
  0x1c   : > { %1344 = vmatprep.subr.bf16.mxu0 %v1480_v13  ;;  %1450 = vmatprep.subr.bf16.mxu1 %v1480_v13 }
  0x1f   : > { %1345 = vmatpush3.bf16.msra.mxu0 %v1481_v15  ;;  %1458 = vmatpush3.bf16.msra.mxu1 %v1481_v15 }
  0x20   : > { %1346 = vmatprep.subr.bf16.mxu0 %v1482_v16  ;;  %1451 = vmatprep.subr.bf16.mxu1 %v1482_v16 }
  0x23   : > { %1347 = vmatpush3.bf16.msra.mxu0 %v1483_v17  ;;  %1459 = vmatpush3.bf16.msra.mxu1 %v1483_v17 }
  0x26   : > { %609 = vmatmul.mubr.bf16.vlgmr.msra.gmra.mrb[0].mxu0 %v1484_v18  ;;  %673 = vmatmul.mubr.bf16.vlgmr.msra.gmra.mrb[0].mxu1 %v1496_v20 }
  0x27   : > { %616 = vmatprep.mubr.bf16.mxu0 %v1487_v19  ;;  %680 = vmatprep.mubr.bf16.mxu1 %v1502_v21 }
  0x2e   : > { %617 = vmatmul.mubr.bf16.gmra.mrb[4].mxu0 %v1489_v22  ;;  %681 = vmatmul.mubr.bf16.gmra.mrb[4].mxu1 %v1504_v24 }
  0x2f   : > { %624 = vmatprep.mubr.bf16.mxu0 %v1490_v23  ;;  %688 = vmatprep.mubr.bf16.mxu1 %v1508_v25 }
  0x36   : > { %625 = vmatmul.mubr.bf16.gmra.mrb[8].mxu0 %v1492_v26  ;;  %689 = vmatmul.mubr.bf16.gmra.mrb[8].mxu1 %v1510_v28 }
  0x37   : > { %632 = vmatprep.mubr.bf16.mxu0 %v1493_v27  ;;  %696 = vmatprep.mubr.bf16.mxu1 %v1514_v29 }
  0x3e   : > { %633 = vmatmul.mubr.bf16.gmra.mrb[12].mxu0 %v1495_v30  ;;  %697 = vmatmul.mubr.bf16.gmra.mrb[12].mxu1 %v1516_v32 }
  0x3f   : > { %640 = vmatprep.mubr.bf16.mxu0 %v1499_v31  ;;  %704 = vmatprep.mubr.bf16.mxu1 %v1520_v33 }
  0x46   : > { %641 = vmatmul.mubr.bf16.gmra.mrb[16].mxu0 %v1501_v34  ;;  %705 = vmatmul.mubr.bf16.gmra.mrb[16].mxu1 %v1522_v36 }
  0x47   : > { %648 = vmatprep.mubr.bf16.mxu0 %v1505_v35  ;;  %712 = vmatprep.mubr.bf16.mxu1 %v1523_v37 }
  0x4e   : > { %649 = vmatmul.mubr.bf16.gmra.mrb[20].mxu0 %v1507_v38  ;;  %713 = vmatmul.mubr.bf16.gmra.mrb[20].mxu1 %v1525_v40 }
  0x4f   : > { %656 = vmatprep.mubr.bf16.mxu0 %v1511_v39  ;;  %720 = vmatprep.mubr.bf16.mxu1 %v1526_v41 }
  0x56   : > { %657 = vmatmul.mubr.bf16.gmra.mrb[24].mxu0 %v1513_v42  ;;  %721 = vmatmul.mubr.bf16.gmra.mrb[24].mxu1 %v1528_v44 }
  0x57   : > { %664 = vmatprep.mubr.bf16.mxu0 %v1517_v43  ;;  %728 = vmatprep.mubr.bf16.mxu1 %v1529_v45 }
  0x5e   : > { %665 = vmatmul.mubr.bf16.gmra.mrb[28].mxu0 %v1519_v46  ;;  %729 = vmatmul.mubr.bf16.gmra.mrb[28].mxu1 %v1531_v47 }
  0xf9   : > { %v1348_v48 = vpop.f32.mrb[0].mxu0  ;;  %v1396_v51 = vpop.f32.mrb[0].mxu1 }
  0xfa   : > { %v1349_v50 = vpop.f32.mrb[1].mxu0  ;;  %v1397_v54 = vpop.f32.mrb[1].mxu1 }
  0xfb   : > { %v1350_v52 = vadd.f32 %v1349_v50, %v1348_v48  ;;  %v1351_v53 = vpop.f32.mrb[2].mxu0  ;;  %v1398_v56 = vadd.f32 %v1397_v54, %v1396_v51  ;;  %v1399_v57 = vpop.f32.mrb[2].mxu1 }
  0xfc   : > { %v1352_v55 = vpop.f32.mrb[3].mxu0  ;;  %v1400_v60 = vpop.f32.mrb[3].mxu1 }
  0xfd   : > { %v611_v58 = vadd.f32 %v1350_v52, %v1672_v49  ;;  %v1353_v59 = vadd.f32 %v1352_v55, %v1351_v53  ;;  %v1677_v61 = vadd.f32 %v1398_v56, %v1672_v49  ;;  %v1401_v62 = vadd.f32 %v1400_v60, %v1399_v57 }
  0xff   : > { %v614_v63 = vadd.f32 %v1353_v59, %v1672_v49  ;;  %v1686_v0 = vadd.f32 %v1401_v62, %v1672_v49  ;;  %v935_v1 = vmul.f32 %v611_v58, %v611_v58 }
 0x101   : > { %v1240_v2 = vpack.c.bf16 %v614_v63, %v611_v58  ;;  %v897_v3 = vadd.f32 %v614_v63, %v611_v58  ;;  %v936_v4 = vmul.f32 %v614_v63, %v614_v63  ;;  %v1354_v5 = vpop.f32.mrb[4].mxu0  ;;  %v1280_v7 = vpack.c.bf16 %v1686_v0, %v1677_v61  ;;  %v1402_v8 = vpop.f32.mrb[4].mxu1 }
 0x102   : > { %v1355_v6 = vpop.f32.mrb[5].mxu0  ;;  %v1403_v12 = vpop.f32.mrb[5].mxu1 }
 0x103   : > { %1241 = vst [vmem:[%s1683_s15] sm:$0xff] %v1240_v2   ;;  %v967_v9 = vadd.f32 %v936_v4, %v935_v1  ;;  %v1356_v10 = vadd.f32 %v1355_v6, %v1354_v5  ;;  %v1357_v11 = vpop.f32.mrb[6].mxu0  ;;  %1324 = vst [vmem:[%s1683_s15 + $0x40] sm:$0xff] %v1280_v7   ;;  %v1404_v14 = vadd.f32 %v1403_v12, %v1402_v8  ;;  %v1405_v15 = vpop.f32.mrb[6].mxu1 }
 0x104   : > { %v1358_v13 = vpop.f32.mrb[7].mxu0  ;;  %v1406_v18 = vpop.f32.mrb[7].mxu1 }
 0x105   : > { %v619_v16 = vadd.f32 %v1356_v10, %v1672_v49  ;;  %v1359_v17 = vadd.f32 %v1358_v13, %v1357_v11  ;;  %v1694_v19 = vadd.f32 %v1404_v14, %v1672_v49  ;;  %v1407_v20 = vadd.f32 %v1406_v18, %v1405_v15 }
 0x107   : > { %v898_v21 = vadd.f32 %v897_v3, %v619_v16  ;;  %v937_v22 = vmul.f32 %v619_v16, %v619_v16  ;;  %v622_v23 = vadd.f32 %v1359_v17, %v1672_v49  ;;  %v1698_v24 = vadd.f32 %v1407_v20, %v1672_v49 }
 0x109   : > { %v968_v25 = vadd.f32 %v967_v9, %v937_v22  ;;  %v1245_v26 = vpack.c.bf16 %v622_v23, %v619_v16  ;;  %v899_v27 = vadd.f32 %v898_v21, %v622_v23  ;;  %v938_v28 = vmul.f32 %v622_v23, %v622_v23  ;;  %v1360_v29 = vpop.f32.mrb[8].mxu0  ;;  %v1408_v32 = vpop.f32.mrb[8].mxu1 }
 0x10a   : > { %v1361_v30 = vpop.f32.mrb[9].mxu0  ;;  %v1285_v31 = vpack.c.bf16 %v1698_v24, %v1694_v19  ;;  %v1409_v36 = vpop.f32.mrb[9].mxu1 }
 0x10b   : > { %1317 = vst [vmem:[%s1683_s15 + $0x8] sm:$0xff] %v1245_v26   ;;  %v969_v33 = vadd.f32 %v968_v25, %v938_v28  ;;  %v1362_v34 = vadd.f32 %v1361_v30, %v1360_v29  ;;  %v1363_v35 = vpop.f32.mrb[10].mxu0  ;;  %v1410_v38 = vadd.f32 %v1409_v36, %v1408_v32  ;;  %v1411_v39 = vpop.f32.mrb[10].mxu1 }
 0x10c   : > { %v1364_v37 = vpop.f32.mrb[11].mxu0  ;;  %1325 = vst [vmem:[%s1683_s15 + $0x48] sm:$0xff] %v1285_v31   ;;  %v1412_v42 = vpop.f32.mrb[11].mxu1 }
 0x10d   : > { %v627_v40 = vadd.f32 %v1362_v34, %v1672_v49  ;;  %v1365_v41 = vadd.f32 %v1364_v37, %v1363_v35  ;;  %v1706_v43 = vadd.f32 %v1410_v38, %v1672_v49  ;;  %v1413_v44 = vadd.f32 %v1412_v42, %v1411_v39 }
 0x10f   : > { %v900_v45 = vadd.f32 %v899_v27, %v627_v40  ;;  %v939_v46 = vmul.f32 %v627_v40, %v627_v40  ;;  %v630_v47 = vadd.f32 %v1365_v41, %v1672_v49  ;;  %v1710_v48 = vadd.f32 %v1413_v44, %v1672_v49 }
 0x111   : > { %v970_v50 = vadd.f32 %v969_v33, %v939_v46  ;;  %v1250_v51 = vpack.c.bf16 %v630_v47, %v627_v40  ;;  %v901_v52 = vadd.f32 %v900_v45, %v630_v47  ;;  %v940_v53 = vmul.f32 %v630_v47, %v630_v47  ;;  %v1366_v54 = vpop.f32.mrb[12].mxu0  ;;  %v1414_v57 = vpop.f32.mrb[12].mxu1 }
 0x112   : > { %v1367_v55 = vpop.f32.mrb[13].mxu0  ;;  %v1290_v56 = vpack.c.bf16 %v1710_v48, %v1706_v43  ;;  %v1415_v62 = vpop.f32.mrb[13].mxu1 }
 0x113   : > { %1318 = vst [vmem:[%s1683_s15 + $0x10] sm:$0xff] %v1250_v51   ;;  %v971_v58 = vadd.f32 %v970_v50, %v940_v53  ;;  %v1368_v59 = vadd.f32 %v1367_v55, %v1366_v54  ;;  %v1369_v60 = vpop.f32.mrb[14].mxu0  ;;  %v1416_v1 = vadd.f32 %v1415_v62, %v1414_v57  ;;  %v1417_v2 = vpop.f32.mrb[14].mxu1 }
 0x114   : > { %v1370_v63 = vpop.f32.mrb[15].mxu0  ;;  %1326 = vst [vmem:[%s1683_s15 + $0x50] sm:$0xff] %v1290_v56   ;;  %v1418_v5 = vpop.f32.mrb[15].mxu1 }
 0x115   : > { %v635_v3 = vadd.f32 %v1368_v59, %v1672_v49  ;;  %v1371_v4 = vadd.f32 %v1370_v63, %v1369_v60  ;;  %v1718_v6 = vadd.f32 %v1416_v1, %v1672_v49  ;;  %v1419_v7 = vadd.f32 %v1418_v5, %v1417_v2 }
 0x117   : > { %v902_v8 = vadd.f32 %v901_v52, %v635_v3  ;;  %v941_v9 = vmul.f32 %v635_v3, %v635_v3  ;;  %v638_v10 = vadd.f32 %v1371_v4, %v1672_v49  ;;  %v1722_v11 = vadd.f32 %v1419_v7, %v1672_v49 }
 0x119   : > { %v972_v12 = vadd.f32 %v971_v58, %v941_v9  ;;  %v1255_v13 = vpack.c.bf16 %v638_v10, %v635_v3  ;;  %v903_v14 = vadd.f32 %v902_v8, %v638_v10  ;;  %v942_v15 = vmul.f32 %v638_v10, %v638_v10  ;;  %v1372_v16 = vpop.f32.mrb[16].mxu0  ;;  %v1420_v20 = vpop.f32.mrb[16].mxu1 }
 0x11a   : > { %v1373_v17 = vpop.f32.mrb[17].mxu0  ;;  %v1295_v18 = vpack.c.bf16 %v1722_v11, %v1718_v6  ;;  %v1421_v25 = vpop.f32.mrb[17].mxu1 }
 0x11b   : > { %1319 = vst [vmem:[%s1683_s15 + $0x18] sm:$0xff] %v1255_v13   ;;  %v973_v21 = vadd.f32 %v972_v12, %v942_v15  ;;  %v1374_v22 = vadd.f32 %v1373_v17, %v1372_v16  ;;  %v1375_v23 = vpop.f32.mrb[18].mxu0  ;;  %v1422_v27 = vadd.f32 %v1421_v25, %v1420_v20  ;;  %v1423_v28 = vpop.f32.mrb[18].mxu1 }
 0x11c   : > { %v1376_v26 = vpop.f32.mrb[19].mxu0  ;;  %1327 = vst [vmem:[%s1683_s15 + $0x58] sm:$0xff] %v1295_v18   ;;  %v1424_v31 = vpop.f32.mrb[19].mxu1 }
 0x11d   : > { %v643_v29 = vadd.f32 %v1374_v22, %v1672_v49  ;;  %v1377_v30 = vadd.f32 %v1376_v26, %v1375_v23  ;;  %v1730_v32 = vadd.f32 %v1422_v27, %v1672_v49  ;;  %v1425_v33 = vadd.f32 %v1424_v31, %v1423_v28 }
 0x11f   : > { %v904_v34 = vadd.f32 %v903_v14, %v643_v29  ;;  %v943_v35 = vmul.f32 %v643_v29, %v643_v29  ;;  %v646_v36 = vadd.f32 %v1377_v30, %v1672_v49  ;;  %v1734_v37 = vadd.f32 %v1425_v33, %v1672_v49 }
 0x121   : > { %v974_v38 = vadd.f32 %v973_v21, %v943_v35  ;;  %v1260_v39 = vpack.c.bf16 %v646_v36, %v643_v29  ;;  %v905_v40 = vadd.f32 %v904_v34, %v646_v36  ;;  %v944_v41 = vmul.f32 %v646_v36, %v646_v36  ;;  %v1378_v42 = vpop.f32.mrb[20].mxu0  ;;  %v1426_v46 = vpop.f32.mrb[20].mxu1 }
 0x122   : > { %v1379_v44 = vpop.f32.mrb[21].mxu0  ;;  %v1300_v45 = vpack.c.bf16 %v1734_v37, %v1730_v32  ;;  %v1427_v52 = vpop.f32.mrb[21].mxu1 }
 0x123   : > { %1320 = vst [vmem:[%s1683_s15 + $0x20] sm:$0xff] %v1260_v39   ;;  %v975_v47 = vadd.f32 %v974_v38, %v944_v41  ;;  %v1380_v50 = vadd.f32 %v1379_v44, %v1378_v42  ;;  %v1381_v51 = vpop.f32.mrb[22].mxu0  ;;  %v1428_v54 = vadd.f32 %v1427_v52, %v1426_v46  ;;  %v1429_v55 = vpop.f32.mrb[22].mxu1 }
 0x124   : > { %v1382_v53 = vpop.f32.mrb[23].mxu0  ;;  %1328 = vst [vmem:[%s1683_s15 + $0x60] sm:$0xff] %v1300_v45   ;;  %v1430_v58 = vpop.f32.mrb[23].mxu1 }
 0x125   : > { %v651_v56 = vadd.f32 %v1380_v50, %v1672_v49  ;;  %v1383_v57 = vadd.f32 %v1382_v53, %v1381_v51  ;;  %v1742_v59 = vadd.f32 %v1428_v54, %v1672_v49  ;;  %v1431_v60 = vadd.f32 %v1430_v58, %v1429_v55 }
 0x127   : > { %v906_v62 = vadd.f32 %v905_v40, %v651_v56  ;;  %v945_v63 = vmul.f32 %v651_v56, %v651_v56  ;;  %v654_v1 = vadd.f32 %v1383_v57, %v1672_v49  ;;  %v1746_v2 = vadd.f32 %v1431_v60, %v1672_v49 }
 0x129   : > { %v976_v3 = vadd.f32 %v975_v47, %v945_v63  ;;  %v1265_v4 = vpack.c.bf16 %v654_v1, %v651_v56  ;;  %v907_v5 = vadd.f32 %v906_v62, %v654_v1  ;;  %v946_v7 = vmul.f32 %v654_v1, %v654_v1  ;;  %v1384_v8 = vpop.f32.mrb[24].mxu0  ;;  %v1432_v12 = vpop.f32.mrb[24].mxu1 }
 0x12a   : > { %v1385_v9 = vpop.f32.mrb[25].mxu0  ;;  %v1305_v10 = vpack.c.bf16 %v1746_v2, %v1742_v59  ;;  %v1433_v16 = vpop.f32.mrb[25].mxu1 }
 0x12b   : > { %1321 = vst [vmem:[%s1683_s15 + $0x28] sm:$0xff] %v1265_v4   ;;  %v977_v13 = vadd.f32 %v976_v3, %v946_v7  ;;  %v1386_v14 = vadd.f32 %v1385_v9, %v1384_v8  ;;  %v1387_v15 = vpop.f32.mrb[26].mxu0  ;;  %v1434_v18 = vadd.f32 %v1433_v16, %v1432_v12  ;;  %v1435_v20 = vpop.f32.mrb[26].mxu1  ;;  %v952_v9 = vmul.f32 %v1686_v0, %v1686_v0 }
 0x12c   : > { %v1388_v17 = vpop.f32.mrb[27].mxu0  ;;  %1329 = vst [vmem:[%s1683_s15 + $0x68] sm:$0xff] %v1305_v10   ;;  %v1436_v23 = vpop.f32.mrb[27].mxu1 }
 0x12d   : > { %v659_v21 = vadd.f32 %v1386_v14, %v1672_v49  ;;  %v1389_v22 = vadd.f32 %v1388_v17, %v1387_v15  ;;  %v1754_v25 = vadd.f32 %v1434_v18, %v1672_v49  ;;  %v1437_v26 = vadd.f32 %v1436_v23, %v1435_v20 }
 0x12e   : > { %v954_v15 = vmul.f32 %v1698_v24, %v1698_v24  ;;  %v955_v17 = vmul.f32 %v1706_v43, %v1706_v43 }
 0x12f   : > { %v908_v27 = vadd.f32 %v907_v5, %v659_v21  ;;  %v947_v28 = vmul.f32 %v659_v21, %v659_v21  ;;  %v662_v29 = vadd.f32 %v1389_v22, %v1672_v49  ;;  %v1758_v30 = vadd.f32 %v1437_v26, %v1672_v49 }
 0x130   : > { %v951_v5 = vmul.f32 %v1677_v61, %v1677_v61 }
 0x131   : > { %v978_v31 = vadd.f32 %v977_v13, %v947_v28  ;;  %v1270_v33 = vpack.c.bf16 %v662_v29, %v659_v21  ;;  %v909_v34 = vadd.f32 %v908_v27, %v662_v29  ;;  %v948_v35 = vmul.f32 %v662_v29, %v662_v29  ;;  %v1390_v36 = vpop.f32.mrb[28].mxu0  ;;  %v1438_v40 = vpop.f32.mrb[28].mxu1 }
 0x132   : > { %v1391_v38 = vpop.f32.mrb[29].mxu0  ;;  %v1310_v39 = vpack.c.bf16 %v1758_v30, %v1754_v25  ;;  %v1439_v45 = vpop.f32.mrb[29].mxu1  ;;  %v959_v29 = vmul.f32 %v1730_v32, %v1730_v32 }
 0x133   : > { %1322 = vst [vmem:[%s1683_s15 + $0x30] sm:$0xff] %v1270_v33   ;;  %v979_v41 = vadd.f32 %v978_v31, %v948_v35  ;;  %v1392_v42 = vadd.f32 %v1391_v38, %v1390_v36  ;;  %v1393_v44 = vpop.f32.mrb[30].mxu0  ;;  %v1440_v47 = vadd.f32 %v1439_v45, %v1438_v40  ;;  %v1441_v50 = vpop.f32.mrb[30].mxu1  ;;  %v961_v36 = vmul.f32 %v1742_v59, %v1742_v59 }
 0x134   : > { %v1394_v46 = vpop.f32.mrb[31].mxu0  ;;  %1330 = vst [vmem:[%s1683_s15 + $0x70] sm:$0xff] %v1310_v39   ;;  %v1442_v53 = vpop.f32.mrb[31].mxu1 }
 0x135   : > { %v667_v51 = vadd.f32 %v1392_v42, %v1672_v49  ;;  %v1395_v52 = vadd.f32 %v1394_v46, %v1393_v44  ;;  %v731_v54 = vadd.f32 %v1440_v47, %v1672_v49  ;;  %v1443_v55 = vadd.f32 %v1442_v53, %v1441_v50 }
 0x137   : > { %v910_v56 = vadd.f32 %v909_v34, %v667_v51  ;;  %v949_v57 = vmul.f32 %v667_v51, %v667_v51  ;;  %v670_v58 = vadd.f32 %v1395_v52, %v1672_v49  ;;  %v734_v60 = vadd.f32 %v1443_v55, %v1672_v49 }
 0x138   : > { %v953_v49 = vmul.f32 %v1694_v19, %v1694_v19  ;;  %v960_v34 = vmul.f32 %v1734_v37, %v1734_v37  ;;  %v965_v44 = vmul.f32 %v731_v54, %v731_v54 }
 0x139   : > { %v980_v62 = vadd.f32 %v979_v41, %v949_v57  ;;  %v1275_v63 = vpack.c.bf16 %v670_v58, %v667_v51  ;;  %v911_v1 = vadd.f32 %v910_v56, %v670_v58  ;;  %v950_v3 = vmul.f32 %v670_v58, %v670_v58 }
 0x13a   : > { %v1315_v4 = vpack.c.bf16 %v734_v60, %v731_v54  ;;  %v963_v41 = vmul.f32 %v1754_v25, %v1754_v25  ;;  %v966_v51 = vmul.f32 %v734_v60, %v734_v60 }
 0x13b   : > { %1323 = vst [vmem:[%s1683_s15 + $0x38] sm:$0xff] %v1275_v63   ;;  %v912_v7 = vadd.f32 %v911_v1, %v1677_v61  ;;  %v981_v8 = vadd.f32 %v980_v62, %v950_v3 }
 0x13c   : > { %1331 = vst [vmem:[%s1683_s15 + $0x78] sm:$0xff] %v1315_v4  }
 0x13d   : > { %v913_v10 = vadd.f32 %v912_v7, %v1686_v0  ;;  %v982_v12 = vadd.f32 %v981_v8, %v951_v5  ;;  %v956_v0 = vmul.f32 %v1710_v48, %v1710_v48 }
 0x13f   : > { %v914_v13 = vadd.f32 %v913_v10, %v1694_v19  ;;  %v983_v14 = vadd.f32 %v982_v12, %v952_v9  ;;  %v957_v19 = vmul.f32 %v1718_v6, %v1718_v6 }
 0x141   : > { %v915_v16 = vadd.f32 %v914_v13, %v1698_v24  ;;  %v984_v61 = vadd.f32 %v983_v14, %v953_v49  ;;  %v958_v24 = vmul.f32 %v1722_v11, %v1722_v11 }
 0x143   : > { %v985_v18 = vadd.f32 %v984_v61, %v954_v15  ;;  %v916_v20 = vadd.f32 %v915_v16, %v1706_v43 }
 0x145   : > { %v917_v21 = vadd.f32 %v916_v20, %v1710_v48  ;;  %v986_v22 = vadd.f32 %v985_v18, %v955_v17 }
 0x147   : > { %v918_v23 = vadd.f32 %v917_v21, %v1718_v6  ;;  %v987_v26 = vadd.f32 %v986_v22, %v956_v0 }
 0x149   : > { %v919_v27 = vadd.f32 %v918_v23, %v1722_v11  ;;  %v988_v28 = vadd.f32 %v987_v26, %v957_v19 }
 0x14b   : > { %v920_v43 = vadd.f32 %v919_v27, %v1730_v32  ;;  %v989_v31 = vadd.f32 %v988_v28, %v958_v24  ;;  %v962_v32 = vmul.f32 %v1746_v2, %v1746_v2 }
 0x14d   : > { %v990_v48 = vadd.f32 %v989_v31, %v959_v29  ;;  %v921_v33 = vadd.f32 %v920_v43, %v1734_v37 }
 0x14f   : > { %v991_v6 = vadd.f32 %v990_v48, %v960_v34  ;;  %v922_v35 = vadd.f32 %v921_v33, %v1742_v59  ;;  %v964_v59 = vmul.f32 %v1758_v30, %v1758_v30 }
 0x151   : > { %v992_v11 = vadd.f32 %v991_v6, %v961_v36  ;;  %v923_v38 = vadd.f32 %v922_v35, %v1746_v2 }
 0x153   : > { %v993_v39 = vadd.f32 %v992_v11, %v962_v32  ;;  %v924_v40 = vadd.f32 %v923_v38, %v1754_v25 }
 0x155   : > { %v994_v37 = vadd.f32 %v993_v39, %v963_v41  ;;  %v925_v42 = vadd.f32 %v924_v40, %v1758_v30 }
 0x157   : > { %v995_v45 = vadd.f32 %v994_v37, %v964_v59  ;;  %v926_v46 = vadd.f32 %v925_v42, %v731_v54 }
 0x159   : > { %v996_v47 = vadd.f32 %v995_v45, %v965_v44  ;;  %v927_v50 = vadd.f32 %v926_v46, %v734_v60 }
 0x15b   : > { %v928_v2 = vrot.slane %v927_v50, 4  ;;  %v997_v52 = vadd.f32 %v996_v47, %v966_v51 }
 0x15d   : > { %v929_v53 = vadd.f32 %v928_v2, %v927_v50  ;;  %v998_v55 = vrot.slane %v997_v52, 4 }
 0x15f   : > { %v930_v56 = vrot.slane %v929_v53, 2  ;;  %v999_v25 = vadd.f32 %v998_v55, %v997_v52 }
 0x161   : > { %v931_v57 = vadd.f32 %v930_v56, %v929_v53  ;;  %v1000_v58 = vrot.slane %v999_v25, 2 }
 0x163   : > { %v932_v62 = vrot.slane %v931_v57, 1  ;;  %v1001_v63 = vadd.f32 %v1000_v58, %v999_v25 }
 0x165   : > { %v933_v30 = vadd.f32 %v932_v62, %v931_v57  ;;  %v1002_v54 = vrot.slane %v1001_v63, 1 }
 0x167   : > { %934 = vst [vmem:[%s244_s17] sm:$0x1] %v933_v30  ;;  %v1003_v60 = vadd.f32 %v1002_v54, %v1001_v63 }
 0x169   : > { %1004 = vst [vmem:[%s247_s23] sm:$0x1] %v1003_v60 }
 0x16a PF: > { %s16_s18 = sadd.s32 1, %s1538_s18  }
 0x16b   : > { %p13_p5 = scmp.ge.s32.totalorder %s16_s18, 4  }
 0x16d   :  { %15 = sbr.rel (!%p13_p5) target bundleno = 1 (0x1), region = 86 }

// kernel: discriminator_forward.20
= control target key start
LH: loop header
LB: loop body
LE: loop exit
PB: predicated region body
PF: predicated region fallthrough
CT: control target
= control target key end

     0   :  { %s447_s12 = smov 0   ;;  %s477_s0 = inlined_call_operand.vmem [shape: bf16[128,128], index: 0, kind: input, shape index: {}]   ;;  %s478_s1 = inlined_call_operand.vmem [shape: f32[1,128], index: 1, kind: input, shape index: {}]   ;;  %s479_s2 = inlined_call_operand.vmem [shape: f32[1,128], index: 2, kind: input, shape index: {}]   ;;  %s480_s3 = inlined_call_operand.vmem [shape: bf16[128,128], index: 3, kind: output, shape index: {}]  }
   0x1 LB: > { %s340_s13 = sadd.s32 4294967295, %s425_s12   ;;  %p344_p0 = scmp.ge.s32.totalorder %s425_s12, 1  ;;  %s425_s12 = sphi %s447_s12, %s13_s12  }
   0x2   : > { %p138_p1 = scmp.lt.s32.totalorder %s425_s12, 3 }
   0x4   : > { %p139_p2 = pnand %p344_p0, %p138_p1 }
   0x5   : > { %s345_s14 = sshll.u32 (!%p139_p2), %s340_s13, 3  ;;  %v349_v0 = vld [vmem:[%s478_s1] ss:$0 sm:$0xff] (!%p139_p2) }
   0x6   : > { %142 = sbr.rel (%p139_p2) target bundleno = 34 (0x22), region = 32  ;;  %p163_p3 = scmp.lt.s32.totalorder (!%p139_p2), %s345_s14, 15  ;;  %v350_v13 = vld [vmem:[%s479_s2] ss:$0 sm:$0xff] (!%p139_p2) }
   0xd   : > { %s482_s14 = smov (!%p163_p3, %s345_s14), 15 }
   0xe   : > { %s346_s15 = sshll.u32 %s482_s14, 2 }
   0xf   : > { %s166_s18 = scalar_lea.vmem %s477_s0, %s346_s15  ;;  %s172_s25 = scalar_lea.vmem %s480_s3, %s346_s15 }
  0x10   : > { %v370_v1 = vld [vmem:[%s166_s18] sm:$0xff]   ;;  %v405_v2 = vld [vmem:[%s166_s18 + $0x8] sm:$0xff]   ;;  %v406_v3 = vld [vmem:[%s166_s18 + $0x10] sm:$0xff]  }
  0x11   : > { %v371_v4 = vunpack.c.l.bf16 %v370_v1  ;;  %v372_v5 = vunpack.c.h.bf16 %v370_v1  ;;  %v375_v6 = vunpack.c.l.bf16 %v405_v2  ;;  %v376_v7 = vunpack.c.h.bf16 %v405_v2  ;;  %v407_v8 = vld [vmem:[%s166_s18 + $0x18] sm:$0xff]  }
  0x12   : > { %v379_v9 = vunpack.c.l.bf16 %v406_v3  ;;  %v380_v10 = vunpack.c.h.bf16 %v406_v3  ;;  %v383_v11 = vunpack.c.l.bf16 %v407_v8  ;;  %v384_v12 = vunpack.c.h.bf16 %v407_v8 }
  0x13   : > { %v197_v14 = vmul.f32 %v371_v4, %v349_v0  ;;  %v198_v15 = vmul.f32 %v372_v5, %v349_v0  ;;  %v199_v16 = vmul.f32 %v375_v6, %v349_v0  ;;  %v200_v17 = vmul.f32 %v376_v7, %v349_v0 }
  0x14   : > { %v201_v18 = vmul.f32 %v379_v9, %v349_v0  ;;  %v202_v19 = vmul.f32 %v380_v10, %v349_v0  ;;  %v203_v20 = vmul.f32 %v383_v11, %v349_v0  ;;  %v204_v21 = vmul.f32 %v384_v12, %v349_v0 }
  0x15   : > { %v212_v22 = vadd.f32 %v350_v13, %v197_v14  ;;  %v213_v23 = vadd.f32 %v350_v13, %v198_v15  ;;  %v214_v24 = vadd.f32 %v350_v13, %v199_v16  ;;  %v215_v25 = vadd.f32 %v350_v13, %v200_v17 }
  0x16   : > { %v216_v26 = vadd.f32 %v350_v13, %v201_v18  ;;  %v217_v27 = vadd.f32 %v350_v13, %v202_v19  ;;  %v218_v28 = vadd.f32 %v350_v13, %v203_v20  ;;  %v219_v29 = vadd.f32 %v350_v13, %v204_v21 }
  0x17   : > { %vm220_vm0 = vcmp.ge.f32.partialorder %v212_v22, 0.0  ;;  %vm221_vm1 = vcmp.ge.f32.partialorder %v213_v23, 0.0  ;;  %v228_v30 = vmul.f32 0.2, %v212_v22  ;;  %v229_v31 = vmul.f32 0.2, %v213_v23 }
  0x18   : > { %vm222_vm2 = vcmp.ge.f32.partialorder %v214_v24, 0.0  ;;  %vm223_vm3 = vcmp.ge.f32.partialorder %v215_v25, 0.0  ;;  %v230_v32 = vmul.f32 0.2, %v214_v24  ;;  %v231_v33 = vmul.f32 0.2, %v215_v25 }
  0x19   : > { %v236_v34 = vsel %vm220_vm0, %v212_v22, %v228_v30  ;;  %v237_v35 = vsel %vm221_vm1, %v213_v23, %v229_v31  ;;  %vm224_vm4 = vcmp.ge.f32.partialorder %v216_v26, 0.0  ;;  %vm225_vm5 = vcmp.ge.f32.partialorder %v217_v27, 0.0 }
  0x1a   : > { %v388_v36 = vpack.c.bf16 %v237_v35, %v236_v34  ;;  %v238_v37 = vsel %vm222_vm2, %v214_v24, %v230_v32  ;;  %v239_v38 = vsel %vm223_vm3, %v215_v25, %v231_v33  ;;  %v232_v39 = vmul.f32 0.2, %v216_v26 }
  0x1b   : > { %v393_v40 = vpack.c.bf16 %v239_v38, %v238_v37  ;;  %v233_v41 = vmul.f32 0.2, %v217_v27  ;;  %vm226_vm6 = vcmp.ge.f32.partialorder %v218_v28, 0.0  ;;  %vm227_vm7 = vcmp.ge.f32.partialorder %v219_v29, 0.0 }
  0x1c   : > { %389 = vst [vmem:[%s172_s25] sm:$0xff] %v388_v36   ;;  %v240_v42 = vsel %vm224_vm4, %v216_v26, %v232_v39  ;;  %v234_v43 = vmul.f32 0.2, %v218_v28  ;;  %v235_v44 = vmul.f32 0.2, %v219_v29 }
  0x1d   : > { %408 = vst [vmem:[%s172_s25 + $0x8] sm:$0xff] %v393_v40   ;;  %v241_v45 = vsel %vm225_vm5, %v217_v27, %v233_v41 }
  0x1e   : > { %v398_v46 = vpack.c.bf16 %v241_v45, %v240_v42  ;;  %v242_v47 = vsel %vm226_vm6, %v218_v28, %v234_v43  ;;  %v243_v48 = vsel %vm227_vm7, %v219_v29, %v235_v44 }
  0x1f   : > { %v403_v49 = vpack.c.bf16 %v243_v48, %v242_v47 }
  0x20   : > { %409 = vst [vmem:[%s172_s25 + $0x10] sm:$0xff] %v398_v46  }
  0x21   : > { %410 = vst [vmem:[%s172_s25 + $0x18] sm:$0xff] %v403_v49  }
  0x22 PF: > { %s13_s12 = sadd.s32 1, %s425_s12  }
  0x23   : > { %p10_p4 = scmp.ge.s32.totalorder %s13_s12, 4  }
  0x25   :  { %12 = sbr.rel (!%p10_p4) target bundleno = 1 (0x1), region = 62 }

// kernel: discriminator_forward.19
= control target key start
LH: loop header
LB: loop body
LE: loop exit
PB: predicated region body
PF: predicated region fallthrough
CT: control target
= control target key end

     0   :  { %s886_s18 = smov 0   ;;  %s985_s0 = inlined_call_operand.vmem [shape: bf16[128,256], index: 0, kind: input, shape index: {}]   ;;  %s986_s1 = inlined_call_operand.vmem [shape: bf16[256,128], index: 1, kind: input, shape index: {}]   ;;  %s987_s2 = inlined_call_operand.vmem [shape: f32[1,128], index: 2, kind: input, shape index: {}]   ;;  %s988_s3 = inlined_call_operand.vmem [shape: bf16[128,128], index: 3, kind: output, shape index: {0}]   ;;  %s989_s4 = inlined_call_operand.vmem [shape: f32[2,1,128], index: 4, kind: output, shape index: {1}]   ;;  %s990_s5 = inlined_call_operand.vmem [shape: f32[2,1,128], index: 5, kind: output, shape index: {2}]  }
   0x1 LB: > { %s892_s19 = sadd.s32 4294967295, %s854_s18   ;;  %p683_p0 = scmp.ge.s32.totalorder %s854_s18, 1  ;;  %s854_s18 = sphi %s886_s18, %s16_s18  }
   0x2   : > { %p194_p1 = scmp.lt.s32.totalorder %s854_s18, 3 }
   0x4   : > { %p195_p2 = pnand %p683_p0, %p194_p1 }
   0x5   : > { %v820_v0 = vld [vmem:[%s986_s1 + $0x40] sm:$0xff] (!%p195_p2)   ;;  %s684_s22 = sshll.u32 (!%p195_p2), %s892_s19, 3  ;;  %v822_v2 = vld [vmem:[%s986_s1 + $0x48] sm:$0xff] (!%p195_p2)   ;;  %v824_v4 = vld [vmem:[%s986_s1 + $0x50] sm:$0xff] (!%p195_p2)   ;;  %p242_p4 = scmp.lt.s32.totalorder (!%p195_p2), %s892_s19, 1 }
   0x6   : > { %198 = sbr.rel (%p195_p2) target bundleno = 290 (0x122), region = 32  ;;  %v821_v1 = vld [vmem:[%s986_s1] sm:$0xff] (!%p195_p2)   ;;  %756 = vmatprep.subr.bf16.mxu0 (!%p195_p2), %v820_v0  ;;  %796 = vmatprep.subr.bf16.mxu1 (!%p195_p2), %v820_v0  ;;  %v823_v3 = vld [vmem:[%s986_s1 + $0x8] sm:$0xff] (!%p195_p2)   ;;  %p230_p3 = scmp.lt.s32.totalorder (!%p195_p2), %s684_s22, 15  ;;  %v825_v5 = vld [vmem:[%s986_s1 + $0x10] sm:$0xff] (!%p195_p2)  }
   0x7   : > { %757 = vmatpush3.bf16.msra.mxu0 (!%p195_p2), %v821_v1  ;;  %804 = vmatpush3.bf16.msra.mxu1 (!%p195_p2), %v821_v1  ;;  %v826_v6 = vld [vmem:[%s986_s1 + $0x58] sm:$0xff] (!%p195_p2)   ;;  %v828_v8 = vld [vmem:[%s986_s1 + $0x60] sm:$0xff] (!%p195_p2)   ;;  %v830_v10 = vld [vmem:[%s986_s1 + $0x68] sm:$0xff] (!%p195_p2)  }
   0x8   : > { %758 = vmatprep.subr.bf16.mxu0 (!%p195_p2), %v822_v2  ;;  %797 = vmatprep.subr.bf16.mxu1 (!%p195_p2), %v822_v2  ;;  %v827_v7 = vld [vmem:[%s986_s1 + $0x18] sm:$0xff] (!%p195_p2)   ;;  %v829_v9 = vld [vmem:[%s986_s1 + $0x20] sm:$0xff] (!%p195_p2)   ;;  %v831_v13 = vld [vmem:[%s986_s1 + $0x28] sm:$0xff] (!%p195_p2)  }
   0x9   : > { %v832_v14 = vld [vmem:[%s986_s1 + $0x70] sm:$0xff] (!%p195_p2)   ;;  %v834_v16 = vld [vmem:[%s986_s1 + $0x78] sm:$0xff] (!%p195_p2)   ;;  %v689_v26 = vld [vmem:[%s987_s2] ss:$0 sm:$0xff] (!%p195_p2) }
   0xa   : > { %v833_v15 = vld [vmem:[%s986_s1 + $0x30] sm:$0xff] (!%p195_p2)   ;;  %v835_v17 = vld [vmem:[%s986_s1 + $0x38] sm:$0xff] (!%p195_p2)  }
   0xb   : > { %759 = vmatpush3.bf16.msra.mxu0 (!%p195_p2), %v823_v3  ;;  %805 = vmatpush3.bf16.msra.mxu1 (!%p195_p2), %v823_v3 }
   0xc   : > { %760 = vmatprep.subr.bf16.mxu0 (!%p195_p2), %v824_v4  ;;  %798 = vmatprep.subr.bf16.mxu1 (!%p195_p2), %v824_v4 }
   0xd   : > { %s992_s22 = smov (!%p230_p3, %s684_s22), 15  ;;  %s994_s19 = smov (!%p242_p4, %s892_s19), 1 }
   0xe   : > { %s724_s12 = sshll.u32 %s992_s22, 3  ;;  %s247_s23 = scalar_lea.vmem %s990_s5, %s994_s19 }
   0xf   : > { %761 = vmatpush3.bf16.msra.mxu0 %v825_v5  ;;  %806 = vmatpush3.bf16.msra.mxu1 %v825_v5  ;;  %s930_s17 = scalar_lea.vmem %s985_s0, %s724_s12  ;;  %s688_s12 = sshll.u32 %s992_s22, 2 }
  0x10   : > { %762 = vmatprep.subr.bf16.mxu0 %v826_v6  ;;  %799 = vmatprep.subr.bf16.mxu1 %v826_v6  ;;  %v838_v11 = vld [vmem:[%s930_s17 + $0x4] ss:$8 sps:$4 sm:$0xff]   ;;  %v836_v18 = vld [vmem:[%s930_s17] ss:$8 sps:$4 sm:$0xff]   ;;  %v842_v20 = vld [vmem:[%s930_s17 + $0x14] ss:$8 sps:$4 sm:$0xff]   ;;  %s968_s15 = scalar_lea.vmem %s988_s3, %s688_s12 }
  0x11   : > { %v841_v12 = vld [vmem:[%s930_s17 + $0x24] ss:$8 sps:$4 sm:$0xff]   ;;  %464 = vmatprep.mubr.bf16.mxu0 %v838_v11  ;;  %v839_v19 = vld [vmem:[%s930_s17 + $0x20] ss:$8 sps:$4 sm:$0xff]   ;;  %v845_v21 = vld [vmem:[%s930_s17 + $0x34] ss:$8 sps:$4 sm:$0xff]  }
  0x12   : > { %480 = vmatprep.mubr.bf16.mxu1 %v841_v12  ;;  %v844_v22 = vld [vmem:[%s930_s17 + $0x10] ss:$8 sps:$4 sm:$0xff]  }
  0x13   : > { %763 = vmatpush3.bf16.msra.mxu0 %v827_v7  ;;  %807 = vmatpush3.bf16.msra.mxu1 %v827_v7  ;;  %v847_v23 = vld [vmem:[%s930_s17 + $0x30] ss:$8 sps:$4 sm:$0xff]   ;;  %s244_s17 = scalar_lea.vmem %s989_s4, %s994_s19 }
  0x14   : > { %764 = vmatprep.subr.bf16.mxu0 %v828_v8  ;;  %800 = vmatprep.subr.bf16.mxu1 %v828_v8 }
  0x17   : > { %765 = vmatpush3.bf16.msra.mxu0 %v829_v9  ;;  %808 = vmatpush3.bf16.msra.mxu1 %v829_v9 }
  0x18   : > { %766 = vmatprep.subr.bf16.mxu0 %v830_v10  ;;  %801 = vmatprep.subr.bf16.mxu1 %v830_v10 }
  0x1b   : > { %767 = vmatpush3.bf16.msra.mxu0 %v831_v13  ;;  %809 = vmatpush3.bf16.msra.mxu1 %v831_v13 }
  0x1c   : > { %768 = vmatprep.subr.bf16.mxu0 %v832_v14  ;;  %802 = vmatprep.subr.bf16.mxu1 %v832_v14 }
  0x1f   : > { %769 = vmatpush3.bf16.msra.mxu0 %v833_v15  ;;  %810 = vmatpush3.bf16.msra.mxu1 %v833_v15 }
  0x20   : > { %770 = vmatprep.subr.bf16.mxu0 %v834_v16  ;;  %803 = vmatprep.subr.bf16.mxu1 %v834_v16 }
  0x23   : > { %771 = vmatpush3.bf16.msra.mxu0 %v835_v17  ;;  %811 = vmatpush3.bf16.msra.mxu1 %v835_v17 }
  0x26   : > { %465 = vmatmul.mubr.bf16.vlgmr.msra.gmra.mrb[0].mxu0 %v836_v18  ;;  %481 = vmatmul.mubr.bf16.vlgmr.msra.gmra.mrb[0].mxu1 %v839_v19 }
  0x27   : > { %472 = vmatprep.mubr.bf16.mxu0 %v842_v20  ;;  %488 = vmatprep.mubr.bf16.mxu1 %v845_v21 }
  0x2e   : > { %473 = vmatmul.mubr.bf16.gmra.mrb[4].mxu0 %v844_v22  ;;  %489 = vmatmul.mubr.bf16.gmra.mrb[4].mxu1 %v847_v23 }
  0xf9   : > { %v772_v24 = vpop.f32.mrb[0].mxu0  ;;  %v784_v25 = vpop.f32.mrb[0].mxu1 }
  0xfa   : > { %v773_v27 = vpop.f32.mrb[1].mxu0  ;;  %v785_v28 = vpop.f32.mrb[1].mxu1 }
  0xfb   : > { %v774_v29 = vadd.f32 %v773_v27, %v772_v24  ;;  %v775_v30 = vpop.f32.mrb[2].mxu0  ;;  %v786_v31 = vadd.f32 %v785_v28, %v784_v25  ;;  %v787_v32 = vpop.f32.mrb[2].mxu1 }
  0xfc   : > { %v776_v33 = vpop.f32.mrb[3].mxu0  ;;  %v788_v34 = vpop.f32.mrb[3].mxu1 }
  0xfd   : > { %v467_v35 = vadd.f32 %v774_v29, %v689_v26  ;;  %v777_v36 = vadd.f32 %v776_v33, %v775_v30  ;;  %v483_v37 = vadd.f32 %v786_v31, %v689_v26  ;;  %v789_v38 = vadd.f32 %v788_v34, %v787_v32 }
  0xff   : > { %v470_v39 = vadd.f32 %v777_v36, %v689_v26  ;;  %v486_v40 = vadd.f32 %v789_v38, %v689_v26  ;;  %v551_v41 = vmul.f32 %v467_v35, %v467_v35  ;;  %v555_v6 = vmul.f32 %v483_v37, %v483_v37 }
 0x101   : > { %v736_v42 = vpack.c.bf16 %v470_v39, %v467_v35  ;;  %v537_v43 = vadd.f32 %v470_v39, %v467_v35  ;;  %v552_v44 = vmul.f32 %v470_v39, %v470_v39  ;;  %v778_v45 = vpop.f32.mrb[4].mxu0  ;;  %v746_v46 = vpack.c.bf16 %v486_v40, %v483_v37  ;;  %v790_v47 = vpop.f32.mrb[4].mxu1 }
 0x102   : > { %v779_v48 = vpop.f32.mrb[5].mxu0  ;;  %v791_v49 = vpop.f32.mrb[5].mxu1  ;;  %v556_v9 = vmul.f32 %v486_v40, %v486_v40 }
 0x103   : > { %737 = vst [vmem:[%s968_s15] sm:$0xff] %v736_v42   ;;  %v559_v50 = vadd.f32 %v552_v44, %v551_v41  ;;  %754 = vst [vmem:[%s968_s15 + $0x10] sm:$0xff] %v746_v46   ;;  %v780_v51 = vadd.f32 %v779_v48, %v778_v45  ;;  %v781_v52 = vpop.f32.mrb[6].mxu0  ;;  %v792_v53 = vadd.f32 %v791_v49, %v790_v47  ;;  %v793_v54 = vpop.f32.mrb[6].mxu1 }
 0x104   : > { %v782_v55 = vpop.f32.mrb[7].mxu0  ;;  %v794_v56 = vpop.f32.mrb[7].mxu1 }
 0x105   : > { %v475_v57 = vadd.f32 %v780_v51, %v689_v26  ;;  %v783_v58 = vadd.f32 %v782_v55, %v781_v52  ;;  %v795_v59 = vadd.f32 %v794_v56, %v793_v54  ;;  %v491_v60 = vadd.f32 %v792_v53, %v689_v26 }
 0x107   : > { %v538_v61 = vadd.f32 %v537_v43, %v475_v57  ;;  %v553_v62 = vmul.f32 %v475_v57, %v475_v57  ;;  %v478_v63 = vadd.f32 %v783_v58, %v689_v26  ;;  %v494_v0 = vadd.f32 %v795_v59, %v689_v26 }
 0x108   : > { %v557_v12 = vmul.f32 %v491_v60, %v491_v60 }
 0x109   : > { %v560_v1 = vadd.f32 %v559_v50, %v553_v62  ;;  %v741_v2 = vpack.c.bf16 %v478_v63, %v475_v57  ;;  %v539_v3 = vadd.f32 %v538_v61, %v478_v63  ;;  %v554_v4 = vmul.f32 %v478_v63, %v478_v63 }
 0x10a   : > { %v751_v5 = vpack.c.bf16 %v494_v0, %v491_v60  ;;  %v558_v17 = vmul.f32 %v494_v0, %v494_v0 }
 0x10b   : > { %753 = vst [vmem:[%s968_s15 + $0x8] sm:$0xff] %v741_v2   ;;  %v540_v7 = vadd.f32 %v539_v3, %v483_v37  ;;  %v561_v8 = vadd.f32 %v560_v1, %v554_v4 }
 0x10c   : > { %755 = vst [vmem:[%s968_s15 + $0x18] sm:$0xff] %v751_v5  }
 0x10d   : > { %v562_v10 = vadd.f32 %v561_v8, %v555_v6  ;;  %v541_v11 = vadd.f32 %v540_v7, %v486_v40 }
 0x10f   : > { %v542_v13 = vadd.f32 %v541_v11, %v491_v60  ;;  %v563_v14 = vadd.f32 %v562_v10, %v556_v9 }
 0x111   : > { %v564_v15 = vadd.f32 %v563_v14, %v557_v12  ;;  %v543_v16 = vadd.f32 %v542_v13, %v494_v0 }
 0x113   : > { %v544_v18 = vrot.slane %v543_v16, 4  ;;  %v565_v19 = vadd.f32 %v564_v15, %v558_v17 }
 0x115   : > { %v545_v20 = vadd.f32 %v544_v18, %v543_v16  ;;  %v566_v21 = vrot.slane %v565_v19, 4 }
 0x117   : > { %v546_v22 = vrot.slane %v545_v20, 2  ;;  %v567_v23 = vadd.f32 %v566_v21, %v565_v19 }
 0x119   : > { %v547_v24 = vadd.f32 %v546_v22, %v545_v20  ;;  %v568_v25 = vrot.slane %v567_v23, 2 }
 0x11b   : > { %v548_v26 = vrot.slane %v547_v24, 1  ;;  %v569_v27 = vadd.f32 %v568_v25, %v567_v23 }
 0x11d   : > { %v549_v28 = vadd.f32 %v548_v26, %v547_v24  ;;  %v570_v29 = vrot.slane %v569_v27, 1 }
 0x11f   : > { %550 = vst [vmem:[%s244_s17] sm:$0x1] %v549_v28  ;;  %v571_v30 = vadd.f32 %v570_v29, %v569_v27 }
 0x121   : > { %572 = vst [vmem:[%s247_s23] sm:$0x1] %v571_v30 }
 0x122 PF: > { %s16_s18 = sadd.s32 1, %s854_s18  }
 0x123   : > { %p13_p5 = scmp.ge.s32.totalorder %s16_s18, 4  }
 0x125   :  { %15 = sbr.rel (!%p13_p5) target bundleno = 1 (0x1), region = 86 }

// kernel: discriminator_forward.21
= control target key start
LH: loop header
LB: loop body
LE: loop exit
PB: predicated region body
PF: predicated region fallthrough
CT: control target
= control target key end

     0   :  { %s1090_s18 = smov 0   ;;  %s1227_s0 = inlined_call_operand.vmem [shape: bf16[128,384], index: 0, kind: input, shape index: {}]   ;;  %s1228_s1 = inlined_call_operand.vmem [shape: bf16[384,128], index: 1, kind: input, shape index: {}]   ;;  %s1229_s2 = inlined_call_operand.vmem [shape: f32[1,128], index: 2, kind: input, shape index: {}]   ;;  %s1230_s3 = inlined_call_operand.vmem [shape: bf16[128,128], index: 3, kind: output, shape index: {0}]   ;;  %s1231_s4 = inlined_call_operand.vmem [shape: f32[2,1,128], index: 4, kind: output, shape index: {1}]   ;;  %s1232_s5 = inlined_call_operand.vmem [shape: f32[2,1,128], index: 5, kind: output, shape index: {2}]  }
   0x1 LB: > { %s1096_s19 = sadd.s32 4294967295, %s1058_s18   ;;  %p844_p0 = scmp.ge.s32.totalorder %s1058_s18, 1  ;;  %s1058_s18 = sphi %s1090_s18, %s16_s18  }
   0x2   : > { %p194_p1 = scmp.lt.s32.totalorder %s1058_s18, 3 }
   0x4   : > { %p195_p2 = pnand %p844_p0, %p194_p1 }
   0x5   : > { %v1012_v0 = vld [vmem:[%s1228_s1 + $0x40] sm:$0xff] (!%p195_p2)   ;;  %v1014_v2 = vld [vmem:[%s1228_s1 + $0x48] sm:$0xff] (!%p195_p2)   ;;  %v1017_v5 = vld [vmem:[%s1228_s1 + $0x50] sm:$0xff] (!%p195_p2)   ;;  %s845_s9 = sshll.u32 (!%p195_p2), %s1096_s19, 3  ;;  %p242_p4 = scmp.lt.s32.totalorder (!%p195_p2), %s1096_s19, 1 }
   0x6   : > { %198 = sbr.rel (%p195_p2) target bundleno = 301 (0x12d), region = 32  ;;  %v1013_v1 = vld [vmem:[%s1228_s1] sm:$0xff] (!%p195_p2)   ;;  %927 = vmatprep.subr.bf16.mxu0 (!%p195_p2), %v1012_v0  ;;  %v1016_v4 = vld [vmem:[%s1228_s1 + $0x8] sm:$0xff] (!%p195_p2)   ;;  %v1019_v7 = vld [vmem:[%s1228_s1 + $0x10] sm:$0xff] (!%p195_p2)   ;;  %p230_p3 = scmp.lt.s32.totalorder (!%p195_p2), %s845_s9, 15 }
   0x7   : > { %928 = vmatpush3.bf16.msra.mxu0 (!%p195_p2), %v1013_v1  ;;  %v1015_v3 = vld [vmem:[%s1228_s1 + $0x80] sm:$0xff] (!%p195_p2)   ;;  %v1018_v6 = vld [vmem:[%s1228_s1 + $0x88] sm:$0xff] (!%p195_p2)   ;;  %v1020_v8 = vld [vmem:[%s1228_s1 + $0x58] sm:$0xff] (!%p195_p2)  }
   0x8   : > { %929 = vmatprep.subr.bf16.mxu0 (!%p195_p2), %v1014_v2  ;;  %979 = vmatprep.subr.bf16.mxu1 (!%p195_p2), %v1015_v3  ;;  %v1021_v9 = vld [vmem:[%s1228_s1 + $0x90] sm:$0xff] (!%p195_p2)   ;;  %v1022_v10 = vld [vmem:[%s1228_s1 + $0x18] sm:$0xff] (!%p195_p2)   ;;  %v1023_v11 = vld [vmem:[%s1228_s1 + $0x60] sm:$0xff] (!%p195_p2)  }
   0x9   : > { %980 = vmatpush3.bf16.msra.mxu1 (!%p195_p2), %v1015_v3  ;;  %v1024_v12 = vld [vmem:[%s1228_s1 + $0x98] sm:$0xff] (!%p195_p2)   ;;  %v1025_v13 = vld [vmem:[%s1228_s1 + $0x20] sm:$0xff] (!%p195_p2)   ;;  %v1026_v15 = vld [vmem:[%s1228_s1 + $0x68] sm:$0xff] (!%p195_p2)  }
   0xa   : > { %981 = vmatprep.subr.bf16.mxu1 (!%p195_p2), %v1018_v6  ;;  %v1027_v14 = vld [vmem:[%s1228_s1 + $0xa0] sm:$0xff] (!%p195_p2)   ;;  %v1028_v16 = vld [vmem:[%s1228_s1 + $0x28] sm:$0xff] (!%p195_p2)   ;;  %v1029_v18 = vld [vmem:[%s1228_s1 + $0x70] sm:$0xff] (!%p195_p2)  }
   0xb   : > { %930 = vmatpush3.bf16.msra.mxu0 (!%p195_p2), %v1016_v4  ;;  %v1030_v17 = vld [vmem:[%s1228_s1 + $0xa8] sm:$0xff] (!%p195_p2)   ;;  %v1031_v19 = vld [vmem:[%s1228_s1 + $0x30] sm:$0xff] (!%p195_p2)   ;;  %v1032_v20 = vld [vmem:[%s1228_s1 + $0x78] sm:$0xff] (!%p195_p2)  }
   0xc   : > { %931 = vmatprep.subr.bf16.mxu0 (!%p195_p2), %v1017_v5  ;;  %v1033_v21 = vld [vmem:[%s1228_s1 + $0xb0] sm:$0xff] (!%p195_p2)   ;;  %v1034_v23 = vld [vmem:[%s1228_s1 + $0x38] sm:$0xff] (!%p195_p2)   ;;  %v1196_v38 = vld [vmem:[%s1229_s2] ss:$0 sm:$0xff] (!%p195_p2) }
   0xd   : > { %982 = vmatpush3.bf16.msra.mxu1 %v1018_v6  ;;  %s1234_s9 = smov (!%p230_p3, %s845_s9), 15  ;;  %v1038_v25 = vld [vmem:[%s1228_s1 + $0xb8] sm:$0xff]   ;;  %s1236_s19 = smov (!%p242_p4, %s1096_s19), 1 }
   0xe   : > { %983 = vmatprep.subr.bf16.mxu1 %v1021_v9  ;;  %s1003_s30 = smul.u32 12, %s1234_s9  ;;  %s244_s11 = scalar_lea.vmem %s1231_s4, %s1236_s19 }
   0xf   : > { %932 = vmatpush3.bf16.msra.mxu0 %v1019_v7  ;;  %s247_s14 = scalar_lea.vmem %s1232_s5, %s1236_s19 }
  0x10   : > { %933 = vmatprep.subr.bf16.mxu0 %v1020_v8  ;;  %s1167_s17 = scalar_lea.vmem %s1227_s0, %s1003_s30  ;;  %s848_s30 = sshll.u32 %s1234_s9, 2 }
  0x11   : > { %984 = vmatpush3.bf16.msra.mxu1 %v1021_v9  ;;  %v1037_v22 = vld [vmem:[%s1167_s17 + $0x4] ss:$12 sps:$4 sm:$0xff]   ;;  %v1039_v24 = vld [vmem:[%s1167_s17 + $0x8] ss:$12 sps:$4 sm:$0xff]   ;;  %v1035_v26 = vld [vmem:[%s1167_s17] ss:$12 sps:$4 sm:$0xff]   ;;  %s1204_s8 = scalar_lea.vmem %s1230_s3, %s848_s30 }
  0x12   : > { %985 = vmatprep.subr.bf16.mxu1 %v1024_v12  ;;  %560 = vmatprep.mubr.bf16.mxu0 %v1037_v22  ;;  %v1041_v27 = vld [vmem:[%s1167_s17 + $0x1c] ss:$12 sps:$4 sm:$0xff]   ;;  %v1040_v28 = vld [vmem:[%s1167_s17 + $0x20] ss:$12 sps:$4 sm:$0xff]   ;;  %v1047_v29 = vld [vmem:[%s1167_s17 + $0x38] ss:$12 sps:$4 sm:$0xff]  }
  0x13   : > { %934 = vmatpush3.bf16.msra.mxu0 %v1022_v10  ;;  %995 = vmatprep.mubr.bf16.mxu1 %v1039_v24  ;;  %v1043_v30 = vld [vmem:[%s1167_s17 + $0x18] ss:$12 sps:$4 sm:$0xff]   ;;  %v1044_v31 = vld [vmem:[%s1167_s17 + $0x34] ss:$12 sps:$4 sm:$0xff]   ;;  %v1048_v32 = vld [vmem:[%s1167_s17 + $0x50] ss:$12 sps:$4 sm:$0xff]  }
  0x14   : > { %935 = vmatprep.subr.bf16.mxu0 %v1023_v11  ;;  %v1046_v33 = vld [vmem:[%s1167_s17 + $0x30] ss:$12 sps:$4 sm:$0xff]   ;;  %v1049_v34 = vld [vmem:[%s1167_s17 + $0x4c] ss:$12 sps:$4 sm:$0xff]   ;;  %v1051_v35 = vld [vmem:[%s1167_s17 + $0x48] ss:$12 sps:$4 sm:$0xff]  }
  0x15   : > { %986 = vmatpush3.bf16.msra.mxu1 %v1024_v12 }
  0x16   : > { %987 = vmatprep.subr.bf16.mxu1 %v1027_v14 }
  0x17   : > { %936 = vmatpush3.bf16.msra.mxu0 %v1025_v13 }
  0x18   : > { %937 = vmatprep.subr.bf16.mxu0 %v1026_v15 }
  0x19   : > { %988 = vmatpush3.bf16.msra.mxu1 %v1027_v14 }
  0x1a   : > { %989 = vmatprep.subr.bf16.mxu1 %v1030_v17 }
  0x1b   : > { %938 = vmatpush3.bf16.msra.mxu0 %v1028_v16 }
  0x1c   : > { %939 = vmatprep.subr.bf16.mxu0 %v1029_v18 }
  0x1d   : > { %990 = vmatpush3.bf16.msra.mxu1 %v1030_v17 }
  0x1e   : > { %991 = vmatprep.subr.bf16.mxu1 %v1033_v21 }
  0x1f   : > { %940 = vmatpush3.bf16.msra.mxu0 %v1031_v19 }
  0x20   : > { %941 = vmatprep.subr.bf16.mxu0 %v1032_v20 }
  0x21   : > { %992 = vmatpush3.bf16.msra.mxu1 %v1033_v21 }
  0x22   : > { %993 = vmatprep.subr.bf16.mxu1 %v1038_v25 }
  0x23   : > { %942 = vmatpush3.bf16.msra.mxu0 %v1034_v23 }
  0x25   : > { %994 = vmatpush3.bf16.msra.mxu1 %v1038_v25 }
  0x26   : > { %561 = vmatmul.mubr.bf16.vlgmr.msra.gmra.mrb[0].mxu0 %v1035_v26 }
  0x27   : > { %568 = vmatprep.mubr.bf16.mxu0 %v1041_v27 }
  0x28   : > { %996 = vmatmul.mubr.bf16.vlgmr.msra.gmra.mrb[0].mxu1 %v1040_v28 }
  0x29   : > { %999 = vmatprep.mubr.bf16.mxu1 %v1047_v29 }
  0x2e   : > { %569 = vmatmul.mubr.bf16.gmra.mrb[4].mxu0 %v1043_v30 }
  0x2f   : > { %576 = vmatprep.mubr.bf16.mxu0 %v1044_v31 }
  0x30   : > { %1000 = vmatmul.mubr.bf16.gmra.mrb[4].mxu1 %v1048_v32 }
  0x36   : > { %577 = vmatmul.mubr.bf16.gmra.mrb[8].mxu0 %v1046_v33 }
  0x37   : > { %584 = vmatprep.mubr.bf16.mxu0 %v1049_v34 }
  0x3e   : > { %585 = vmatmul.mubr.bf16.gmra.mrb[12].mxu0 %v1051_v35 }
  0xf9   : > { %v943_v36 = vpop.f32.mrb[0].mxu0 }
  0xfa   : > { %v944_v37 = vpop.f32.mrb[1].mxu0 }
  0xfb   : > { %v945_v39 = vadd.f32 %v944_v37, %v943_v36  ;;  %v946_v40 = vpop.f32.mrb[2].mxu0  ;;  %v997_v42 = vpop.f32.mrb[0].mxu1 }
  0xfc   : > { %v947_v41 = vpop.f32.mrb[3].mxu0  ;;  %v627_v45 = vpop.f32.mrb[1].mxu1 }
  0xfd   : > { %v948_v43 = vadd.f32 %v947_v41, %v946_v40  ;;  %v563_v44 = vadd.f32 %v945_v39, %v1196_v38  ;;  %v998_v46 = vpop.f32.mrb[2].mxu1 }
  0xfe   : > { %v630_v49 = vpop.f32.mrb[3].mxu1 }
  0xff   : > { %v628_v47 = vadd.f32 %v627_v45, %v563_v44  ;;  %v566_v48 = vadd.f32 %v948_v43, %v1196_v38 }
 0x101   : > { %v631_v50 = vadd.f32 %v630_v49, %v566_v48  ;;  %v949_v51 = vpop.f32.mrb[4].mxu0  ;;  %v712_v52 = vmul.f32 %v628_v47, %v628_v47 }
 0x102   : > { %v950_v53 = vpop.f32.mrb[5].mxu0 }
 0x103   : > { %v907_v54 = vpack.c.bf16 %v631_v50, %v628_v47  ;;  %v698_v55 = vadd.f32 %v631_v50, %v628_v47  ;;  %v713_v56 = vmul.f32 %v631_v50, %v631_v50  ;;  %v951_v57 = vadd.f32 %v950_v53, %v949_v51  ;;  %v952_v58 = vpop.f32.mrb[6].mxu0  ;;  %v1001_v60 = vpop.f32.mrb[4].mxu1 }
 0x104   : > { %v953_v59 = vpop.f32.mrb[7].mxu0  ;;  %v643_v0 = vpop.f32.mrb[5].mxu1 }
 0x105   : > { %908 = vst [vmem:[%s1204_s8] sm:$0xff] %v907_v54   ;;  %v720_v61 = vadd.f32 %v713_v56, %v712_v52  ;;  %v571_v62 = vadd.f32 %v951_v57, %v1196_v38  ;;  %v954_v63 = vadd.f32 %v953_v59, %v952_v58  ;;  %v1002_v1 = vpop.f32.mrb[6].mxu1 }
 0x106   : > { %v646_v4 = vpop.f32.mrb[7].mxu1 }
 0x107   : > { %v636_v2 = vadd.f32 %v997_v42, %v571_v62  ;;  %v574_v3 = vadd.f32 %v954_v63, %v1196_v38 }
 0x109   : > { %v714_v5 = vmul.f32 %v636_v2, %v636_v2  ;;  %v639_v6 = vadd.f32 %v998_v46, %v574_v3  ;;  %v955_v7 = vpop.f32.mrb[8].mxu0  ;;  %v699_v8 = vadd.f32 %v698_v55, %v636_v2 }
 0x10a   : > { %v956_v9 = vpop.f32.mrb[9].mxu0 }
 0x10b   : > { %v912_v10 = vpack.c.bf16 %v639_v6, %v636_v2  ;;  %v715_v11 = vmul.f32 %v639_v6, %v639_v6  ;;  %v957_v12 = vadd.f32 %v956_v9, %v955_v7  ;;  %v958_v13 = vpop.f32.mrb[10].mxu0  ;;  %v700_v14 = vadd.f32 %v699_v8, %v639_v6 }
 0x10c   : > { %v959_v15 = vpop.f32.mrb[11].mxu0  ;;  %v721_v16 = vadd.f32 %v720_v61, %v714_v5 }
 0x10d   : > { %924 = vst [vmem:[%s1204_s8 + $0x8] sm:$0xff] %v912_v10   ;;  %v960_v17 = vadd.f32 %v959_v15, %v958_v13  ;;  %v579_v18 = vadd.f32 %v957_v12, %v1196_v38 }
 0x10e   : > { %v722_v19 = vadd.f32 %v721_v16, %v715_v11 }
 0x10f   : > { %v644_v20 = vadd.f32 %v643_v0, %v579_v18  ;;  %v582_v21 = vadd.f32 %v960_v17, %v1196_v38 }
 0x111   : > { %v701_v22 = vadd.f32 %v700_v14, %v644_v20  ;;  %v716_v23 = vmul.f32 %v644_v20, %v644_v20  ;;  %v647_v24 = vadd.f32 %v646_v4, %v582_v21  ;;  %v961_v25 = vpop.f32.mrb[12].mxu0 }
 0x112   : > { %v962_v26 = vpop.f32.mrb[13].mxu0 }
 0x113   : > { %v723_v27 = vadd.f32 %v722_v19, %v716_v23  ;;  %v917_v28 = vpack.c.bf16 %v647_v24, %v644_v20  ;;  %v702_v29 = vadd.f32 %v701_v22, %v647_v24  ;;  %v717_v30 = vmul.f32 %v647_v24, %v647_v24  ;;  %v964_v31 = vpop.f32.mrb[14].mxu0 }
 0x114   : > { %v963_v32 = vadd.f32 %v962_v26, %v961_v25  ;;  %v965_v33 = vpop.f32.mrb[15].mxu0 }
 0x115   : > { %925 = vst [vmem:[%s1204_s8 + $0x10] sm:$0xff] %v917_v28   ;;  %v724_v34 = vadd.f32 %v723_v27, %v717_v30  ;;  %v966_v35 = vadd.f32 %v965_v33, %v964_v31 }
 0x116   : > { %v587_v36 = vadd.f32 %v963_v32, %v1196_v38 }
 0x117   : > { %v590_v37 = vadd.f32 %v966_v35, %v1196_v38 }
 0x118   : > { %v652_v39 = vadd.f32 %v1001_v60, %v587_v36 }
 0x119   : > { %v655_v40 = vadd.f32 %v1002_v1, %v590_v37 }
 0x11a   : > { %v703_v41 = vadd.f32 %v702_v29, %v652_v39  ;;  %v718_v42 = vmul.f32 %v652_v39, %v652_v39 }
 0x11b   : > { %v922_v43 = vpack.c.bf16 %v655_v40, %v652_v39  ;;  %v719_v44 = vmul.f32 %v655_v40, %v655_v40 }
 0x11c   : > { %v725_v45 = vadd.f32 %v724_v34, %v718_v42  ;;  %v704_v46 = vadd.f32 %v703_v41, %v655_v40 }
 0x11d   : > { %926 = vst [vmem:[%s1204_s8 + $0x18] sm:$0xff] %v922_v43  }
 0x11e   : > { %v705_v47 = vrot.slane %v704_v46, 4  ;;  %v726_v48 = vadd.f32 %v725_v45, %v719_v44 }
 0x120   : > { %v706_v49 = vadd.f32 %v705_v47, %v704_v46  ;;  %v727_v50 = vrot.slane %v726_v48, 4 }
 0x122   : > { %v707_v51 = vrot.slane %v706_v49, 2  ;;  %v728_v52 = vadd.f32 %v727_v50, %v726_v48 }
 0x124   : > { %v708_v53 = vadd.f32 %v707_v51, %v706_v49  ;;  %v729_v38 = vrot.slane %v728_v52, 2 }
 0x126   : > { %v709_v54 = vrot.slane %v708_v53, 1  ;;  %v730_v55 = vadd.f32 %v729_v38, %v728_v52 }
 0x128   : > { %v710_v56 = vadd.f32 %v709_v54, %v708_v53  ;;  %v731_v57 = vrot.slane %v730_v55, 1 }
 0x12a   : > { %711 = vst [vmem:[%s244_s11] sm:$0x1] %v710_v56  ;;  %v732_v58 = vadd.f32 %v731_v57, %v730_v55 }
 0x12c   : > { %733 = vst [vmem:[%s247_s14] sm:$0x1] %v732_v58 }
 0x12d PF: > { %s16_s18 = sadd.s32 1, %s1058_s18  }
 0x12e   : > { %p13_p5 = scmp.ge.s32.totalorder %s16_s18, 4  }
 0x130   :  { %15 = sbr.rel (!%p13_p5) target bundleno = 1 (0x1), region = 86 }

// kernel: discriminator_forward.24
= control target key start
LH: loop header
LB: loop body
LE: loop exit
PB: predicated region body
PF: predicated region fallthrough
CT: control target
= control target key end

     0   :  { %s330_s12 = smov 0   ;;  %s353_s0 = inlined_call_operand.vmem [shape: bf16[32,128], index: 0, kind: input, shape index: {}]   ;;  %s354_s1 = inlined_call_operand.vmem [shape: f32[1,128], index: 1, kind: input, shape index: {}]   ;;  %s355_s2 = inlined_call_operand.vmem [shape: f32[1,128], index: 2, kind: input, shape index: {}]   ;;  %s356_s3 = inlined_call_operand.vmem [shape: bf16[32,128], index: 3, kind: output, shape index: {}]  }
   0x1 LB: > { %s268_s13 = sadd.s32 4294967295, %s308_s12   ;;  %p272_p0 = scmp.ge.s32.totalorder %s308_s12, 1  ;;  %s308_s12 = sphi %s330_s12, %s13_s12  }
   0x2   : > { %p138_p1 = scmp.lt.s32.totalorder %s308_s12, 3 }
   0x4   : > { %p139_p2 = pnand %p272_p0, %p138_p1 }
   0x5   : > { %s273_s14 = sshll.u32 (!%p139_p2), %s268_s13, 1  ;;  %v277_v1 = vld [vmem:[%s354_s1] ss:$0 sm:$0xff] (!%p139_p2) }
   0x6   : > { %142 = sbr.rel (%p139_p2) target bundleno = 29 (0x1d), region = 32  ;;  %p163_p3 = scmp.lt.s32.totalorder (!%p139_p2), %s273_s14, 3  ;;  %v278_v4 = vld [vmem:[%s355_s2] ss:$0 sm:$0xff] (!%p139_p2) }
   0xd   : > { %s358_s14 = smov (!%p163_p3, %s273_s14), 3 }
   0xe   : > { %s274_s15 = sshll.u32 %s358_s14, 2 }
   0xf   : > { %s166_s18 = scalar_lea.vmem %s353_s0, %s274_s15  ;;  %s172_s25 = scalar_lea.vmem %s356_s3, %s274_s15 }
  0x10   : > { %v286_v0 = vld [vmem:[%s166_s18] sm:$0xff]  }
  0x11   : > { %v287_v2 = vunpack.c.l.bf16 %v286_v0  ;;  %v288_v3 = vunpack.c.h.bf16 %v286_v0 }
  0x13   : > { %v185_v5 = vmul.f32 %v287_v2, %v277_v1  ;;  %v186_v6 = vmul.f32 %v288_v3, %v277_v1 }
  0x15   : > { %v194_v7 = vadd.f32 %v278_v4, %v185_v5  ;;  %v195_v8 = vadd.f32 %v278_v4, %v186_v6 }
  0x17   : > { %vm196_vm0 = vcmp.ge.f32.partialorder %v194_v7, 0.0  ;;  %vm197_vm1 = vcmp.ge.f32.partialorder %v195_v8, 0.0  ;;  %v198_v9 = vmul.f32 0.2, %v194_v7  ;;  %v199_v10 = vmul.f32 0.2, %v195_v8 }
  0x19   : > { %v200_v11 = vsel %vm196_vm0, %v194_v7, %v198_v9  ;;  %v201_v12 = vsel %vm197_vm1, %v195_v8, %v199_v10 }
  0x1a   : > { %v292_v13 = vpack.c.bf16 %v201_v12, %v200_v11 }
  0x1c   : > { %293 = vst [vmem:[%s172_s25] sm:$0xff] %v292_v13  }
  0x1d PF: > { %s13_s12 = sadd.s32 1, %s308_s12  }
  0x1e   : > { %p10_p4 = scmp.ge.s32.totalorder %s13_s12, 4  }
  0x20   :  { %12 = sbr.rel (!%p10_p4) target bundleno = 1 (0x1), region = 62 }

// kernel: discriminator_forward.23
= control target key start
LH: loop header
LB: loop body
LE: loop exit
PB: predicated region body
PF: predicated region fallthrough
CT: control target
= control target key end

     0   :  { %s939_s18 = smov 0   ;;  %s1070_s0 = inlined_call_operand.vmem [shape: bf16[32,512], index: 0, kind: input, shape index: {}]   ;;  %s1071_s1 = inlined_call_operand.vmem [shape: bf16[512,128], index: 1, kind: input, shape index: {}]   ;;  %s1072_s2 = inlined_call_operand.vmem [shape: f32[1,128], index: 2, kind: input, shape index: {}]   ;;  %s1073_s3 = inlined_call_operand.vmem [shape: bf16[32,128], index: 3, kind: output, shape index: {0}]   ;;  %s1074_s4 = inlined_call_operand.vmem [shape: f32[2,1,128], index: 4, kind: output, shape index: {1}]   ;;  %s1075_s5 = inlined_call_operand.vmem [shape: f32[2,1,128], index: 5, kind: output, shape index: {2}]  }
   0x1 LB: > { %s945_s19 = sadd.s32 4294967295, %s907_s18   ;;  %p756_p0 = scmp.ge.s32.totalorder %s907_s18, 1  ;;  %s907_s18 = sphi %s939_s18, %s16_s18  }
   0x2   : > { %p194_p1 = scmp.lt.s32.totalorder %s907_s18, 3 }
   0x4   : > { %p195_p2 = pnand %p756_p0, %p194_p1 }
   0x5   : > { %v863_v0 = vld [vmem:[%s1071_s1 + $0x40] sm:$0xff] (!%p195_p2)   ;;  %v867_v4 = vld [vmem:[%s1071_s1 + $0x48] sm:$0xff] (!%p195_p2)   ;;  %v871_v8 = vld [vmem:[%s1071_s1 + $0x50] sm:$0xff] (!%p195_p2)   ;;  %s757_s29 = sshll.u32 (!%p195_p2), %s945_s19, 1  ;;  %p242_p4 = scmp.lt.s32.totalorder (!%p195_p2), %s945_s19, 1 }
   0x6   : > { %198 = sbr.rel (%p195_p2) target bundleno = 277 (0x115), region = 32  ;;  %v864_v1 = vld [vmem:[%s1071_s1 + $0xc0] sm:$0xff] (!%p195_p2)   ;;  %811 = vmatprep.subr.bf16.mxu0 (!%p195_p2), %v863_v0  ;;  %v868_v5 = vld [vmem:[%s1071_s1 + $0xc8] sm:$0xff] (!%p195_p2)   ;;  %v872_v9 = vld [vmem:[%s1071_s1 + $0xd0] sm:$0xff] (!%p195_p2)   ;;  %p230_p3 = scmp.lt.s32.totalorder (!%p195_p2), %s757_s29, 3 }
   0x7   : > { %v865_v2 = vld [vmem:[%s1071_s1] sm:$0xff] (!%p195_p2)   ;;  %833 = vmatprep.subr.bf16.mxu1 (!%p195_p2), %v864_v1  ;;  %v869_v6 = vld [vmem:[%s1071_s1 + $0x8] sm:$0xff] (!%p195_p2)   ;;  %v873_v10 = vld [vmem:[%s1071_s1 + $0x10] sm:$0xff] (!%p195_p2)  }
   0x8   : > { %v866_v3 = vld [vmem:[%s1071_s1 + $0x80] sm:$0xff] (!%p195_p2)   ;;  %812 = vmatpush3.bf16.msra.mxu0 (!%p195_p2), %v865_v2  ;;  %v870_v7 = vld [vmem:[%s1071_s1 + $0x88] sm:$0xff] (!%p195_p2)   ;;  %v874_v11 = vld [vmem:[%s1071_s1 + $0x90] sm:$0xff] (!%p195_p2)  }
   0x9   : > { %834 = vmatpush3.bf16.msra.mxu1 (!%p195_p2), %v866_v3  ;;  %813 = vmatprep.subr.bf16.mxu0 (!%p195_p2), %v867_v4  ;;  %v875_v12 = vld [vmem:[%s1071_s1 + $0x58] sm:$0xff] (!%p195_p2)   ;;  %v879_v16 = vld [vmem:[%s1071_s1 + $0x60] sm:$0xff] (!%p195_p2)   ;;  %v883_v20 = vld [vmem:[%s1071_s1 + $0x68] sm:$0xff] (!%p195_p2)  }
   0xa   : > { %835 = vmatprep.subr.bf16.mxu1 (!%p195_p2), %v868_v5  ;;  %v876_v13 = vld [vmem:[%s1071_s1 + $0xd8] sm:$0xff] (!%p195_p2)   ;;  %v880_v17 = vld [vmem:[%s1071_s1 + $0xe0] sm:$0xff] (!%p195_p2)   ;;  %v884_v21 = vld [vmem:[%s1071_s1 + $0xe8] sm:$0xff] (!%p195_p2)  }
   0xb   : > { %v877_v14 = vld [vmem:[%s1071_s1 + $0x18] sm:$0xff] (!%p195_p2)   ;;  %v881_v18 = vld [vmem:[%s1071_s1 + $0x20] sm:$0xff] (!%p195_p2)   ;;  %v885_v22 = vld [vmem:[%s1071_s1 + $0x28] sm:$0xff] (!%p195_p2)  }
   0xc   : > { %814 = vmatpush3.bf16.msra.mxu0 (!%p195_p2), %v869_v6  ;;  %v878_v15 = vld [vmem:[%s1071_s1 + $0x98] sm:$0xff] (!%p195_p2)   ;;  %v882_v19 = vld [vmem:[%s1071_s1 + $0xa0] sm:$0xff] (!%p195_p2)   ;;  %v886_v23 = vld [vmem:[%s1071_s1 + $0xa8] sm:$0xff] (!%p195_p2)  }
   0xd   : > { %836 = vmatpush3.bf16.msra.mxu1 %v870_v7  ;;  %815 = vmatprep.subr.bf16.mxu0 %v871_v8  ;;  %s1077_s29 = smov (!%p230_p3, %s757_s29), 3  ;;  %v887_v24 = vld [vmem:[%s1071_s1 + $0x70] sm:$0xff]   ;;  %v891_v28 = vld [vmem:[%s1071_s1 + $0x78] sm:$0xff]   ;;  %v762_v38 = vld [vmem:[%s1072_s2] ss:$0 sm:$0xff]  ;;  %s1079_s19 = smov (!%p242_p4, %s945_s19), 1 }
   0xe   : > { %837 = vmatprep.subr.bf16.mxu1 %v872_v9  ;;  %v888_v25 = vld [vmem:[%s1071_s1 + $0xf0] sm:$0xff]   ;;  %s803_s30 = sshll.u32 %s1077_s29, 4  ;;  %v892_v29 = vld [vmem:[%s1071_s1 + $0xf8] sm:$0xff]   ;;  %s761_s23 = sshll.u32 %s1077_s29, 2 }
   0xf   : > { %v889_v26 = vld [vmem:[%s1071_s1 + $0x30] sm:$0xff]   ;;  %s234_s14 = scalar_lea.vmem %s1070_s0, %s803_s30  ;;  %v893_v30 = vld [vmem:[%s1071_s1 + $0x38] sm:$0xff]   ;;  %s240_s26 = scalar_lea.vmem %s1073_s3, %s761_s23 }
  0x10   : > { %816 = vmatpush3.bf16.msra.mxu0 %v873_v10  ;;  %v890_v27 = vld [vmem:[%s1071_s1 + $0xb0] sm:$0xff]   ;;  %v894_v31 = vld [vmem:[%s1071_s1 + $0xb8] sm:$0xff]   ;;  %s244_s28 = scalar_lea.vmem %s1074_s4, %s1079_s19  ;;  %s247_s7 = scalar_lea.vmem %s1075_s5, %s1079_s19 }
  0x11   : > { %838 = vmatpush3.bf16.msra.mxu1 %v874_v11  ;;  %817 = vmatprep.subr.bf16.mxu0 %v875_v12  ;;  %v895_v32 = vld [vmem:[%s234_s14] ss:$16 sps:$4 sm:$0xff]   ;;  %v897_v33 = vld [vmem:[%s234_s14 + $0x4] ss:$16 sps:$4 sm:$0xff]   ;;  %v898_v34 = vld [vmem:[%s234_s14 + $0x8] ss:$16 sps:$4 sm:$0xff]  }
  0x12   : > { %839 = vmatprep.subr.bf16.mxu1 %v876_v13  ;;  %v900_v35 = vld [vmem:[%s234_s14 + $0xc] ss:$16 sps:$4 sm:$0xff]   ;;  %568 = vmatprep.mubr.bf16.mxu0 %v897_v33 }
  0x13   : > { %609 = vmatprep.mubr.bf16.mxu1 %v900_v35 }
  0x14   : > { %818 = vmatpush3.bf16.msra.mxu0 %v877_v14 }
  0x15   : > { %840 = vmatpush3.bf16.msra.mxu1 %v878_v15  ;;  %819 = vmatprep.subr.bf16.mxu0 %v879_v16 }
  0x16   : > { %841 = vmatprep.subr.bf16.mxu1 %v880_v17 }
  0x18   : > { %820 = vmatpush3.bf16.msra.mxu0 %v881_v18 }
  0x19   : > { %842 = vmatpush3.bf16.msra.mxu1 %v882_v19  ;;  %821 = vmatprep.subr.bf16.mxu0 %v883_v20 }
  0x1a   : > { %843 = vmatprep.subr.bf16.mxu1 %v884_v21 }
  0x1c   : > { %822 = vmatpush3.bf16.msra.mxu0 %v885_v22 }
  0x1d   : > { %844 = vmatpush3.bf16.msra.mxu1 %v886_v23  ;;  %823 = vmatprep.subr.bf16.mxu0 %v887_v24 }
  0x1e   : > { %845 = vmatprep.subr.bf16.mxu1 %v888_v25 }
  0x20   : > { %824 = vmatpush3.bf16.msra.mxu0 %v889_v26 }
  0x21   : > { %846 = vmatpush3.bf16.msra.mxu1 %v890_v27  ;;  %825 = vmatprep.subr.bf16.mxu0 %v891_v28 }
  0x22   : > { %847 = vmatprep.subr.bf16.mxu1 %v892_v29 }
  0x24   : > { %826 = vmatpush3.bf16.msra.mxu0 %v893_v30 }
  0x25   : > { %848 = vmatpush3.bf16.msra.mxu1 %v894_v31 }
  0x27   : > { %569 = vmatmul.mubr.bf16.vlgmr.msra.gmra.mrb[0].mxu0 %v895_v32 }
  0x28   : > { %610 = vmatmul.mubr.bf16.vlgmr.msra.gmra.mrb[0].mxu1 %v898_v34 }
  0xfa   : > { %v827_v36 = vpop.f32.mrb[0].mxu0 }
  0xfb   : > { %v849_v37 = vpop.f32.mrb[0].mxu1  ;;  %v828_v39 = vpop.f32.mrb[1].mxu0 }
  0xfc   : > { %v829_v40 = vadd.f32 %v828_v39, %v827_v36  ;;  %v850_v41 = vpop.f32.mrb[1].mxu1  ;;  %v830_v42 = vpop.f32.mrb[2].mxu0 }
  0xfd   : > { %v851_v43 = vadd.f32 %v850_v41, %v849_v37  ;;  %v852_v44 = vpop.f32.mrb[2].mxu1  ;;  %v831_v45 = vpop.f32.mrb[3].mxu0 }
  0xfe   : > { %v571_v46 = vadd.f32 %v829_v40, %v762_v38  ;;  %v832_v47 = vadd.f32 %v831_v45, %v830_v42  ;;  %v853_v48 = vpop.f32.mrb[3].mxu1 }
  0xff   : > { %v854_v49 = vadd.f32 %v853_v48, %v852_v44 }
 0x100   : > { %v612_v50 = vadd.f32 %v851_v43, %v571_v46  ;;  %v574_v51 = vadd.f32 %v832_v47, %v762_v38 }
 0x102   : > { %v615_v52 = vadd.f32 %v854_v49, %v574_v51  ;;  %v636_v53 = vmul.f32 %v612_v50, %v612_v50 }
 0x104   : > { %v809_v54 = vpack.c.bf16 %v615_v52, %v612_v50  ;;  %v628_v55 = vadd.f32 %v615_v52, %v612_v50  ;;  %v637_v56 = vmul.f32 %v615_v52, %v615_v52 }
 0x106   : > { %810 = vst [vmem:[%s240_s26] sm:$0xff] %v809_v54   ;;  %v629_v57 = vrot.slane %v628_v55, 4  ;;  %v638_v58 = vadd.f32 %v637_v56, %v636_v53 }
 0x108   : > { %v630_v59 = vadd.f32 %v629_v57, %v628_v55  ;;  %v639_v60 = vrot.slane %v638_v58, 4 }
 0x10a   : > { %v631_v61 = vrot.slane %v630_v59, 2  ;;  %v640_v62 = vadd.f32 %v639_v60, %v638_v58 }
 0x10c   : > { %v632_v63 = vadd.f32 %v631_v61, %v630_v59  ;;  %v641_v0 = vrot.slane %v640_v62, 2 }
 0x10e   : > { %v633_v1 = vrot.slane %v632_v63, 1  ;;  %v642_v2 = vadd.f32 %v641_v0, %v640_v62 }
 0x110   : > { %v634_v3 = vadd.f32 %v633_v1, %v632_v63  ;;  %v643_v4 = vrot.slane %v642_v2, 1 }
 0x112   : > { %635 = vst [vmem:[%s244_s28] sm:$0x1] %v634_v3  ;;  %v644_v5 = vadd.f32 %v643_v4, %v642_v2 }
 0x114   : > { %645 = vst [vmem:[%s247_s7] sm:$0x1] %v644_v5 }
 0x115 PF: > { %s16_s18 = sadd.s32 1, %s907_s18  }
 0x116   : > { %p13_p5 = scmp.ge.s32.totalorder %s16_s18, 4  }
 0x118   :  { %15 = sbr.rel (!%p13_p5) target bundleno = 1 (0x1), region = 86 }

// kernel: discriminator_forward.27
= control target key start
LH: loop header
LB: loop body
LE: loop exit
PB: predicated region body
PF: predicated region fallthrough
CT: control target
= control target key end

     0   :  { %v26_v0 = vlaneseq  ;;  %v304_v1 = vmov 1983009808   ;;  %vm254_vm0 = vcmask 1041408   ;;  %vm296_vm1 = vcmask 1024   ;;  %s377_s2 = inlined_call_operand.<no memory space> [shape: f32[1,1], index: 2, kind: input, shape index: {}]   ;;  %s378_s1 = inlined_call_operand.vmem [shape: f32[1,2048], index: 1, kind: input, shape index: {}]   ;;  %s379_s0 = inlined_call_operand.vmem [shape: bf16[2,2048], index: 0, kind: input, shape index: {}]   ;;  %s380_s3 = inlined_call_operand.vmem [shape: f32[2,1], index: 3, kind: output, shape index: {}]  }
   0x1   :  { %v93_v2 = vunpack.c.l.s4 %v304_v1  ;;  %v8_v3 = vstv %s377_s2  ;;  %v22_v5 = vld [vmem:[%s378_s1] sm:$0xff]  ;;  %v23_v15 = vld [vmem:[%s378_s1 + $0x8] sm:$0xff] }
   0x2   :  { %9 = vst [vmem:[#allocation2] sm:$0x1] %v8_v3  ;;  %v27_v4 = vshrl.u32 %v26_v0, 7  ;;  %v16_v24 = vld [vmem:[%s379_s0] sm:$0xff]  ;;  %v17_v52 = vld [vmem:[%s379_s0 + $0x8] sm:$0xff] }
   0x3   :  { %v94_v6 = vunpack.c.0.s8 %v93_v2  ;;  %v18_v34 = vunpack.c.l.bf16 %v16_v24  ;;  %v19_v38 = vunpack.c.h.bf16 %v16_v24  ;;  %v20_v59 = vunpack.c.l.bf16 %v17_v52 }
   0x4   :  { %v28_v7 = vsub.s32 0, %v27_v4  ;;  %v32_v8 = vsub.s32 1, %v27_v4  ;;  %v36_v9 = vsub.s32 2, %v27_v4  ;;  %v40_v10 = vsub.s32 3, %v27_v4 }
   0x5   :  { %v44_v11 = vsub.s32 4, %v27_v4  ;;  %v48_v12 = vsub.s32 5, %v27_v4  ;;  %v52_v13 = vsub.s32 6, %v27_v4  ;;  %v56_v14 = vsub.s32 7, %v27_v4 }
   0x6   :  { %v29_v16 = vrot.slane %v22_v5, %v28_v7  ;;  %v33_v17 = vrot.slane %v22_v5, %v32_v8  ;;  %v37_v18 = vrot.slane %v22_v5, %v36_v9  ;;  %v41_v19 = vrot.slane %v22_v5, %v40_v10 }
   0x7   :  { %v45_v20 = vrot.slane %v22_v5, %v44_v11  ;;  %v49_v21 = vrot.slane %v22_v5, %v48_v12  ;;  %v53_v22 = vrot.slane %v22_v5, %v52_v13  ;;  %v57_v23 = vrot.slane %v22_v5, %v56_v14 }
   0x8   :  { %v61_v25 = vrot.slane %v23_v15, %v28_v7  ;;  %v65_v26 = vrot.slane %v23_v15, %v32_v8  ;;  %v69_v27 = vrot.slane %v23_v15, %v36_v9  ;;  %v73_v28 = vrot.slane %v23_v15, %v40_v10 }
   0x9   :  { %v90_v29 = vcombine.low %v29_v16, %v33_v17  ;;  %v91_v30 = vcombine.low %v37_v18, %v41_v19  ;;  %v337_v31 = vsub.s32 %v94_v6, %v27_v4  ;;  %v107_v32 = vcombine.low %v45_v20, %v49_v21 }
   0xa   :  { %v108_v33 = vcombine.low %v53_v22, %v57_v23  ;;  %v124_v40 = vcombine.low %v61_v25, %v65_v26  ;;  %v125_v41 = vcombine.low %v69_v27, %v73_v28  ;;  %v77_v43 = vrot.slane %v23_v15, %v44_v11 }
   0xb   :  { %v98_v35 = vrot.slane %v90_v29, %v337_v31  ;;  %v105_v36 = vrot.slane %v91_v30, %v337_v31  ;;  %v115_v37 = vrot.slane %v107_v32, %v337_v31  ;;  %v81_v45 = vrot.slane %v23_v15, %v48_v12 }
   0xc   :  { %v122_v39 = vrot.slane %v108_v33, %v337_v31  ;;  %v85_v46 = vrot.slane %v23_v15, %v52_v13  ;;  %v89_v47 = vrot.slane %v23_v15, %v56_v14  ;;  %v132_v49 = vrot.slane %v124_v40, %v337_v31 }
   0xd   :  { %v106_v42 = vcombine.low %v98_v35, %v105_v36  ;;  %v139_v50 = vrot.slane %v125_v41, %v337_v31  ;;  %v141_v55 = vcombine.low %v77_v43, %v81_v45  ;;  %v21_v12 = vunpack.c.h.bf16 %v17_v52 }
   0xe   :  { %v123_v44 = vcombine.low %v115_v37, %v122_v39  ;;  %v142_v56 = vcombine.low %v85_v46, %v89_v47 }
   0xf   :  { %v162_v48 = vmul.f32 %v106_v42, %v18_v34  ;;  %v140_v60 = vcombine.low %v132_v49, %v139_v50  ;;  %v149_v3 = vrot.slane %v141_v55, %v337_v31 }
  0x10   :  { %v163_v51 = vmul.f32 %v123_v44, %v19_v38  ;;  %v156_v4 = vrot.slane %v142_v56, %v337_v31 }
  0x11   :  { %v170_v53 = vcombine.high %v162_v48, %v162_v48  ;;  %v177_v54 = vrot.slane %v162_v48, %v337_v31  ;;  %v164_v6 = vmul.f32 %v140_v60, %v20_v59 }
  0x12   :  { %v187_v61 = vcombine.high %v163_v51, %v163_v51  ;;  %v194_v62 = vrot.slane %v163_v51, %v337_v31  ;;  %v157_v13 = vcombine.low %v149_v3, %v156_v4 }
  0x13   :  { %v184_v57 = vrot.slane %v170_v53, %v337_v31  ;;  %v185_v58 = vcombine.high %v177_v54, %v177_v54  ;;  %v255_v0 = vsel %vm254_vm0, %v177_v54, 0.0  ;;  %v204_v16 = vcombine.high %v164_v6, %v164_v6 }
  0x14   :  { %v201_v7 = vrot.slane %v187_v61, %v337_v31  ;;  %v202_v8 = vcombine.high %v194_v62, %v194_v62  ;;  %v262_v11 = vsel %vm254_vm0, %v194_v62, 0.0  ;;  %v211_v17 = vrot.slane %v164_v6, %v337_v31 }
  0x15   :  { %v186_v63 = vcombine.high %v184_v57, %v184_v57  ;;  %v256_v1 = vsel %vm254_vm0, %v185_v58, 0.0  ;;  %v258_v2 = vsel %vm254_vm0, %v184_v57, 0.0  ;;  %v165_v22 = vmul.f32 %v157_v13, %v21_v12 }
  0x16   :  { %v257_v5 = vadd.f32 %v256_v1, %v255_v0  ;;  %v203_v15 = vcombine.high %v201_v7, %v201_v7  ;;  %v264_v18 = vsel %vm254_vm0, %v202_v8, 0.0  ;;  %v266_v20 = vsel %vm254_vm0, %v201_v7, 0.0 }
  0x17   :  { %v260_v9 = vsel %vm254_vm0, %v186_v63, 0.0  ;;  %v218_v23 = vrot.slane %v204_v16, %v337_v31  ;;  %v219_v24 = vcombine.high %v211_v17, %v211_v17  ;;  %v270_v27 = vsel %vm254_vm0, %v211_v17, 0.0 }
  0x18   :  { %v259_v10 = vadd.f32 %v258_v2, %v257_v5  ;;  %v268_v25 = vsel %vm254_vm0, %v203_v15, 0.0  ;;  %v221_v30 = vcombine.high %v165_v22, %v165_v22  ;;  %v228_v32 = vrot.slane %v165_v22, %v337_v31 }
  0x19   :  { %v220_v29 = vcombine.high %v218_v23, %v218_v23  ;;  %v272_v33 = vsel %vm254_vm0, %v219_v24, 0.0  ;;  %v274_v35 = vsel %vm254_vm0, %v218_v23, 0.0 }
  0x1a   :  { %v261_v14 = vadd.f32 %v260_v9, %v259_v10  ;;  %v235_v37 = vrot.slane %v221_v30, %v337_v31  ;;  %v236_v38 = vcombine.high %v228_v32, %v228_v32  ;;  %v278_v41 = vsel %vm254_vm0, %v228_v32, 0.0  ;;  %v302_v31 = vld [vmem:[#allocation2] ss:$0 sm:$0xff] }
  0x1b   :  { %v276_v39 = vsel %vm254_vm0, %v220_v29, 0.0 }
  0x1c   :  { %v263_v19 = vadd.f32 %v262_v11, %v261_v14  ;;  %v237_v43 = vcombine.high %v235_v37, %v235_v37  ;;  %v280_v44 = vsel %vm254_vm0, %v236_v38, 0.0  ;;  %v282_v46 = vsel %vm254_vm0, %v235_v37, 0.0 }
  0x1e   :  { %v265_v21 = vadd.f32 %v264_v18, %v263_v19  ;;  %v284_v48 = vsel %vm254_vm0, %v237_v43, 0.0 }
  0x20   :  { %v267_v26 = vadd.f32 %v266_v20, %v265_v21 }
  0x22   :  { %v269_v28 = vadd.f32 %v268_v25, %v267_v26 }
  0x24   :  { %v271_v34 = vadd.f32 %v270_v27, %v269_v28 }
  0x26   :  { %v273_v36 = vadd.f32 %v272_v33, %v271_v34 }
  0x28   :  { %v275_v40 = vadd.f32 %v274_v35, %v273_v36 }
  0x2a   :  { %v277_v42 = vadd.f32 %v276_v39, %v275_v40 }
  0x2c   :  { %v279_v45 = vadd.f32 %v278_v41, %v277_v42 }
  0x2e   :  { %v281_v47 = vadd.f32 %v280_v44, %v279_v45 }
  0x30   :  { %v283_v49 = vadd.f32 %v282_v46, %v281_v47 }
  0x32   :  { %v285_v50 = vadd.f32 %v284_v48, %v283_v49 }
  0x34   :  { %286 = vadd.xlane.f32.xlu0 %v285_v50 }
  0xc1   :  { %v287_v51 = vpop.xlane.xlu0 %286 }
  0xc2   :  { %v295_v52 = vadd.f32 %v302_v31, %v287_v51 }
  0xc4   :  { %297 = vst.msk [vmem:[%s380_s3] sm:$0x3] %vm296_vm1, %v295_v52 }

// kernel: discriminator_forward.25
= control target key start
LH: loop header
LB: loop body
LE: loop exit
PB: predicated region body
PF: predicated region fallthrough
CT: control target
= control target key end

     0   :  { %s1102_s18 = smov 0   ;;  %s1264_s0 = inlined_call_operand.vmem [shape: bf16[32,640], index: 0, kind: input, shape index: {}]   ;;  %s1265_s1 = inlined_call_operand.vmem [shape: bf16[640,128], index: 1, kind: input, shape index: {}]   ;;  %s1266_s2 = inlined_call_operand.vmem [shape: f32[1,128], index: 2, kind: input, shape index: {}]   ;;  %s1267_s3 = inlined_call_operand.vmem [shape: bf16[32,128], index: 3, kind: output, shape index: {0}]   ;;  %s1268_s4 = inlined_call_operand.vmem [shape: f32[2,1,128], index: 4, kind: output, shape index: {1}]   ;;  %s1269_s5 = inlined_call_operand.vmem [shape: f32[2,1,128], index: 5, kind: output, shape index: {2}]  }
   0x1 LB: > { %s1108_s19 = sadd.s32 4294967295, %s1068_s18   ;;  %p869_p0 = scmp.ge.s32.totalorder %s1068_s18, 1  ;;  %s1068_s18 = sphi %s1102_s18, %s16_s18  }
   0x2   : > { %p194_p1 = scmp.lt.s32.totalorder %s1068_s18, 3 }
   0x4   : > { %p195_p2 = pnand %p869_p0, %p194_p1 }
   0x5   : > { %v1015_v0 = vld [vmem:[%s1265_s1 + $0x40] sm:$0xff] (!%p195_p2)   ;;  %v1019_v4 = vld [vmem:[%s1265_s1 + $0x48] sm:$0xff] (!%p195_p2)   ;;  %v1023_v8 = vld [vmem:[%s1265_s1 + $0x50] sm:$0xff] (!%p195_p2)   ;;  %s870_s25 = sshll.u32 (!%p195_p2), %s1108_s19, 1  ;;  %v1070_v33 = vmov (!%p195_p2), 0.0   ;;  %vm1071_vm0 = vmmov (!%p195_p2), 0  }
   0x6   : > { %198 = sbr.rel (%p195_p2) target bundleno = 303 (0x12f), region = 32  ;;  %v1016_v1 = vld [vmem:[%s1265_s1] sm:$0xff] (!%p195_p2)   ;;  %931 = vmatprep.subr.bf16.mxu0 (!%p195_p2), %v1015_v0  ;;  %v1020_v5 = vld [vmem:[%s1265_s1 + $0x8] sm:$0xff] (!%p195_p2)   ;;  %v1024_v9 = vld [vmem:[%s1265_s1 + $0x10] sm:$0xff] (!%p195_p2)   ;;  %p230_p3 = scmp.lt.s32.totalorder (!%p195_p2), %s870_s25, 3 }
   0x7   : > { %v1017_v2 = vld [vmem:[%s1265_s1 + $0xc0] sm:$0xff] (!%p195_p2)   ;;  %932 = vmatpush3.bf16.msra.mxu0 (!%p195_p2), %v1016_v1  ;;  %v1021_v6 = vld [vmem:[%s1265_s1 + $0xc8] sm:$0xff] (!%p195_p2)   ;;  %v1025_v10 = vld [vmem:[%s1265_s1 + $0xd0] sm:$0xff] (!%p195_p2)   ;;  %p242_p4 = scmp.lt.s32.totalorder (!%p195_p2), %s1108_s19, 1 }
   0x8   : > { %v1018_v3 = vld [vmem:[%s1265_s1 + $0x80] sm:$0xff] (!%p195_p2)   ;;  %953 = vmatprep.subr.bf16.mxu1 (!%p195_p2), %v1017_v2  ;;  %933 = vmatprep.subr.bf16.mxu0 (!%p195_p2), %v1019_v4  ;;  %v1022_v7 = vld [vmem:[%s1265_s1 + $0x88] sm:$0xff] (!%p195_p2)   ;;  %v1026_v11 = vld [vmem:[%s1265_s1 + $0x90] sm:$0xff] (!%p195_p2)  }
   0x9   : > { %954 = vmatpush3.bf16.msra.mxu1 (!%p195_p2), %v1018_v3  ;;  %v1027_v12 = vld [vmem:[%s1265_s1 + $0x58] sm:$0xff] (!%p195_p2)   ;;  %v1031_v16 = vld [vmem:[%s1265_s1 + $0x60] sm:$0xff] (!%p195_p2)   ;;  %v1035_v20 = vld [vmem:[%s1265_s1 + $0x68] sm:$0xff] (!%p195_p2)  }
   0xa   : > { %955 = vmatprep.subr.bf16.mxu1 (!%p195_p2), %v1021_v6  ;;  %v1028_v13 = vld [vmem:[%s1265_s1 + $0x18] sm:$0xff] (!%p195_p2)   ;;  %v1032_v17 = vld [vmem:[%s1265_s1 + $0x20] sm:$0xff] (!%p195_p2)   ;;  %v1036_v21 = vld [vmem:[%s1265_s1 + $0x28] sm:$0xff] (!%p195_p2)  }
   0xb   : > { %934 = vmatpush3.bf16.msra.mxu0 (!%p195_p2), %v1020_v5  ;;  %v1029_v14 = vld [vmem:[%s1265_s1 + $0xd8] sm:$0xff] (!%p195_p2)   ;;  %v1033_v18 = vld [vmem:[%s1265_s1 + $0xe0] sm:$0xff] (!%p195_p2)   ;;  %v1037_v22 = vld [vmem:[%s1265_s1 + $0xe8] sm:$0xff] (!%p195_p2)  }
   0xc   : > { %935 = vmatprep.subr.bf16.mxu0 (!%p195_p2), %v1023_v8  ;;  %v1030_v15 = vld [vmem:[%s1265_s1 + $0x98] sm:$0xff] (!%p195_p2)   ;;  %v1034_v19 = vld [vmem:[%s1265_s1 + $0xa0] sm:$0xff] (!%p195_p2)   ;;  %v1038_v23 = vld [vmem:[%s1265_s1 + $0xa8] sm:$0xff] (!%p195_p2)  }
   0xd   : > { %956 = vmatpush3.bf16.msra.mxu1 %v1022_v7  ;;  %s1271_s25 = smov (!%p230_p3, %s870_s25), 3  ;;  %v1039_v24 = vld [vmem:[%s1265_s1 + $0x70] sm:$0xff]   ;;  %v1043_v28 = vld [vmem:[%s1265_s1 + $0x78] sm:$0xff]   ;;  %v1053_v37 = vld [vmem:[%s1265_s1 + $0x100] sm:$0xff]   ;;  %s1273_s19 = smov (!%p242_p4, %s1108_s19), 1 }
   0xe   : > { %957 = vmatprep.subr.bf16.mxu1 %v1025_v10  ;;  %s1004_s26 = smul.u32 20, %s1271_s25  ;;  %v1040_v25 = vld [vmem:[%s1265_s1 + $0x30] sm:$0xff]   ;;  %v1044_v29 = vld [vmem:[%s1265_s1 + $0x38] sm:$0xff]   ;;  %v1054_v38 = vld [vmem:[%s1265_s1 + $0x108] sm:$0xff]   ;;  %s244_s22 = scalar_lea.vmem %s1268_s4, %s1273_s19 }
   0xf   : > { %936 = vmatpush3.bf16.msra.mxu0 %v1024_v9  ;;  %v1041_v26 = vld [vmem:[%s1265_s1 + $0xf0] sm:$0xff]   ;;  %v1045_v30 = vld [vmem:[%s1265_s1 + $0xf8] sm:$0xff]   ;;  %v1057_v41 = vld [vmem:[%s1265_s1 + $0x120] sm:$0xff]  }
  0x10   : > { %937 = vmatprep.subr.bf16.mxu0 %v1027_v12  ;;  %v1042_v27 = vld [vmem:[%s1265_s1 + $0xb0] sm:$0xff]   ;;  %s1206_s12 = scalar_lea.vmem %s1264_s0, %s1004_s26  ;;  %v1049_v34 = vld [vmem:[%s1265_s1 + $0xb8] sm:$0xff]   ;;  %v1058_v42 = vld [vmem:[%s1265_s1 + $0x128] sm:$0xff]   ;;  %s247_s26 = scalar_lea.vmem %s1269_s5, %s1273_s19 }
  0x11   : > { %958 = vmatpush3.bf16.msra.mxu1 %v1026_v11  ;;  %v1046_v31 = vld [vmem:[%s1206_s12] ss:$20 sps:$4 sm:$0xff]   ;;  %v1048_v32 = vld [vmem:[%s1206_s12 + $0x4] ss:$20 sps:$4 sm:$0xff]   ;;  %v1050_v35 = vld [vmem:[%s1206_s12 + $0x8] ss:$20 sps:$4 sm:$0xff]  }
  0x12   : > { %959 = vmatprep.subr.bf16.mxu1 %v1029_v14  ;;  %640 = vmatprep.mubr.bf16.mxu0 %v1048_v32  ;;  %v1052_v36 = vld [vmem:[%s1206_s12 + $0xc] ss:$20 sps:$4 sm:$0xff]   ;;  %v1055_v39 = vld [vmem:[%s1265_s1 + $0x110] sm:$0xff]   ;;  %v1056_v40 = vld [vmem:[%s1265_s1 + $0x118] sm:$0xff]  }
  0x13   : > { %938 = vmatpush3.bf16.msra.mxu0 %v1028_v13  ;;  %681 = vmatprep.mubr.bf16.mxu1 %v1052_v36  ;;  %v1059_v43 = vld [vmem:[%s1265_s1 + $0x130] sm:$0xff]   ;;  %v1060_v44 = vld [vmem:[%s1265_s1 + $0x138] sm:$0xff]   ;;  %v874_v47 = vld [vmem:[%s1266_s2] ss:$0 sm:$0xff] }
  0x14   : > { %939 = vmatprep.subr.bf16.mxu0 %v1031_v16  ;;  %v1061_v45 = vld [vmem:[%s1206_s12 + $0x10] ss:$20 sps:$4 sm:$0xff]   ;;  %s873_s12 = sshll.u32 %s1271_s25, 2 }
  0x15   : > { %960 = vmatpush3.bf16.msra.mxu1 %v1030_v15  ;;  %s240_s20 = scalar_lea.vmem %s1267_s3, %s873_s12 }
  0x16   : > { %961 = vmatprep.subr.bf16.mxu1 %v1033_v18 }
  0x17   : > { %940 = vmatpush3.bf16.msra.mxu0 %v1032_v17 }
  0x18   : > { %941 = vmatprep.subr.bf16.mxu0 %v1035_v20 }
  0x19   : > { %962 = vmatpush3.bf16.msra.mxu1 %v1034_v19 }
  0x1a   : > { %963 = vmatprep.subr.bf16.mxu1 %v1037_v22 }
  0x1b   : > { %942 = vmatpush3.bf16.msra.mxu0 %v1036_v21 }
  0x1c   : > { %943 = vmatprep.subr.bf16.mxu0 %v1039_v24 }
  0x1d   : > { %964 = vmatpush3.bf16.msra.mxu1 %v1038_v23 }
  0x1e   : > { %965 = vmatprep.subr.bf16.mxu1 %v1041_v26 }
  0x1f   : > { %944 = vmatpush3.bf16.msra.mxu0 %v1040_v25 }
  0x20   : > { %945 = vmatprep.subr.bf16.mxu0 %v1043_v28 }
  0x21   : > { %966 = vmatpush3.bf16.msra.mxu1 %v1042_v27 }
  0x22   : > { %967 = vmatprep.subr.bf16.mxu1 %v1045_v30 }
  0x23   : > { %946 = vmatpush3.bf16.msra.mxu0 %v1044_v29 }
  0x24   : > { %984 = vmatprep.subr.bf16.mxu0 %v1070_v33 }
  0x25   : > { %968 = vmatpush3.bf16.msra.mxu1 %v1049_v34 }
  0x26   : > { %641 = vmatmul.mubr.bf16.vlgmr.msra.gmra.mrb[0].mxu0 %v1046_v31 }
  0x27   : > { %1000 = vmatprep.mubr.msk.bf16.mxu0 %vm1071_vm0, %v1070_v33  ;;  %985 = vmatpush3.bf16.msra.mxu0 %v1053_v37 }
  0x28   : > { %682 = vmatmul.mubr.bf16.vlgmr.msra.gmra.mrb[0].mxu1 %v1050_v35  ;;  %986 = vmatprep.subr.bf16.mxu0 %v1070_v33 }
  0x2b   : > { %987 = vmatpush3.bf16.msra.mxu0 %v1054_v38 }
  0x2c   : > { %988 = vmatprep.subr.bf16.mxu0 %v1070_v33 }
  0x2f   : > { %989 = vmatpush3.bf16.msra.mxu0 %v1055_v39 }
  0x30   : > { %990 = vmatprep.subr.bf16.mxu0 %v1070_v33 }
  0x33   : > { %991 = vmatpush3.bf16.msra.mxu0 %v1056_v40 }
  0x34   : > { %992 = vmatprep.subr.bf16.mxu0 %v1070_v33 }
  0x37   : > { %993 = vmatpush3.bf16.msra.mxu0 %v1057_v41 }
  0x38   : > { %994 = vmatprep.subr.bf16.mxu0 %v1070_v33 }
  0x3b   : > { %995 = vmatpush3.bf16.msra.mxu0 %v1058_v42 }
  0x3c   : > { %996 = vmatprep.subr.bf16.mxu0 %v1070_v33 }
  0x3f   : > { %997 = vmatpush3.bf16.msra.mxu0 %v1059_v43 }
  0x40   : > { %998 = vmatprep.subr.bf16.mxu0 %v1070_v33 }
  0x43   : > { %999 = vmatpush3.bf16.msra.mxu0 %v1060_v44 }
  0x46   : > { %1001 = vmatmul.mubr.bf16.vlgmr.msra.gmra.mrb[4].mxu0 %v1061_v45 }
  0xf9   : > { %v947_v46 = vpop.f32.mrb[0].mxu0 }
  0xfa   : > { %v948_v48 = vpop.f32.mrb[1].mxu0 }
  0xfb   : > { %v949_v49 = vadd.f32 %v948_v48, %v947_v46  ;;  %v950_v50 = vpop.f32.mrb[2].mxu0  ;;  %v969_v51 = vpop.f32.mrb[0].mxu1 }
  0xfc   : > { %v951_v52 = vpop.f32.mrb[3].mxu0  ;;  %v970_v55 = vpop.f32.mrb[1].mxu1 }
  0xfd   : > { %v643_v53 = vadd.f32 %v949_v49, %v874_v47  ;;  %v952_v54 = vadd.f32 %v951_v52, %v950_v50  ;;  %v971_v56 = vadd.f32 %v970_v55, %v969_v51  ;;  %v972_v57 = vpop.f32.mrb[2].mxu1 }
  0xfe   : > { %v973_v59 = vpop.f32.mrb[3].mxu1 }
  0xff   : > { %v646_v58 = vadd.f32 %v952_v54, %v874_v47  ;;  %v974_v60 = vadd.f32 %v973_v59, %v972_v57  ;;  %v684_v61 = vadd.f32 %v971_v56, %v643_v53 }
 0x101   : > { %v687_v62 = vadd.f32 %v974_v60, %v646_v58 }
 0x119   : > { %v724_v63 = vpop.f32.mrb[4].mxu0 }
 0x11a   : > { %v725_v0 = vadd.f32 %v724_v63, %v684_v61  ;;  %v1002_v1 = vpop.f32.mrb[5].mxu0 }
 0x11b   : > { %v727_v2 = vpop.f32.mrb[6].mxu0 }
 0x11c   : > { %v728_v3 = vadd.f32 %v727_v2, %v687_v62  ;;  %v1003_v4 = vpop.f32.mrb[7].mxu0  ;;  %v749_v5 = vmul.f32 %v725_v0, %v725_v0 }
 0x11e   : > { %v929_v6 = vpack.c.bf16 %v728_v3, %v725_v0  ;;  %v741_v7 = vadd.f32 %v728_v3, %v725_v0  ;;  %v750_v8 = vmul.f32 %v728_v3, %v728_v3 }
 0x120   : > { %930 = vst [vmem:[%s240_s20] sm:$0xff] %v929_v6   ;;  %v742_v9 = vrot.slane %v741_v7, 4  ;;  %v751_v10 = vadd.f32 %v750_v8, %v749_v5 }
 0x122   : > { %v743_v11 = vadd.f32 %v742_v9, %v741_v7  ;;  %v752_v12 = vrot.slane %v751_v10, 4 }
 0x124   : > { %v744_v13 = vrot.slane %v743_v11, 2  ;;  %v753_v14 = vadd.f32 %v752_v12, %v751_v10 }
 0x126   : > { %v745_v15 = vadd.f32 %v744_v13, %v743_v11  ;;  %v754_v16 = vrot.slane %v753_v14, 2 }
 0x128   : > { %v746_v17 = vrot.slane %v745_v15, 1  ;;  %v755_v18 = vadd.f32 %v754_v16, %v753_v14 }
 0x12a   : > { %v747_v19 = vadd.f32 %v746_v17, %v745_v15  ;;  %v756_v20 = vrot.slane %v755_v18, 1 }
 0x12c   : > { %748 = vst [vmem:[%s244_s22] sm:$0x1] %v747_v19  ;;  %v757_v21 = vadd.f32 %v756_v20, %v755_v18 }
 0x12e   : > { %758 = vst [vmem:[%s247_s26] sm:$0x1] %v757_v21 }
 0x12f PF: > { %s16_s18 = sadd.s32 1, %s1068_s18  }
 0x130   : > { %p13_p5 = scmp.ge.s32.totalorder %s16_s18, 4  }
 0x132   :  { %15 = sbr.rel (!%p13_p5) target bundleno = 1 (0x1), region = 86 }

</bundles_post_ra>
